<compile_context>
chip_gen: v7x
topology: tpu7x:2x2x1
jax: 0.10.0
libtpu: 0.0.40
codegen_flags: <defaults>
</compile_context>

<pallas_src>
import functools

import jax
import jax.numpy as jnp
from jax import lax
from jax.experimental import pallas as pl
from jax.experimental.pallas import tpu as pltpu


# --------------------------------------------------------------------------
# Kernel
# --------------------------------------------------------------------------
def rpn_head_kernel(x_ref, wconv_ref, bconv_ref, whead_ref, bhead_ref, out_ref):
    """One (image, row-tile) step of the fused RPN head.

    x_ref:     (1, TH+2, W+2, C)  bf16  zero-padded NHWC halo slab
    wconv_ref: (9, C, C)          bf16  wconv_ref[3*dy+dx][i, o] = w3x3[o, i, dy, dx]
    bconv_ref: (1, C)             f32
    whead_ref: (C, A + 4A)        bf16  columns [:A]=objectness, [A:]=anchor deltas
    bhead_ref: (1, A + 4A)        f32
    out_ref:   (1, TH, W, A + 4A)       fused head output tile
    """
    TH = out_ref.shape[1]
    W = out_ref.shape[2]
    C = bconv_ref.shape[1]
    n_head = out_ref.shape[3]
    M = TH * W

    # 3x3 "same" conv as 9 shifted (M, C) x (C, C) MXU matmuls with bf16
    # operands and an f32 accumulator.
    acc = jnp.zeros((M, C), jnp.float32)
    for dy in range(3):
        for dx in range(3):
            patch = x_ref[0, dy:dy + TH, dx:dx + W, :].reshape(M, C)
            acc = acc + jnp.dot(patch, wconv_ref[3 * dy + dx],
                                preferred_element_type=jnp.float32)

    # Bias + ReLU in f32 on the accumulator.
    t = jnp.maximum(acc + bconv_ref[...], 0.0)               # (M, C) f32

    # Both 1x1 heads fused into one matmul over the conv activation (bf16
    # operands, f32 accumulation), then one store of the fused result.
    heads = jnp.dot(t.astype(jnp.bfloat16), whead_ref[...],
                    preferred_element_type=jnp.float32) + bhead_ref[...]
    out_ref[...] = heads.reshape(1, TH, W, n_head).astype(out_ref.dtype)


# --------------------------------------------------------------------------
# Wrapper
# --------------------------------------------------------------------------
def _choose_row_tile(H, W, C, n_head, budget_bytes=28 * 1024 * 1024,
                     max_rows=64):
    """Largest row tile TH (TH | H, TH <= max_rows) fitting the VMEM budget.

    The budget is kept conservative (~28 MiB of activations) so the same tile
    choice stays comfortably inside v7x's 64 MiB physical VMEM as well as the
    raised scoped limit on v5e/v6e.
    """
    def vmem_bytes(th):
        x_slab = 2 * (th + 2) * (W + 2) * C * 2    # double-buffered bf16 input
        out_bl = 2 * th * W * n_head * 4           # double-buffered output tile
        accum = th * W * C * 4                     # f32 conv accumulator
        work = 2 * th * W * C * 2                  # bf16 patch / activation temps
        return x_slab + out_bl + accum + work

    divisors = [d for d in range(1, H + 1) if H % d == 0 and d <= max_rows]
    fitting = [d for d in divisors if vmem_bytes(d) <= budget_bytes]
    return fitting[-1] if fitting else divisors[0]


@functools.partial(jax.jit, static_argnames=("num_anchors",))
def rpn_head_level(x, wconv, bconv, whead, bhead, *, num_anchors):
    """RPN head on one NCHW feature level. Returns (cls, box) in NCHW."""
    N, C, H, W = x.shape
    A = num_anchors
    n_head = whead.shape[1]                         # A + box_dim * A

    TH = _choose_row_tile(H, W, C, n_head)
    R = H // TH

    # NCHW -> NHWC, zero-pad the 3x3 halo, cast to bf16 and cut R overlapping
    # (TH+2)-row slabs.  Under jit this fuses into one XLA data-movement pass
    # (which doubles as the bf16 cast); duplicating the 2 halo rows per slab is
    # what lets plain BlockSpec double-buffering pipeline the DMA.
    xp = jnp.pad(jnp.transpose(x, (0, 2, 3, 1)),
                 ((0, 0), (1, 1), (1, 1), (0, 0))).astype(jnp.bfloat16)
    x_tiles = jnp.stack(
        [xp[:, r * TH:r * TH + TH + 2, :, :] for r in range(R)], axis=1,
    ).reshape(N * R, TH + 2, W + 2, C)

    out = pl.pallas_call(
        rpn_head_kernel,
        out_shape=jax.ShapeDtypeStruct((N, H, W, n_head), x.dtype),
        grid=(N, R),
        in_specs=[
            # Per-step halo slab (double-buffered by the Pallas pipeline).
            pl.BlockSpec((1, TH + 2, W + 2, C),
                         lambda n, r: (n * R + r, 0, 0, 0)),
            # Weights / biases: constant block index -> fetched once and kept
            # resident across the whole grid.
            pl.BlockSpec((9, C, C), lambda n, r: (0, 0, 0)),
            pl.BlockSpec((1, C), lambda n, r: (0, 0)),
            pl.BlockSpec((C, n_head), lambda n, r: (0, 0)),
            pl.BlockSpec((1, n_head), lambda n, r: (0, 0)),
        ],
        out_specs=pl.BlockSpec((1, TH, W, n_head), lambda n, r: (n, r, 0, 0)),
        compiler_params=pltpu.CompilerParams(
            # Both axes are fully independent -> megacore sharding keeps both
            # v7x TensorCores busy even at batch 1.
            dimension_semantics=("parallel", "parallel"),
            # Tile chooser targets <=~30 MiB; 48 MiB leaves headroom on every
            # generation (v7x physical VMEM is 64 MiB).
            vmem_limit_bytes=48 * 1024 * 1024),
    )(x_tiles, wconv, bconv, whead, bhead)

    # Cheap post-pass over the small (A + 4A channel) outputs only.
    cls = jnp.transpose(out[..., :A], (0, 3, 1, 2))
    box = jnp.transpose(out[..., A:], (0, 3, 1, 2))
    return cls, box


def rpn_head_forward(features_nchw, params, num_anchors):
    """Mirrors RPNHead.forward: returns (rpn_cls_score, rpn_bbox_pred) lists."""
    rpn_cls_score, rpn_bbox_pred = [], []
    for x in features_nchw:
        cls, box = rpn_head_level(x, params["wconv"], params["bconv"],
                                  params["whead"], params["bhead"],
                                  num_anchors=num_anchors)
        rpn_cls_score.append(cls)
        rpn_bbox_pred.append(box)
    return rpn_cls_score, rpn_bbox_pred


# --------------------------------------------------------------------------
# Parameters (PyTorch-layout raw params + packing into the kernel layout)
# --------------------------------------------------------------------------
def init_raw_params(key, in_channels, num_anchors, box_dim=4):
    """Raw f32 params in PyTorch layout (OIHW conv, (out, in) linear weights).

    The module uses std=0.01 normal weights and zero biases; we use small
    nonzero biases here so the self-check also exercises the bias path.
    """
    C, A = in_channels, num_anchors
    k1, k2, k3, k4, k5, k6 = jax.random.split(key, 6)
    return dict(
        wconv=0.01 * jax.random.normal(k1, (C, C, 3, 3), jnp.float32),
        bconv=0.01 * jax.random.normal(k2, (C,), jnp.float32),
        wcls=0.01 * jax.random.normal(k3, (A, C), jnp.float32),
        bcls=0.01 * jax.random.normal(k4, (A,), jnp.float32),
        wbox=0.01 * jax.random.normal(k5, (box_dim * A, C), jnp.float32),
        bbox=0.01 * jax.random.normal(k6, (box_dim * A,), jnp.float32),
    )


def pack_params(raw):
    """Pack f32 OIHW params into the kernel's bf16 matmul layout."""
    wconv = raw["wconv"]                              # (Cout, Cin, 3, 3)
    C = wconv.shape[0]
    # wpack[3*dy+dx, i, o] = wconv[o, i, dy, dx]
    wpack = jnp.transpose(wconv, (2, 3, 1, 0)).reshape(9, C, C)
    whead = jnp.concatenate([raw["wcls"], raw["wbox"]], axis=0).T   # (C, 5A)
    bhead = jnp.concatenate([raw["bcls"], raw["bbox"]])[None, :]    # (1, 5A)
    return dict(
        wconv=wpack.astype(jnp.bfloat16),
        bconv=raw["bconv"][None, :].astype(jnp.float32),            # (1, C)
        whead=whead.astype(jnp.bfloat16),
        bhead=bhead.astype(jnp.float32),
    )


# --------------------------------------------------------------------------
# Pure-JAX reference (f32, lax conv) for correctness checking
# --------------------------------------------------------------------------
def _reference_level(x_nchw, raw):
    dn = ("NCHW", "OIHW", "NCHW")
    t = lax.conv_general_dilated(x_nchw, raw["wconv"], (1, 1), "SAME",
                                 dimension_numbers=dn)
    t = jnp.maximum(t + raw["bconv"][None, :, None, None], 0.0)
    cls = (jnp.einsum("ac,nchw->nahw", raw["wcls"], t)
           + raw["bcls"][None, :, None, None])
    box = (jnp.einsum("ac,nchw->nahw", raw["wbox"], t)
           + raw["bbox"][None, :, None, None])
    return cls, box


if __name__ == "__main__":
    key = jax.random.PRNGKey(0)
    kp, kf1, kf2, kf3 = jax.random.split(key, 4)

    in_channels = 4
    num_anchors = 3
    box_dim = 4

    raw = init_raw_params(kp, in_channels, num_anchors, box_dim)
    params = pack_params(raw)

    # Small NCHW FPN levels; the third one is tall enough to force R > 1 row
    # tiles so the halo/tiling path is exercised too.
    features = [
        jax.random.normal(kf1, (2, in_channels, 16, 16), jnp.float32),
        jax.random.normal(kf2, (2, in_channels, 8, 8), jnp.float32),
        jax.random.normal(kf3, (1, in_channels, 128, 32), jnp.float32),
    ]

    cls_scores, bbox_preds = rpn_head_forward(features, params, num_anchors)
    for t in cls_scores + bbox_preds:
        jax.block_until_ready(t)

    # Self-check against the f32 reference (bf16 operands -> loose tolerance).
    for x, cls, box in zip(features, cls_scores, bbox_preds):
        ref_cls, ref_box = _reference_level(x, raw)
        assert cls.shape == ref_cls.shape and box.shape == ref_box.shape
        assert jnp.allclose(cls, ref_cls, atol=1e-3, rtol=1e-2), \
            float(jnp.max(jnp.abs(cls - ref_cls)))
        assert jnp.allclose(box, ref_box, atol=1e-3, rtol=1e-2), \
            float(jnp.max(jnp.abs(box - ref_box)))

    print("KERNEL_OK")
</pallas_src>

<mosaic_0001>
module attributes {stable_mosaic.version = 11 : i64} {
  func.func @rpn_head_kernel(%arg0: i32, %arg1: i32, %arg2: memref<1x18x18x4xbf16, #tpu.memory_space<vmem>>, %arg3: memref<9x4x4xbf16, #tpu.memory_space<vmem>>, %arg4: memref<1x4xf32, #tpu.memory_space<vmem>>, %arg5: memref<4x15xbf16, #tpu.memory_space<vmem>>, %arg6: memref<1x15xf32, #tpu.memory_space<vmem>>, %arg7: memref<1x16x16x15xf32, #tpu.memory_space<vmem>>) attributes {dimension_semantics = [#tpu.dimension_semantics<parallel>, #tpu.dimension_semantics<parallel>], iteration_bounds = array<i64: 2, 1>, scalar_prefetch = 0 : i64, scratch_operands = 0 : i64, tpu.core_type = #tpu.core_type<tc>, window_params = [{transform_indices = @transform_0, window_bounds = array<i64: 1, 18, 18, 4>}, {pipeline_mode = #tpu.pipeline_mode<synchronous>, transform_indices = @transform_1, window_bounds = array<i64: 9, 4, 4>}, {pipeline_mode = #tpu.pipeline_mode<synchronous>, transform_indices = @transform_2, window_bounds = array<i64: 1, 4>}, {pipeline_mode = #tpu.pipeline_mode<synchronous>, transform_indices = @transform_3, window_bounds = array<i64: 4, 15>}, {pipeline_mode = #tpu.pipeline_mode<synchronous>, transform_indices = @transform_4, window_bounds = array<i64: 1, 15>}, {transform_indices = @transform_5, window_bounds = array<i64: 1, 16, 16, 15>}]} {
    %cst = arith.constant 0.000000e+00 : f32
    %0 = vector.broadcast %cst : f32 to vector<256x4xf32>
    %c0 = arith.constant 0 : index
    %c0_0 = arith.constant 0 : index
    %c0_1 = arith.constant 0 : index
    %c0_2 = arith.constant 0 : index
    %1 = vector.load %arg2[%c0, %c0_0, %c0_1, %c0_2] : memref<1x18x18x4xbf16, #tpu.memory_space<vmem>>, vector<1x16x16x4xbf16>
    %2 = vector.shape_cast %1 : vector<1x16x16x4xbf16> to vector<16x16x4xbf16>
    %3 = vector.shape_cast %2 : vector<16x16x4xbf16> to vector<256x4xbf16>
    %c0_3 = arith.constant 0 : index
    %c0_4 = arith.constant 0 : index
    %c0_5 = arith.constant 0 : index
    %4 = vector.load %arg3[%c0_3, %c0_4, %c0_5] : memref<9x4x4xbf16, #tpu.memory_space<vmem>>, vector<1x4x4xbf16>
    %5 = vector.shape_cast %4 : vector<1x4x4xbf16> to vector<4x4xbf16>
    %cst_6 = arith.constant dense<0.000000e+00> : vector<256x4xf32>
    %6 = tpu.matmul %3, %5, %cst_6 {dimension_numbers = #tpu.dot_dimension_numbers<[1], [0], [0], [1], [0, 0, 1, 1], [], []>} : vector<256x4xbf16>, vector<4x4xbf16>, vector<256x4xf32> -> vector<256x4xf32>
    %7 = arith.addf %0, %6 : vector<256x4xf32>
    %c0_7 = arith.constant 0 : index
    %c0_8 = arith.constant 0 : index
    %c1 = arith.constant 1 : index
    %c0_9 = arith.constant 0 : index
    %8 = vector.load %arg2[%c0_7, %c0_8, %c1, %c0_9] : memref<1x18x18x4xbf16, #tpu.memory_space<vmem>>, vector<1x16x16x4xbf16>
    %9 = vector.shape_cast %8 : vector<1x16x16x4xbf16> to vector<16x16x4xbf16>
    %10 = vector.shape_cast %9 : vector<16x16x4xbf16> to vector<256x4xbf16>
    %c1_10 = arith.constant 1 : index
    %c0_11 = arith.constant 0 : index
    %c0_12 = arith.constant 0 : index
    %11 = vector.load %arg3[%c1_10, %c0_11, %c0_12] : memref<9x4x4xbf16, #tpu.memory_space<vmem>>, vector<1x4x4xbf16>
    %12 = vector.shape_cast %11 : vector<1x4x4xbf16> to vector<4x4xbf16>
    %cst_13 = arith.constant dense<0.000000e+00> : vector<256x4xf32>
    %13 = tpu.matmul %10, %12, %cst_13 {dimension_numbers = #tpu.dot_dimension_numbers<[1], [0], [0], [1], [0, 0, 1, 1], [], []>} : vector<256x4xbf16>, vector<4x4xbf16>, vector<256x4xf32> -> vector<256x4xf32>
    %14 = arith.addf %7, %13 : vector<256x4xf32>
    %c0_14 = arith.constant 0 : index
    %c0_15 = arith.constant 0 : index
    %c2 = arith.constant 2 : index
    %c0_16 = arith.constant 0 : index
    %15 = vector.load %arg2[%c0_14, %c0_15, %c2, %c0_16] : memref<1x18x18x4xbf16, #tpu.memory_space<vmem>>, vector<1x16x16x4xbf16>
    %16 = vector.shape_cast %15 : vector<1x16x16x4xbf16> to vector<16x16x4xbf16>
    %17 = vector.shape_cast %16 : vector<16x16x4xbf16> to vector<256x4xbf16>
    %c2_17 = arith.constant 2 : index
    %c0_18 = arith.constant 0 : index
    %c0_19 = arith.constant 0 : index
    %18 = vector.load %arg3[%c2_17, %c0_18, %c0_19] : memref<9x4x4xbf16, #tpu.memory_space<vmem>>, vector<1x4x4xbf16>
    %19 = vector.shape_cast %18 : vector<1x4x4xbf16> to vector<4x4xbf16>
    %cst_20 = arith.constant dense<0.000000e+00> : vector<256x4xf32>
    %20 = tpu.matmul %17, %19, %cst_20 {dimension_numbers = #tpu.dot_dimension_numbers<[1], [0], [0], [1], [0, 0, 1, 1], [], []>} : vector<256x4xbf16>, vector<4x4xbf16>, vector<256x4xf32> -> vector<256x4xf32>
    %21 = arith.addf %14, %20 : vector<256x4xf32>
    %c0_21 = arith.constant 0 : index
    %c1_22 = arith.constant 1 : index
    %c0_23 = arith.constant 0 : index
    %c0_24 = arith.constant 0 : index
    %22 = vector.load %arg2[%c0_21, %c1_22, %c0_23, %c0_24] : memref<1x18x18x4xbf16, #tpu.memory_space<vmem>>, vector<1x16x16x4xbf16>
    %23 = vector.shape_cast %22 : vector<1x16x16x4xbf16> to vector<16x16x4xbf16>
    %24 = vector.shape_cast %23 : vector<16x16x4xbf16> to vector<256x4xbf16>
    %c3 = arith.constant 3 : index
    %c0_25 = arith.constant 0 : index
    %c0_26 = arith.constant 0 : index
    %25 = vector.load %arg3[%c3, %c0_25, %c0_26] : memref<9x4x4xbf16, #tpu.memory_space<vmem>>, vector<1x4x4xbf16>
    %26 = vector.shape_cast %25 : vector<1x4x4xbf16> to vector<4x4xbf16>
    %cst_27 = arith.constant dense<0.000000e+00> : vector<256x4xf32>
    %27 = tpu.matmul %24, %26, %cst_27 {dimension_numbers = #tpu.dot_dimension_numbers<[1], [0], [0], [1], [0, 0, 1, 1], [], []>} : vector<256x4xbf16>, vector<4x4xbf16>, vector<256x4xf32> -> vector<256x4xf32>
    %28 = arith.addf %21, %27 : vector<256x4xf32>
    %c0_28 = arith.constant 0 : index
    %c1_29 = arith.constant 1 : index
    %c1_30 = arith.constant 1 : index
    %c0_31 = arith.constant 0 : index
    %29 = vector.load %arg2[%c0_28, %c1_29, %c1_30, %c0_31] : memref<1x18x18x4xbf16, #tpu.memory_space<vmem>>, vector<1x16x16x4xbf16>
    %30 = vector.shape_cast %29 : vector<1x16x16x4xbf16> to vector<16x16x4xbf16>
    %31 = vector.shape_cast %30 : vector<16x16x4xbf16> to vector<256x4xbf16>
    %c4 = arith.constant 4 : index
    %c0_32 = arith.constant 0 : index
    %c0_33 = arith.constant 0 : index
    %32 = vector.load %arg3[%c4, %c0_32, %c0_33] : memref<9x4x4xbf16, #tpu.memory_space<vmem>>, vector<1x4x4xbf16>
    %33 = vector.shape_cast %32 : vector<1x4x4xbf16> to vector<4x4xbf16>
    %cst_34 = arith.constant dense<0.000000e+00> : vector<256x4xf32>
    %34 = tpu.matmul %31, %33, %cst_34 {dimension_numbers = #tpu.dot_dimension_numbers<[1], [0], [0], [1], [0, 0, 1, 1], [], []>} : vector<256x4xbf16>, vector<4x4xbf16>, vector<256x4xf32> -> vector<256x4xf32>
    %35 = arith.addf %28, %34 : vector<256x4xf32>
    %c0_35 = arith.constant 0 : index
    %c1_36 = arith.constant 1 : index
    %c2_37 = arith.constant 2 : index
    %c0_38 = arith.constant 0 : index
    %36 = vector.load %arg2[%c0_35, %c1_36, %c2_37, %c0_38] : memref<1x18x18x4xbf16, #tpu.memory_space<vmem>>, vector<1x16x16x4xbf16>
    %37 = vector.shape_cast %36 : vector<1x16x16x4xbf16> to vector<16x16x4xbf16>
    %38 = vector.shape_cast %37 : vector<16x16x4xbf16> to vector<256x4xbf16>
    %c5 = arith.constant 5 : index
    %c0_39 = arith.constant 0 : index
    %c0_40 = arith.constant 0 : index
    %39 = vector.load %arg3[%c5, %c0_39, %c0_40] : memref<9x4x4xbf16, #tpu.memory_space<vmem>>, vector<1x4x4xbf16>
    %40 = vector.shape_cast %39 : vector<1x4x4xbf16> to vector<4x4xbf16>
    %cst_41 = arith.constant dense<0.000000e+00> : vector<256x4xf32>
    %41 = tpu.matmul %38, %40, %cst_41 {dimension_numbers = #tpu.dot_dimension_numbers<[1], [0], [0], [1], [0, 0, 1, 1], [], []>} : vector<256x4xbf16>, vector<4x4xbf16>, vector<256x4xf32> -> vector<256x4xf32>
    %42 = arith.addf %35, %41 : vector<256x4xf32>
    %c0_42 = arith.constant 0 : index
    %c2_43 = arith.constant 2 : index
    %c0_44 = arith.constant 0 : index
    %c0_45 = arith.constant 0 : index
    %43 = vector.load %arg2[%c0_42, %c2_43, %c0_44, %c0_45] : memref<1x18x18x4xbf16, #tpu.memory_space<vmem>>, vector<1x16x16x4xbf16>
    %44 = vector.shape_cast %43 : vector<1x16x16x4xbf16> to vector<16x16x4xbf16>
    %45 = vector.shape_cast %44 : vector<16x16x4xbf16> to vector<256x4xbf16>
    %c6 = arith.constant 6 : index
    %c0_46 = arith.constant 0 : index
    %c0_47 = arith.constant 0 : index
    %46 = vector.load %arg3[%c6, %c0_46, %c0_47] : memref<9x4x4xbf16, #tpu.memory_space<vmem>>, vector<1x4x4xbf16>
    %47 = vector.shape_cast %46 : vector<1x4x4xbf16> to vector<4x4xbf16>
    %cst_48 = arith.constant dense<0.000000e+00> : vector<256x4xf32>
    %48 = tpu.matmul %45, %47, %cst_48 {dimension_numbers = #tpu.dot_dimension_numbers<[1], [0], [0], [1], [0, 0, 1, 1], [], []>} : vector<256x4xbf16>, vector<4x4xbf16>, vector<256x4xf32> -> vector<256x4xf32>
    %49 = arith.addf %42, %48 : vector<256x4xf32>
    %c0_49 = arith.constant 0 : index
    %c2_50 = arith.constant 2 : index
    %c1_51 = arith.constant 1 : index
    %c0_52 = arith.constant 0 : index
    %50 = vector.load %arg2[%c0_49, %c2_50, %c1_51, %c0_52] : memref<1x18x18x4xbf16, #tpu.memory_space<vmem>>, vector<1x16x16x4xbf16>
    %51 = vector.shape_cast %50 : vector<1x16x16x4xbf16> to vector<16x16x4xbf16>
    %52 = vector.shape_cast %51 : vector<16x16x4xbf16> to vector<256x4xbf16>
    %c7 = arith.constant 7 : index
    %c0_53 = arith.constant 0 : index
    %c0_54 = arith.constant 0 : index
    %53 = vector.load %arg3[%c7, %c0_53, %c0_54] : memref<9x4x4xbf16, #tpu.memory_space<vmem>>, vector<1x4x4xbf16>
    %54 = vector.shape_cast %53 : vector<1x4x4xbf16> to vector<4x4xbf16>
    %cst_55 = arith.constant dense<0.000000e+00> : vector<256x4xf32>
    %55 = tpu.matmul %52, %54, %cst_55 {dimension_numbers = #tpu.dot_dimension_numbers<[1], [0], [0], [1], [0, 0, 1, 1], [], []>} : vector<256x4xbf16>, vector<4x4xbf16>, vector<256x4xf32> -> vector<256x4xf32>
    %56 = arith.addf %49, %55 : vector<256x4xf32>
    %c0_56 = arith.constant 0 : index
    %c2_57 = arith.constant 2 : index
    %c2_58 = arith.constant 2 : index
    %c0_59 = arith.constant 0 : index
    %57 = vector.load %arg2[%c0_56, %c2_57, %c2_58, %c0_59] : memref<1x18x18x4xbf16, #tpu.memory_space<vmem>>, vector<1x16x16x4xbf16>
    %58 = vector.shape_cast %57 : vector<1x16x16x4xbf16> to vector<16x16x4xbf16>
    %59 = vector.shape_cast %58 : vector<16x16x4xbf16> to vector<256x4xbf16>
    %c8 = arith.constant 8 : index
    %c0_60 = arith.constant 0 : index
    %c0_61 = arith.constant 0 : index
    %60 = vector.load %arg3[%c8, %c0_60, %c0_61] : memref<9x4x4xbf16, #tpu.memory_space<vmem>>, vector<1x4x4xbf16>
    %61 = vector.shape_cast %60 : vector<1x4x4xbf16> to vector<4x4xbf16>
    %cst_62 = arith.constant dense<0.000000e+00> : vector<256x4xf32>
    %62 = tpu.matmul %59, %61, %cst_62 {dimension_numbers = #tpu.dot_dimension_numbers<[1], [0], [0], [1], [0, 0, 1, 1], [], []>} : vector<256x4xbf16>, vector<4x4xbf16>, vector<256x4xf32> -> vector<256x4xf32>
    %63 = arith.addf %56, %62 : vector<256x4xf32>
    %c0_63 = arith.constant 0 : index
    %c0_64 = arith.constant 0 : index
    %64 = vector.load %arg4[%c0_63, %c0_64] : memref<1x4xf32, #tpu.memory_space<vmem>>, vector<1x4xf32>
    %65 = vector.broadcast %64 : vector<1x4xf32> to vector<256x4xf32>
    %66 = arith.addf %63, %65 : vector<256x4xf32>
    %cst_65 = arith.constant 0.000000e+00 : f32
    %67 = vector.broadcast %cst_65 : f32 to vector<256x4xf32>
    %68 = arith.maximumf %66, %67 : vector<256x4xf32>
    %69 = arith.truncf %68 : vector<256x4xf32> to vector<256x4xbf16>
    %c0_66 = arith.constant 0 : index
    %c0_67 = arith.constant 0 : index
    %70 = vector.load %arg5[%c0_66, %c0_67] : memref<4x15xbf16, #tpu.memory_space<vmem>>, vector<4x15xbf16>
    %cst_68 = arith.constant dense<0.000000e+00> : vector<256x15xf32>
    %71 = tpu.matmul %69, %70, %cst_68 {dimension_numbers = #tpu.dot_dimension_numbers<[1], [0], [0], [1], [0, 0, 1, 1], [], []>} : vector<256x4xbf16>, vector<4x15xbf16>, vector<256x15xf32> -> vector<256x15xf32>
    %c0_69 = arith.constant 0 : index
    %c0_70 = arith.constant 0 : index
    %72 = vector.load %arg6[%c0_69, %c0_70] : memref<1x15xf32, #tpu.memory_space<vmem>>, vector<1x15xf32>
    %73 = vector.broadcast %72 : vector<1x15xf32> to vector<256x15xf32>
    %74 = arith.addf %71, %73 : vector<256x15xf32>
    %75 = vector.shape_cast %74 : vector<256x15xf32> to vector<1x16x16x15xf32>
    %c0_71 = arith.constant 0 : index
    %c0_72 = arith.constant 0 : index
    %c0_73 = arith.constant 0 : index
    %c0_74 = arith.constant 0 : index
    %76 = vector.load %arg7[%c0_71, %c0_72, %c0_73, %c0_74] : memref<1x16x16x15xf32, #tpu.memory_space<vmem>>, vector<1x16x16x15xf32>
    tpu.vector_store %arg7[%c0_71, %c0_72, %c0_73, %c0_74], %75 {strides = array<i32>} : memref<1x16x16x15xf32, #tpu.memory_space<vmem>>, vector<1x16x16x15xf32>,
    return
  }
  func.func @transform_0(%arg0: i32, %arg1: i32) -> (i32, i32, i32, i32) {
    %c1_i32 = arith.constant 1 : i32
    %0 = arith.muli %arg0, %c1_i32 : i32
    %1 = arith.addi %0, %arg1 : i32
    %c0_i32 = arith.constant 0 : i32
    %c0_i32_0 = arith.constant 0 : i32
    %c0_i32_1 = arith.constant 0 : i32
    %c0_i32_2 = arith.constant 0 : i32
    return %1, %c0_i32, %c0_i32_0, %c0_i32_1 : i32, i32, i32, i32
  }
  func.func @transform_1(%arg0: i32, %arg1: i32) -> (i32, i32, i32) {
    %c0_i32 = arith.constant 0 : i32
    %c0_i32_0 = arith.constant 0 : i32
    %c0_i32_1 = arith.constant 0 : i32
    %c0_i32_2 = arith.constant 0 : i32
    return %c0_i32, %c0_i32_0, %c0_i32_1 : i32, i32, i32
  }
  func.func @transform_2(%arg0: i32, %arg1: i32) -> (i32, i32) {
    %c0_i32 = arith.constant 0 : i32
    %c0_i32_0 = arith.constant 0 : i32
    %c0_i32_1 = arith.constant 0 : i32
    return %c0_i32, %c0_i32_0 : i32, i32
  }
  func.func @transform_3(%arg0: i32, %arg1: i32) -> (i32, i32) {
    %c0_i32 = arith.constant 0 : i32
    %c0_i32_0 = arith.constant 0 : i32
    %c0_i32_1 = arith.constant 0 : i32
    return %c0_i32, %c0_i32_0 : i32, i32
  }
  func.func @transform_4(%arg0: i32, %arg1: i32) -> (i32, i32) {
    %c0_i32 = arith.constant 0 : i32
    %c0_i32_0 = arith.constant 0 : i32
    %c0_i32_1 = arith.constant 0 : i32
    return %c0_i32, %c0_i32_0 : i32, i32
  }
  func.func @transform_5(%arg0: i32, %arg1: i32) -> (i32, i32, i32, i32) {
    %c0_i32 = arith.constant 0 : i32
    %c0_i32_0 = arith.constant 0 : i32
    %c0_i32_1 = arith.constant 0 : i32
    return %arg0, %arg1, %c0_i32, %c0_i32_0 : i32, i32, i32, i32
  }
}

</mosaic_0001>

<bundles_post_ra>
// kernel: rpn_head_level.1
= control target key start
LH: loop header
LB: loop body
LE: loop exit
PB: predicated region body
PF: predicated region fallthrough
CT: control target
= control target key end

     0   :  { %s6764_s18 = smov 0   ;;  %s6766_s19 = smov 0   ;;  %s8744_s0 = inlined_call_operand.vmem [shape: bf16[2,18,18,4], index: 0, kind: input, shape index: {}]   ;;  %s8745_s1 = inlined_call_operand.vmem [shape: bf16[9,4,4], index: 1, kind: input, shape index: {}]   ;;  %s8746_s2 = inlined_call_operand.vmem [shape: f32[1,4], index: 2, kind: input, shape index: {}]   ;;  %s8747_s3 = inlined_call_operand.vmem [shape: bf16[4,15], index: 3, kind: input, shape index: {}]   ;;  %s8748_s4 = inlined_call_operand.vmem [shape: f32[1,15], index: 4, kind: input, shape index: {}]   ;;  %s8749_s5 = inlined_call_operand.vmem [shape: f32[2,16,16,15], index: 5, kind: output, shape index: {}]  }
   0x1   :  { %s6768_s20 = smov 0  }
   0x2 LB: > { %s27_s21 = sadd.s32 1, %s6728_s19  ;;  %p5248_p0 = scmp.ge.s32.totalorder %s6732_s20, 1  ;;  %s6732_s20 = sphi %s6768_s20, %s15_s20   ;;  %s6728_s19 = sphi %s6766_s19, %s8831_s19   ;;  %s6724_s18 = sphi %s6764_s18, %s8830_s18  }
   0x3   : > { %p29_p1 = scmp.ge.s32.totalorder %s27_s21, 2  ;;  %p205_p2 = scmp.lt.s32.totalorder %s6732_s20, 3 }
   0x5   : > { %s8833_s21 = smov (%p29_p1, %s27_s21), 0  ;;  %p206_p3 = pnand %p5248_p0, %p205_p2 }
   0x7   : > { %209 = sbr.rel (%p206_p3) target bundleno = 861 (0x35d), region = 40 }
   0xe   : > { %vm793_vm0 = vcmask 1041408   ;;  %v5479_v0 = vld [vmem:[%s8745_s1 + $0x8] sm:$0x3]  ;;  %v5252_v1 = vld [vmem:[%s8745_s1 + $0x2] sm:$0x3]  ;;  %p240_p4 = scmp.lt.s32.totalorder %s6724_s18, 1 }
   0xf   : > { %6579 = vmatprep.subr.msk.bf16.mxu0 %vm793_vm0, %v5479_v0  ;;  %6575 = vmatprep.subr.msk.bf16.mxu1 %vm793_vm0, %v5252_v1  ;;  %v2597_v2 = vsel %vm793_vm0, %v5479_v0, 0  ;;  %v795_v3 = vsel %vm793_vm0, %v5252_v1, 0  ;;  %v6797_v4 = vld [vmem:[%s8745_s1 + $0xa] sm:$0x3]  ;;  %vm307_vm1 = vsmask.f32 3328 }
  0x10   : > { %6116 = vmatpush3.bf16.msra.mxu0 %v2597_v2  ;;  %5980 = vmatpush3.bf16.msra.mxu1 %v795_v3  ;;  %s8835_s18 = smov (!%p240_p4, %s6724_s18), 1  ;;  %vm308_vm2 = vsmask.f32 7440  ;;  %v8766_v29 = vmov 0  ;;  %vm744_vm4 = vcmask 31744   ;;  %v6846_v60 = vsel %vm793_vm0, %v6797_v4, 0 }
  0x11   : > { %6580 = vmatprep.subr.msk.bf16.mxu0 %vm793_vm0, %v6797_v4  ;;  %s6585_s28 = smul.u32 216, %s8835_s18  ;;  %vm6823_vm3 = vmor %vm307_vm1, %vm308_vm2  ;;  %vm1298_vm5 = vcmask 1042432   ;;  %vm1299_vm6 = vcmask 1046532   ;;  %s5808_s27 = sshll.u32 %s8835_s18, 8  ;;  %vm5124_vm8 = vcmask 121856  }
  0x12   : > { %v8767_v29 = vsel %vm6823_vm3, 4294967295, %v8766_v29  ;;  %vm7235_vm7 = vmor %vm1298_vm5, %vm1299_vm6  ;;  %s8637_s7 = scalar_lea.vmem %s8749_s5, %s5808_s27 }
  0x13   : > { %s6805_s6 = scalar_lea.vmem %s8744_s0, %s6585_s28  ;;  %8768 = vst [vmem:[#allocation2_spill] sm:$0xff] %v8767_v29 }
  0x14   : > { %v258_v5 = vld [vmem:[%s6805_s6] sm:$0xf]  ;;  %v259_v6 = vld [vmem:[%s6805_s6 + $0x4] sm:$0xf]  ;;  %v291_v7 = vld [vmem:[%s6805_s6 + $0x8] sm:$0x1] }
  0x15   : > { %v311_v8 = vshrl.u32 %v258_v5, 16  ;;  %v314_v9 = vshll.u32 %v258_v5, 16  ;;  %v320_v10 = vshll.u32 %v259_v6, 16  ;;  %v324_v11 = vshrl.u32 %v259_v6, 16  ;;  %v5431_v12 = vld [vmem:[%s6805_s6 + $0xc] sm:$0xf] }
  0x16   : > { %v330_v13 = vshll.u32 %v291_v7, 16  ;;  %v6812_v14 = vld [vmem:[%s6805_s6 + $0x10] sm:$0xf]  ;;  %v6815_v15 = vld [vmem:[%s6805_s6 + $0x14] sm:$0x1]  ;;  %v2115_v21 = vshrl.u32 %v5431_v12, 16 }
  0x17   : > { %v313_v16 = vrot.slane %v311_v8, 4  ;;  %v316_v17 = vrot.slane %v314_v9, 5  ;;  %v322_v18 = vrot.slane %v320_v10, 5  ;;  %v326_v19 = vrot.slane %v324_v11, 4  ;;  %v260_v28 = vld [vmem:[%s6805_s6 + $0xc] sm:$0xf] }
  0x18   : > { %v332_v20 = vrot.slane %v330_v13, 5  ;;  %v2118_v22 = vshll.u32 %v5431_v12, 16  ;;  %v2124_v23 = vshll.u32 %v6812_v14, 16  ;;  %v2128_v26 = vshrl.u32 %v6812_v14, 16  ;;  %v261_v33 = vld [vmem:[%s6805_s6 + $0x10] sm:$0xf] }
  0x19   : > { %v317_v24 = vor.u32 %v316_v17, %v313_v16  ;;  %v327_v25 = vor.u32 %v326_v19, %v322_v18  ;;  %v2134_v27 = vshll.u32 %v6815_v15, 16  ;;  %v2117_v30 = vrot.slane %v2115_v21, 4  ;;  %v292_v39 = vld [vmem:[%s6805_s6 + $0x14] sm:$0x1]  ;;  %v5434_v50 = vld [vmem:[%s6805_s6 + $0x18] sm:$0xf] }
  0x1a   : > { %v2120_v31 = vrot.slane %v2118_v22, 5  ;;  %v2126_v32 = vrot.slane %v2124_v23, 5  ;;  %v2130_v36 = vrot.slane %v2128_v26, 4  ;;  %v335_v40 = vshrl.u32 %v260_v28, 16  ;;  %v6835_v55 = vld [vmem:[%s6805_s6 + $0x1c] sm:$0xf] }
  0x1b   : > { %v318_v34 = vrot.slane %v317_v24, 4  ;;  %v328_v35 = vrot.slane %v327_v25, 4  ;;  %v2136_v38 = vrot.slane %v2134_v27, 5  ;;  %v338_v41 = vshll.u32 %v260_v28, 16  ;;  %v6842_v59 = vld [vmem:[%s6805_s6 + $0x20] sm:$0x1] }
  0x1c   : > { %v2121_v37 = vor.u32 %v2120_v31, %v2117_v30  ;;  %v2131_v44 = vor.u32 %v2130_v36, %v2126_v32  ;;  %v344_v45 = vshll.u32 %v261_v33, 16  ;;  %v337_v48 = vrot.slane %v335_v40, 4  ;;  %v262_v9 = vld [vmem:[%s6805_s6 + $0x18] sm:$0xf]  ;;  %v263_v16 = vld [vmem:[%s6805_s6 + $0x1c] sm:$0xf] }
  0x1d   : > { %v323_v42 = vsel %vm6823_vm3, %v318_v34, %v322_v18  ;;  %v333_v43 = vsel %vm6823_vm3, %v328_v35, %v332_v20  ;;  %v340_v49 = vrot.slane %v338_v41, 5  ;;  %v348_v53 = vshrl.u32 %v261_v33, 16  ;;  %v293_v23 = vld [vmem:[%s6805_s6 + $0x20] sm:$0x1]  ;;  %v5437_v31 = vld [vmem:[%s6805_s6 + $0x24] sm:$0xf] }
  0x1e   : > { %v5253_v46 = vcombine.low %v323_v42, %v333_v43  ;;  %v2122_v47 = vrot.slane %v2121_v37, 4  ;;  %v2132_v51 = vrot.slane %v2131_v44, 4  ;;  %v346_v52 = vrot.slane %v344_v45, 5  ;;  %v5438_v36 = vld [vmem:[%s6805_s6 + $0x28] sm:$0xf] }
  0x1f   : > { %v354_v54 = vshll.u32 %v292_v39, 16  ;;  %v341_v58 = vor.u32 %v340_v49, %v337_v48  ;;  %v350_v62 = vrot.slane %v348_v53, 4  ;;  %v2139_v0 = vshrl.u32 %v5434_v50, 16  ;;  %v5439_v43 = vld [vmem:[%s6805_s6 + $0x2c] sm:$0x1] }
  0x20   : > { %5981 = vmatprep.mubr.msk.bf16.mxu1 %vm744_vm4, %v5253_v46  ;;  %v2127_v56 = vsel %vm6823_vm3, %v2122_v47, %v2126_v32  ;;  %v2137_v61 = vsel %vm6823_vm3, %v2132_v51, %v2136_v38  ;;  %v2142_v3 = vshll.u32 %v5434_v50, 16  ;;  %v2148_v5 = vshll.u32 %v6835_v55, 16  ;;  %v264_v50 = vld [vmem:[%s6805_s6 + $0x24] sm:$0xf] }
  0x21   : > { %v356_v63 = vrot.slane %v354_v54, 5  ;;  %v5480_v1 = vcombine.low %v2127_v56, %v2137_v61  ;;  %v342_v2 = vrot.slane %v341_v58, 4  ;;  %v351_v6 = vor.u32 %v350_v62, %v346_v52  ;;  %v265_v56 = vld [vmem:[%s6805_s6 + $0x28] sm:$0xf] }
  0x22   : > { %v2141_v7 = vrot.slane %v2139_v0, 4  ;;  %v2152_v8 = vshrl.u32 %v6835_v55, 16  ;;  %v2158_v4 = vshll.u32 %v6842_v59, 16  ;;  %v2144_v12 = vrot.slane %v2142_v3, 5 }
  0x23   : > { %6117 = vmatprep.mubr.msk.bf16.mxu0 %vm744_vm4, %v5480_v1  ;;  %v347_v11 = vsel %vm6823_vm3, %v342_v2, %v346_v52  ;;  %v2150_v13 = vrot.slane %v2148_v5, 5  ;;  %v352_v17 = vrot.slane %v351_v6, 4  ;;  %v2865_v20 = vrot.slane %v6835_v55, 5  ;;  %v294_v2 = vld [vmem:[%s6805_s6 + $0x2c] sm:$0x1] }
  0x24   : > { %v2154_v18 = vrot.slane %v2152_v8, 4  ;;  %v2160_v19 = vrot.slane %v2158_v4, 5  ;;  %v2145_v21 = vor.u32 %v2144_v12, %v2141_v7  ;;  %v359_v24 = vshrl.u32 %v262_v9, 16 }
  0x25   : > { %v362_v25 = vshll.u32 %v262_v9, 16  ;;  %v357_v26 = vsel %vm6823_vm3, %v352_v17, %v356_v63  ;;  %v368_v28 = vshll.u32 %v263_v16, 16  ;;  %v372_v30 = vshrl.u32 %v263_v16, 16  ;;  %v5440_v9 = vld [vmem:[%s6805_s6 + $0x30] sm:$0xf] }
  0x26   : > { %v2155_v27 = vor.u32 %v2154_v18, %v2150_v13  ;;  %v5254_v32 = vcombine.low %v347_v11, %v357_v26  ;;  %v2146_v33 = vrot.slane %v2145_v21, 4  ;;  %v361_v34 = vrot.slane %v359_v24, 4  ;;  %v5441_v17 = vld [vmem:[%s6805_s6 + $0x34] sm:$0xf] }
  0x27   : > { %v364_v35 = vrot.slane %v362_v25, 5  ;;  %v370_v38 = vrot.slane %v368_v28, 5  ;;  %v374_v39 = vrot.slane %v372_v30, 4  ;;  %v378_v40 = vshll.u32 %v293_v23, 16  ;;  %v5442_v25 = vld [vmem:[%s6805_s6 + $0x38] sm:$0x1] }
  0x28   : > { %v2156_v37 = vrot.slane %v2155_v27, 4  ;;  %5982 = vmatmul.mubr.msk.bf16.vlgmr.msra.gmra.mrb[0].mxu1 %vm744_vm4, %v5254_v32  ;;  %v2151_v41 = vsel %vm6823_vm3, %v2146_v33, %v2150_v13  ;;  %v2163_v44 = vshrl.u32 %v5437_v31, 16  ;;  %v2166_v45 = vshll.u32 %v5437_v31, 16 }
  0x29   : > { %v365_v42 = vor.u32 %v364_v35, %v361_v34  ;;  %v375_v47 = vor.u32 %v374_v39, %v370_v38  ;;  %v380_v48 = vrot.slane %v378_v40, 5  ;;  %v2172_v49 = vshll.u32 %v5438_v36, 16 }
  0x2a   : > { %v2161_v46 = vsel %vm6823_vm3, %v2156_v37, %v2160_v19  ;;  %v2165_v53 = vrot.slane %v2163_v44, 4  ;;  %v2168_v54 = vrot.slane %v2166_v45, 5  ;;  %v2176_v62 = vshrl.u32 %v5438_v36, 16  ;;  %v266_v37 = vld [vmem:[%s6805_s6 + $0x30] sm:$0xf] }
  0x2b   : > { %v5481_v51 = vcombine.low %v2151_v41, %v2161_v46  ;;  %v366_v52 = vrot.slane %v365_v42, 4  ;;  %v376_v58 = vrot.slane %v375_v47, 4  ;;  %v2174_v61 = vrot.slane %v2172_v49, 5  ;;  %v267_v42 = vld [vmem:[%s6805_s6 + $0x34] sm:$0xf] }
  0x2c   : > { %v2182_v63 = vshll.u32 %v5439_v43, 16  ;;  %v2169_v1 = vor.u32 %v2168_v54, %v2165_v53  ;;  %v383_v3 = vshrl.u32 %v264_v50, 16  ;;  %v386_v5 = vshll.u32 %v264_v50, 16  ;;  %v295_v47 = vld [vmem:[%s6805_s6 + $0x38] sm:$0x1] }
  0x2d   : > { %6118 = vmatmul.mubr.msk.bf16.vlgmr.msra.gmra.mrb[0].mxu0 %vm744_vm4, %v5481_v51  ;;  %v371_v0 = vsel %vm6823_vm3, %v366_v52, %v370_v38  ;;  %v381_v6 = vsel %vm6823_vm3, %v376_v58, %v380_v48  ;;  %v2178_v7 = vrot.slane %v2176_v62, 4  ;;  %v392_v4 = vshll.u32 %v265_v56, 16  ;;  %v5443_v58 = vld [vmem:[%s6805_s6 + $0x3c] sm:$0xf] }
  0x2e   : > { %6150 = vmatpush3.bf16.msra.mxu0 %v6846_v60  ;;  %v2184_v8 = vrot.slane %v2182_v63, 5  ;;  %v5255_v11 = vcombine.low %v371_v0, %v381_v6  ;;  %v2170_v12 = vrot.slane %v2169_v1, 4  ;;  %v385_v13 = vrot.slane %v383_v3, 4  ;;  %v5444_v1 = vld [vmem:[%s6805_s6 + $0x40] sm:$0xf] }
  0x2f   : > { %v388_v16 = vrot.slane %v386_v5, 5  ;;  %v2179_v18 = vor.u32 %v2178_v7, %v2174_v61  ;;  %v394_v19 = vrot.slane %v392_v4, 5  ;;  %v396_v21 = vshrl.u32 %v265_v56, 16 }
  0x30   : > { %v402_v23 = vshll.u32 %v294_v2, 16  ;;  %5985 = vmatprep.mubr.msk.bf16.mxu1 %vm744_vm4, %v5255_v11  ;;  %v2175_v60 = vsel %vm6823_vm3, %v2170_v12, %v2174_v61  ;;  %v2187_v26 = vshrl.u32 %v5440_v9, 16  ;;  %v2190_v27 = vshll.u32 %v5440_v9, 16  ;;  %v5445_v9 = vld [vmem:[%s6805_s6 + $0x44] sm:$0x1] }
  0x31   : > { %v389_v24 = vor.u32 %v388_v16, %v385_v13  ;;  %v2180_v28 = vrot.slane %v2179_v18, 4  ;;  %v398_v30 = vrot.slane %v396_v21, 4  ;;  %v2196_v32 = vshll.u32 %v5441_v17, 16  ;;  %v268_v18 = vld [vmem:[%s6805_s6 + $0x3c] sm:$0xf] }
  0x32   : > { %v404_v31 = vrot.slane %v402_v23, 5  ;;  %v2189_v34 = vrot.slane %v2187_v26, 4  ;;  %v2192_v35 = vrot.slane %v2190_v27, 5  ;;  %v2200_v36 = vshrl.u32 %v5441_v17, 16 }
  0x33   : > { %v390_v33 = vrot.slane %v389_v24, 4  ;;  %v2185_v38 = vsel %vm6823_vm3, %v2180_v28, %v2184_v8  ;;  %v399_v39 = vor.u32 %v398_v30, %v394_v19  ;;  %v2198_v40 = vrot.slane %v2196_v32, 5  ;;  %v269_v24 = vld [vmem:[%s6805_s6 + $0x40] sm:$0xf] }
  0x34   : > { %v2206_v41 = vshll.u32 %v5442_v25, 16  ;;  %v5482_v43 = vcombine.low %v2175_v60, %v2185_v38  ;;  %v2193_v45 = vor.u32 %v2192_v35, %v2189_v34  ;;  %v2202_v46 = vrot.slane %v2200_v36, 4 }
  0x35   : > { %v395_v44 = vsel %vm6823_vm3, %v390_v33, %v394_v19  ;;  %v400_v48 = vrot.slane %v399_v39, 4  ;;  %v407_v50 = vshrl.u32 %v266_v37, 16  ;;  %v410_v51 = vshll.u32 %v266_v37, 16  ;;  %v296_v37 = vld [vmem:[%s6805_s6 + $0x44] sm:$0x1] }
  0x36   : > { %v2208_v49 = vrot.slane %v2206_v41, 5  ;;  %6121 = vmatprep.mubr.msk.bf16.mxu0 %vm744_vm4, %v5482_v43  ;;  %v2194_v52 = vrot.slane %v2193_v45, 4  ;;  %v2203_v53 = vor.u32 %v2202_v46, %v2198_v40  ;;  %v416_v54 = vshll.u32 %v267_v42, 16  ;;  %v5446_v39 = vld [vmem:[%s6805_s6 + $0x48] sm:$0xf] }
  0x37   : > { %v420_v56 = vshrl.u32 %v267_v42, 16  ;;  %v405_v61 = vsel %vm6823_vm3, %v400_v48, %v404_v31  ;;  %v409_v62 = vrot.slane %v407_v50, 4  ;;  %v412_v63 = vrot.slane %v410_v51, 5 }
  0x38   : > { %v426_v0 = vshll.u32 %v295_v47, 16  ;;  %v5256_v2 = vcombine.low %v395_v44, %v405_v61  ;;  %v2199_v3 = vsel %vm6823_vm3, %v2194_v52, %v2198_v40  ;;  %v2204_v5 = vrot.slane %v2203_v53, 4  ;;  %v5447_v44 = vld [vmem:[%s6805_s6 + $0x4c] sm:$0xf] }
  0x39   : > { %v418_v6 = vrot.slane %v416_v54, 5  ;;  %v413_v7 = vor.u32 %v412_v63, %v409_v62  ;;  %v422_v8 = vrot.slane %v420_v56, 4  ;;  %v2211_v11 = vshrl.u32 %v5443_v58, 16  ;;  %v5448_v56 = vld [vmem:[%s6805_s6 + $0x50] sm:$0x1] }
  0x3a   : > { %v428_v4 = vrot.slane %v426_v0, 5  ;;  %5986 = vmatmul.mubr.msk.bf16.gmra.mrb[4].mxu1 %vm744_vm4, %v5256_v2  ;;  %v2209_v12 = vsel %vm6823_vm3, %v2204_v5, %v2208_v49  ;;  %v2214_v13 = vshll.u32 %v5443_v58, 16  ;;  %v2220_v16 = vshll.u32 %v5444_v1, 16  ;;  %v270_v62 = vld [vmem:[%s6805_s6 + $0x48] sm:$0xf] }
  0x3b   : > { %v2224_v17 = vshrl.u32 %v5444_v1, 16  ;;  %v5483_v19 = vcombine.low %v2199_v3, %v2209_v12  ;;  %v414_v21 = vrot.slane %v413_v7, 4  ;;  %v423_v23 = vor.u32 %v422_v8, %v418_v6  ;;  %v271_v3 = vld [vmem:[%s6805_s6 + $0x4c] sm:$0xf]  ;;  %v297_v12 = vld [vmem:[%s6805_s6 + $0x50] sm:$0x1] }
  0x3c   : > { %v2213_v60 = vrot.slane %v2211_v11, 4  ;;  %v2216_v25 = vrot.slane %v2214_v13, 5  ;;  %v2222_v26 = vrot.slane %v2220_v16, 5  ;;  %v2230_v28 = vshll.u32 %v5445_v9, 16 }
  0x3d   : > { %v2226_v27 = vrot.slane %v2224_v17, 4  ;;  %6122 = vmatmul.mubr.msk.bf16.gmra.mrb[4].mxu0 %vm744_vm4, %v5483_v19  ;;  %v419_v30 = vsel %vm6823_vm3, %v414_v21, %v418_v6  ;;  %v424_v31 = vrot.slane %v423_v23, 4  ;;  %v431_v32 = vshrl.u32 %v268_v18, 16  ;;  %v5449_v21 = vld [vmem:[%s6805_s6 + $0x54] sm:$0xf] }
  0x3e   : > { %v434_v33 = vshll.u32 %v268_v18, 16  ;;  %v2217_v34 = vor.u32 %v2216_v25, %v2213_v60  ;;  %v2232_v36 = vrot.slane %v2230_v28, 5  ;;  %v440_v38 = vshll.u32 %v269_v24, 16 }
  0x3f   : > { %v2227_v35 = vor.u32 %v2226_v27, %v2222_v26  ;;  %v429_v40 = vsel %vm6823_vm3, %v424_v31, %v428_v4  ;;  %v433_v41 = vrot.slane %v431_v32, 4  ;;  %v444_v43 = vshrl.u32 %v269_v24, 16  ;;  %v5450_v31 = vld [vmem:[%s6805_s6 + $0x58] sm:$0xf] }
  0x40   : > { %v436_v42 = vrot.slane %v434_v33, 5  ;;  %v5257_v45 = vcombine.low %v419_v30, %v429_v40  ;;  %v2218_v46 = vrot.slane %v2217_v34, 4  ;;  %v442_v48 = vrot.slane %v440_v38, 5 }
  0x41   : > { %v2228_v47 = vrot.slane %v2227_v35, 4  ;;  %v446_v50 = vrot.slane %v444_v43, 4  ;;  %v450_v51 = vshll.u32 %v296_v37, 16  ;;  %v2235_v52 = vshrl.u32 %v5446_v39, 16 }
  0x42   : > { %v437_v49 = vor.u32 %v436_v42, %v433_v41  ;;  %5989 = vmatprep.mubr.msk.bf16.mxu1 %vm744_vm4, %v5257_v45  ;;  %v2223_v53 = vsel %vm6823_vm3, %v2218_v46, %v2222_v26  ;;  %v2238_v58 = vshll.u32 %v5446_v39, 16  ;;  %v2244_v61 = vshll.u32 %v5447_v44, 16  ;;  %v5451_v39 = vld [vmem:[%s6805_s6 + $0x5c] sm:$0x1]  ;;  %v272_v45 = vld [vmem:[%s6805_s6 + $0x54] sm:$0xf] }
  0x43   : > { %v2233_v54 = vsel %vm6823_vm3, %v2228_v47, %v2232_v36  ;;  %v447_v1 = vor.u32 %v446_v50, %v442_v48  ;;  %v452_v2 = vrot.slane %v450_v51, 5  ;;  %v2237_v5 = vrot.slane %v2235_v52, 4  ;;  %v273_v50 = vld [vmem:[%s6805_s6 + $0x58] sm:$0xf] }
  0x44   : > { %v5484_v63 = vcombine.low %v2223_v53, %v2233_v54  ;;  %v438_v0 = vrot.slane %v437_v49, 4  ;;  %v2240_v6 = vrot.slane %v2238_v58, 5  ;;  %v2246_v7 = vrot.slane %v2244_v61, 5 }
  0x45   : > { %v2248_v8 = vshrl.u32 %v5447_v44, 16  ;;  %v448_v9 = vrot.slane %v447_v1, 4  ;;  %v2254_v11 = vshll.u32 %v5448_v56, 16  ;;  %v455_v13 = vshrl.u32 %v270_v62, 16 }
  0x46   : > { %6125 = vmatprep.mubr.msk.bf16.mxu0 %vm744_vm4, %v5484_v63  ;;  %v443_v4 = vsel %vm6823_vm3, %v438_v0, %v442_v48  ;;  %v2241_v16 = vor.u32 %v2240_v6, %v2237_v5  ;;  %v458_v18 = vshll.u32 %v270_v62, 16  ;;  %v464_v19 = vshll.u32 %v271_v3, 16  ;;  %v298_v62 = vld [vmem:[%s6805_s6 + $0x5c] sm:$0x1]  ;;  %v5452_v5 = vld [vmem:[%s6805_s6 + $0x60] sm:$0xf] }
  0x47   : > { %v2250_v17 = vrot.slane %v2248_v8, 4  ;;  %v453_v23 = vsel %vm6823_vm3, %v448_v9, %v452_v2  ;;  %v2256_v60 = vrot.slane %v2254_v11, 5  ;;  %v457_v24 = vrot.slane %v455_v13, 4  ;;  %v5453_v9 = vld [vmem:[%s6805_s6 + $0x64] sm:$0xf] }
  0x48   : > { %v468_v25 = vshrl.u32 %v271_v3, 16  ;;  %v5258_v26 = vcombine.low %v443_v4, %v453_v23  ;;  %v2242_v27 = vrot.slane %v2241_v16, 4  ;;  %v460_v30 = vrot.slane %v458_v18, 5 }
  0x49   : > { %v2251_v28 = vor.u32 %v2250_v17, %v2246_v7  ;;  %v466_v32 = vrot.slane %v464_v19, 5  ;;  %v474_v34 = vshll.u32 %v297_v12, 16  ;;  %v2259_v35 = vshrl.u32 %v5449_v21, 16  ;;  %v5454_v19 = vld [vmem:[%s6805_s6 + $0x68] sm:$0x1] }
  0x4a   : > { %v470_v33 = vrot.slane %v468_v25, 4  ;;  %5990 = vmatmul.mubr.msk.bf16.gmra.mrb[8].mxu1 %vm744_vm4, %v5258_v26  ;;  %v2247_v36 = vsel %vm6823_vm3, %v2242_v27, %v2246_v7  ;;  %v461_v38 = vor.u32 %v460_v30, %v457_v24  ;;  %v2262_v40 = vshll.u32 %v5449_v21, 16  ;;  %v274_v27 = vld [vmem:[%s6805_s6 + $0x60] sm:$0xf] }
  0x4b   : > { %v2252_v37 = vrot.slane %v2251_v28, 4  ;;  %v476_v42 = vrot.slane %v474_v34, 5  ;;  %v2261_v43 = vrot.slane %v2259_v35, 4  ;;  %v2268_v44 = vshll.u32 %v5450_v31, 16 }
  0x4c   : > { %v471_v41 = vor.u32 %v470_v33, %v466_v32  ;;  %v462_v47 = vrot.slane %v461_v38, 4  ;;  %v2264_v48 = vrot.slane %v2262_v40, 5  ;;  %v2272_v49 = vshrl.u32 %v5450_v31, 16  ;;  %v6955_v33 = vld [vmem:[%s6805_s6 + $0x64] sm:$0xf] }
  0x4d   : > { %v2257_v46 = vsel %vm6823_vm3, %v2252_v37, %v2256_v60  ;;  %v2270_v53 = vrot.slane %v2268_v44, 5  ;;  %v2278_v54 = vshll.u32 %v5451_v39, 16  ;;  %v479_v63 = vshrl.u32 %v272_v45, 16  ;;  %v299_v44 = vld [vmem:[%s6805_s6 + $0x68] sm:$0x1] }
  0x4e   : > { %v5485_v51 = vcombine.low %v2247_v36, %v2257_v46  ;;  %v472_v52 = vrot.slane %v471_v41, 4  ;;  %v467_v56 = vsel %vm6823_vm3, %v462_v47, %v466_v32  ;;  %v2265_v58 = vor.u32 %v2264_v48, %v2261_v43 }
  0x4f   : > { %v2274_v61 = vrot.slane %v2272_v49, 4  ;;  %v2280_v1 = vrot.slane %v2278_v54, 5  ;;  %v482_v2 = vshll.u32 %v272_v45, 16  ;;  %v488_v3 = vshll.u32 %v273_v50, 16 }
  0x50   : > { %6126 = vmatmul.mubr.msk.bf16.gmra.mrb[8].mxu0 %vm744_vm4, %v5485_v51  ;;  %v477_v0 = vsel %vm6823_vm3, %v472_v52, %v476_v42  ;;  %v2266_v7 = vrot.slane %v2265_v58, 4  ;;  %v481_v4 = vrot.slane %v479_v63, 4  ;;  %v492_v13 = vshrl.u32 %v273_v50, 16  ;;  %v5455_v51 = vld [vmem:[%s6805_s6 + $0x6c] sm:$0xf] }
  0x51   : > { %v5259_v6 = vcombine.low %v467_v56, %v477_v0  ;;  %v2275_v8 = vor.u32 %v2274_v61, %v2270_v53  ;;  %v484_v11 = vrot.slane %v482_v2, 5  ;;  %v490_v12 = vrot.slane %v488_v3, 5  ;;  %v6967_v58 = vld [vmem:[%s6805_s6 + $0x70] sm:$0xf]  ;;  %v6977_v2 = vld [vmem:[%s8745_s1] sm:$0x3] }
  0x52   : > { %v498_v16 = vshll.u32 %v298_v62, 16  ;;  %v2271_v17 = vsel %vm6823_vm3, %v2266_v7, %v2270_v53  ;;  %v2283_v21 = vshrl.u32 %v5452_v5, 16  ;;  %v2286_v23 = vshll.u32 %v5452_v5, 16  ;;  %6576 = vmatprep.subr.msk.bf16.mxu1 %vm793_vm0, %v6977_v2 }
  0x53   : > { %5993 = vmatprep.mubr.msk.bf16.mxu1 %vm744_vm4, %v5259_v6  ;;  %v2276_v18 = vrot.slane %v2275_v8, 4  ;;  %v485_v60 = vor.u32 %v484_v11, %v481_v4  ;;  %v494_v24 = vrot.slane %v492_v13, 4  ;;  %v2292_v26 = vshll.u32 %v5453_v9, 16  ;;  %v276_v8 = vld [vmem:[%s6805_s6 + $0x6c] sm:$0xf] }
  0x54   : > { %v500_v25 = vrot.slane %v498_v16, 5  ;;  %v2285_v30 = vrot.slane %v2283_v21, 4  ;;  %v2288_v31 = vrot.slane %v2286_v23, 5  ;;  %v2296_v32 = vshrl.u32 %v5453_v9, 16  ;;  %v6990_v13 = vld [vmem:[%s8745_s1 + $0xc] sm:$0x3] }
  0x55   : > { %v2281_v28 = vsel %vm6823_vm3, %v2276_v18, %v2280_v1  ;;  %v486_v35 = vrot.slane %v485_v60, 4  ;;  %v495_v36 = vor.u32 %v494_v24, %v490_v12  ;;  %v2294_v37 = vrot.slane %v2292_v26, 5  ;;  %v6972_v1 = vld [vmem:[%s6805_s6 + $0x74] sm:$0x1]  ;;  %v277_v21 = vld [vmem:[%s6805_s6 + $0x70] sm:$0xf]  ;;  %6581 = vmatprep.subr.msk.bf16.mxu0 %vm793_vm0, %v6990_v13 }
  0x56   : > { %v5486_v34 = vcombine.low %v2271_v17, %v2281_v28  ;;  %v2289_v38 = vor.u32 %v2288_v31, %v2285_v30  ;;  %v2298_v39 = vrot.slane %v2296_v32, 4  ;;  %v2302_v40 = vshll.u32 %v5454_v19, 16 }
  0x57   : > { %v503_v41 = vshrl.u32 %v274_v27, 16  ;;  %v491_v42 = vsel %vm6823_vm3, %v486_v35, %v490_v12  ;;  %v496_v43 = vrot.slane %v495_v36, 4  ;;  %v506_v45 = vshll.u32 %v274_v27, 16  ;;  %v300_v35 = vld [vmem:[%s6805_s6 + $0x74] sm:$0x1] }
  0x58   : > { %6129 = vmatprep.mubr.msk.bf16.mxu0 %vm744_vm4, %v5486_v34  ;;  %v512_v46 = vshll.u32 %v6955_v33, 16  ;;  %v2290_v47 = vrot.slane %v2289_v38, 4  ;;  %v2299_v48 = vor.u32 %v2298_v39, %v2294_v37  ;;  %v2304_v49 = vrot.slane %v2302_v40, 5 }
  0x59   : > { %v505_v50 = vrot.slane %v503_v41, 4  ;;  %v501_v52 = vsel %vm6823_vm3, %v496_v43, %v500_v25  ;;  %v508_v53 = vrot.slane %v506_v45, 5  ;;  %v516_v56 = vshrl.u32 %v6955_v33, 16 }
  0x5a   : > { %v514_v54 = vrot.slane %v512_v46, 5  ;;  %v5260_v61 = vcombine.low %v491_v42, %v501_v52  ;;  %v2295_v62 = vsel %vm6823_vm3, %v2290_v47, %v2294_v37  ;;  %v2300_v63 = vrot.slane %v2299_v48, 4  ;;  %v5458_v37 = vld [vmem:[%s6805_s6 + $0x78] sm:$0xf]  ;;  %v7004_v42 = vld [vmem:[%s6805_s6 + $0x7c] sm:$0xf] }
  0x5b   : > { %v522_v0 = vshll.u32 %v299_v44, 16  ;;  %v509_v3 = vor.u32 %v508_v53, %v505_v50  ;;  %v518_v5 = vrot.slane %v516_v56, 4  ;;  %v2307_v6 = vshrl.u32 %v5455_v51, 16  ;;  %v7012_v53 = vld [vmem:[%s6805_s6 + $0x80] sm:$0x1] }
  0x5c   : > { %v2310_v7 = vshll.u32 %v5455_v51, 16  ;;  %5994 = vmatmul.mubr.msk.bf16.gmra.mrb[12].mxu1 %vm744_vm4, %v5260_v61  ;;  %v2305_v4 = vsel %vm6823_vm3, %v2300_v63, %v2304_v49  ;;  %v2316_v11 = vshll.u32 %v6967_v58, 16  ;;  %v2320_v12 = vshrl.u32 %v6967_v58, 16  ;;  %v7016_v61 = vld [vmem:[%s6805_s6 + $0x78] sm:$0xf] }
  0x5d   : > { %v524_v9 = vrot.slane %v522_v0, 5  ;;  %v5487_v16 = vcombine.low %v2295_v62, %v2305_v4  ;;  %v510_v17 = vrot.slane %v509_v3, 4  ;;  %v519_v18 = vor.u32 %v518_v5, %v514_v54  ;;  %v7019_v5 = vld [vmem:[%s6805_s6 + $0x7c] sm:$0xf] }
  0x5e   : > { %v2309_v19 = vrot.slane %v2307_v6, 4  ;;  %v2312_v23 = vrot.slane %v2310_v7, 5  ;;  %v2318_v60 = vrot.slane %v2316_v11, 5  ;;  %v2322_v24 = vrot.slane %v2320_v12, 4 }
  0x5f   : > { %v2326_v25 = vshll.u32 %v6972_v1, 16  ;;  %6130 = vmatmul.mubr.msk.bf16.gmra.mrb[12].mxu0 %vm744_vm4, %v5487_v16  ;;  %v515_v26 = vsel %vm6823_vm3, %v510_v17, %v514_v54  ;;  %v520_v27 = vrot.slane %v519_v18, 4  ;;  %v527_v28 = vshrl.u32 %v276_v8, 16  ;;  %v301_v16 = vld [vmem:[%s6805_s6 + $0x80] sm:$0x1] }
  0x60   : > { %v530_v30 = vshll.u32 %v276_v8, 16  ;;  %v2313_v31 = vor.u32 %v2312_v23, %v2309_v19  ;;  %v2323_v32 = vor.u32 %v2322_v24, %v2318_v60  ;;  %v536_v36 = vshll.u32 %v277_v21, 16 }
  0x61   : > { %v2328_v34 = vrot.slane %v2326_v25, 5  ;;  %v525_v38 = vsel %vm6823_vm3, %v520_v27, %v524_v9  ;;  %v529_v39 = vrot.slane %v527_v28, 4  ;;  %v540_v41 = vshrl.u32 %v277_v21, 16  ;;  %v7035_v28 = vld [vmem:[%s6805_s6 + $0x88] sm:$0xf] }
  0x62   : > { %v532_v40 = vrot.slane %v530_v30, 5  ;;  %v5261_v43 = vcombine.low %v515_v26, %v525_v38  ;;  %v2314_v44 = vrot.slane %v2313_v31, 4  ;;  %v2324_v45 = vrot.slane %v2323_v32, 4 }
  0x63   : > { %v538_v46 = vrot.slane %v536_v36, 5  ;;  %v542_v48 = vrot.slane %v540_v41, 4  ;;  %v546_v49 = vshll.u32 %v300_v35, 16  ;;  %v2331_v50 = vshrl.u32 %v5458_v37, 16  ;;  %v7038_v35 = vld [vmem:[%s6805_s6 + $0x8c] sm:$0x1] }
  0x64   : > { %v533_v47 = vor.u32 %v532_v40, %v529_v39  ;;  %5997 = vmatprep.mubr.msk.bf16.mxu1 %vm744_vm4, %v5261_v43  ;;  %v2319_v51 = vsel %vm6823_vm3, %v2314_v44, %v2318_v60  ;;  %v2329_v52 = vsel %vm6823_vm3, %v2324_v45, %v2328_v34  ;;  %v2334_v54 = vshll.u32 %v5458_v37, 16  ;;  %v5461_v60 = vld [vmem:[%s6805_s6 + $0x84] sm:$0xf] }
  0x65   : > { %v2340_v56 = vshll.u32 %v7004_v42, 16  ;;  %v5488_v62 = vcombine.low %v2319_v51, %v2329_v52  ;;  %v543_v0 = vor.u32 %v542_v48, %v538_v46  ;;  %v548_v3 = vrot.slane %v546_v49, 5  ;;  %v7041_v40 = vld [vmem:[%s6805_s6 + $0x84] sm:$0xf] }
  0x66   : > { %v534_v63 = vrot.slane %v533_v47, 4  ;;  %v2333_v6 = vrot.slane %v2331_v50, 4  ;;  %v2336_v7 = vrot.slane %v2334_v54, 5  ;;  %v2344_v4 = vshrl.u32 %v7004_v42, 16 }
  0x67   : > { %v2342_v8 = vrot.slane %v2340_v56, 5  ;;  %6133 = vmatprep.mubr.msk.bf16.mxu0 %vm744_vm4, %v5488_v62  ;;  %v544_v11 = vrot.slane %v543_v0, 4  ;;  %v2350_v12 = vshll.u32 %v7012_v53, 16  ;;  %v551_v17 = vshrl.u32 %v7016_v61, 16  ;;  %v302_v62 = vld [vmem:[%s6805_s6 + $0x8c] sm:$0x1] }
  0x68   : > { %v539_v9 = vsel %vm6823_vm3, %v534_v63, %v538_v46  ;;  %v2337_v18 = vor.u32 %v2336_v7, %v2333_v6  ;;  %v2346_v19 = vrot.slane %v2344_v4, 4  ;;  %v554_v21 = vshll.u32 %v7016_v61, 16  ;;  %v7047_v46 = vld [vmem:[%s6805_s6 + $0x88] sm:$0xf]  ;;  %v5464_v7 = vld [vmem:[%s6805_s6 + $0x90] sm:$0xf] }
  0x69   : > { %v560_v23 = vshll.u32 %v7019_v5, 16  ;;  %v549_v24 = vsel %vm6823_vm3, %v544_v11, %v548_v3  ;;  %v2352_v25 = vrot.slane %v2350_v12, 5  ;;  %v553_v26 = vrot.slane %v551_v17, 4  ;;  %v7060_v12 = vld [vmem:[%s6805_s6 + $0x94] sm:$0xf] }
  0x6a   : > { %v564_v27 = vshrl.u32 %v7019_v5, 16  ;;  %v5262_v30 = vcombine.low %v539_v9, %v549_v24  ;;  %v2338_v31 = vrot.slane %v2337_v18, 4  ;;  %v2347_v32 = vor.u32 %v2346_v19, %v2342_v8 }
  0x6b   : > { %v556_v34 = vrot.slane %v554_v21, 5  ;;  %v562_v36 = vrot.slane %v560_v23, 5  ;;  %v570_v38 = vshll.u32 %v301_v16, 16  ;;  %v2355_v39 = vshrl.u32 %v5461_v60, 16 }
  0x6c   : > { %v566_v37 = vrot.slane %v564_v27, 4  ;;  %5998 = vmatmul.mubr.msk.bf16.gmra.mrb[16].mxu1 %vm744_vm4, %v5262_v30  ;;  %v2343_v41 = vsel %vm6823_vm3, %v2338_v31, %v2342_v8  ;;  %v2348_v43 = vrot.slane %v2347_v32, 4  ;;  %v2358_v45 = vshll.u32 %v5461_v60, 16  ;;  %v7069_v31 = vld [vmem:[%s6805_s6 + $0x98] sm:$0x1] }
  0x6d   : > { %v557_v44 = vor.u32 %v556_v34, %v553_v26  ;;  %v572_v48 = vrot.slane %v570_v38, 5  ;;  %v2357_v49 = vrot.slane %v2355_v39, 4  ;;  %v2364_v50 = vshll.u32 %v7035_v28, 16  ;;  %v7072_v32 = vld [vmem:[%s6805_s6 + $0x90] sm:$0xf] }
  0x6e   : > { %v567_v47 = vor.u32 %v566_v37, %v562_v36  ;;  %v2353_v51 = vsel %vm6823_vm3, %v2348_v43, %v2352_v25  ;;  %v2360_v54 = vrot.slane %v2358_v45, 5  ;;  %v2368_v56 = vshrl.u32 %v7035_v28, 16  ;;  %v7079_v45 = vld [vmem:[%s6805_s6 + $0x94] sm:$0xf] }
  0x6f   : > { %v558_v52 = vrot.slane %v557_v44, 4  ;;  %v5489_v63 = vcombine.low %v2343_v41, %v2353_v51  ;;  %v2366_v3 = vrot.slane %v2364_v50, 5  ;;  %v2374_v6 = vshll.u32 %v7038_v35, 16 }
  0x70   : > { %v568_v0 = vrot.slane %v567_v47, 4  ;;  %v2361_v4 = vor.u32 %v2360_v54, %v2357_v49  ;;  %v2370_v9 = vrot.slane %v2368_v56, 4  ;;  %v575_v11 = vshrl.u32 %v7041_v40, 16 }
  0x71   : > { %v563_v8 = vsel %vm6823_vm3, %v558_v52, %v562_v36  ;;  %6134 = vmatmul.mubr.msk.bf16.gmra.mrb[16].mxu0 %vm744_vm4, %v5489_v63  ;;  %v2376_v17 = vrot.slane %v2374_v6, 5  ;;  %v578_v18 = vshll.u32 %v7041_v40, 16  ;;  %v584_v19 = vshll.u32 %v7047_v46, 16 }
  0x72   : > { %v573_v16 = vsel %vm6823_vm3, %v568_v0, %v572_v48  ;;  %v2362_v23 = vrot.slane %v2361_v4, 4  ;;  %v2371_v60 = vor.u32 %v2370_v9, %v2366_v3  ;;  %v577_v24 = vrot.slane %v575_v11, 4 }
  0x73   : > { %v5263_v21 = vcombine.low %v563_v8, %v573_v16  ;;  %v580_v25 = vrot.slane %v578_v18, 5  ;;  %v586_v26 = vrot.slane %v584_v19, 5  ;;  %v588_v27 = vshrl.u32 %v7047_v46, 16  ;;  %v7094_v16 = vld [vmem:[%s6805_s6 + $0xa0] sm:$0xf] }
  0x74   : > { %v594_v30 = vshll.u32 %v302_v62, 16  ;;  %v2367_v34 = vsel %vm6823_vm3, %v2362_v23, %v2366_v3  ;;  %v2372_v36 = vrot.slane %v2371_v60, 4  ;;  %v2379_v37 = vshrl.u32 %v5464_v7, 16  ;;  %v303_v62 = vld [vmem:[%s6805_s6 + $0x98] sm:$0x1] }
  0x75   : > { %6001 = vmatprep.mubr.msk.bf16.mxu1 %vm744_vm4, %v5263_v21  ;;  %v2382_v38 = vshll.u32 %v5464_v7, 16  ;;  %v581_v39 = vor.u32 %v580_v25, %v577_v24  ;;  %v590_v41 = vrot.slane %v588_v27, 4  ;;  %v2388_v44 = vshll.u32 %v7060_v12, 16  ;;  %v5467_v7 = vld [vmem:[%s6805_s6 + $0x9c] sm:$0xf] }
  0x76   : > { %v596_v43 = vrot.slane %v594_v30, 5  ;;  %v2377_v47 = vsel %vm6823_vm3, %v2372_v36, %v2376_v17  ;;  %v2381_v48 = vrot.slane %v2379_v37, 4  ;;  %v2392_v50 = vshrl.u32 %v7060_v12, 16  ;;  %v7105_v37 = vld [vmem:[%s6805_s6 + $0x9c] sm:$0xf] }
  0x77   : > { %v2384_v49 = vrot.slane %v2382_v38, 5  ;;  %v5490_v51 = vcombine.low %v2367_v34, %v2377_v47  ;;  %v582_v52 = vrot.slane %v581_v39, 4  ;;  %v591_v54 = vor.u32 %v590_v41, %v586_v26 }
  0x78   : > { %v2390_v56 = vrot.slane %v2388_v44, 5  ;;  %v2394_v0 = vrot.slane %v2392_v50, 4  ;;  %v2398_v3 = vshll.u32 %v7069_v31, 16  ;;  %v599_v6 = vshrl.u32 %v7072_v32, 16 }
  0x79   : > { %v2385_v63 = vor.u32 %v2384_v49, %v2381_v48  ;;  %6137 = vmatprep.mubr.msk.bf16.mxu0 %vm744_vm4, %v5490_v51  ;;  %v587_v8 = vsel %vm6823_vm3, %v582_v52, %v586_v26  ;;  %v592_v4 = vrot.slane %v591_v54, 4  ;;  %v602_v9 = vshll.u32 %v7072_v32, 16  ;;  %v7100_v26 = vld [vmem:[%s6805_s6 + $0xa4] sm:$0x1] }
  0x7a   : > { %v608_v11 = vshll.u32 %v7079_v45, 16  ;;  %v2395_v18 = vor.u32 %v2394_v0, %v2390_v56  ;;  %v2400_v19 = vrot.slane %v2398_v3, 5  ;;  %v601_v21 = vrot.slane %v599_v6, 4  ;;  %v7117_v6 = vld [vmem:[%s6805_s6 + $0xa4] sm:$0x1] }
  0x7b   : > { %v2386_v17 = vrot.slane %v2385_v63, 4  ;;  %v597_v23 = vsel %vm6823_vm3, %v592_v4, %v596_v43  ;;  %v604_v60 = vrot.slane %v602_v9, 5  ;;  %v612_v25 = vshrl.u32 %v7079_v45, 16  ;;  %v7108_v43 = vld [vmem:[%s6805_s6 + $0xa0] sm:$0xf]  ;;  %8769 = vst [vmem:[#allocation3_spill] sm:$0xff] %v7117_v6 }
  0x7c   : > { %v610_v24 = vrot.slane %v608_v11, 5  ;;  %v5264_v27 = vcombine.low %v587_v8, %v597_v23  ;;  %v2396_v34 = vrot.slane %v2395_v18, 4  ;;  %v618_v36 = vshll.u32 %v303_v62, 16 }
  0x7d   : > { %v2391_v30 = vsel %vm6823_vm3, %v2386_v17, %v2390_v56  ;;  %v605_v38 = vor.u32 %v604_v60, %v601_v21  ;;  %v614_v39 = vrot.slane %v612_v25, 4  ;;  %v2403_v41 = vshrl.u32 %v5467_v7, 16 }
  0x7e   : > { %v2406_v44 = vshll.u32 %v5467_v7, 16  ;;  %6002 = vmatmul.mubr.msk.bf16.gmra.mrb[20].mxu1 %vm744_vm4, %v5264_v27  ;;  %v2401_v47 = vsel %vm6823_vm3, %v2396_v34, %v2400_v19  ;;  %v620_v48 = vrot.slane %v618_v36, 5  ;;  %v2412_v49 = vshll.u32 %v7094_v16, 16  ;;  %v5470_v7 = vld [vmem:[%s6805_s6 + $0xa8] sm:$0xf] }
  0x7f   : > { %v2416_v50 = vshrl.u32 %v7094_v16, 16  ;;  %v5491_v51 = vcombine.low %v2391_v30, %v2401_v47  ;;  %v606_v52 = vrot.slane %v605_v38, 4  ;;  %v615_v54 = vor.u32 %v614_v39, %v610_v24  ;;  %v7130_v27 = vld [vmem:[%s6805_s6 + $0xac] sm:$0xf]  ;;  %v7133_v39 = vld [vmem:[%s6805_s6 + $0xb0] sm:$0x1] }
  0x80   : > { %v2405_v56 = vrot.slane %v2403_v41, 4  ;;  %v2408_v62 = vrot.slane %v2406_v44, 5  ;;  %v2414_v63 = vrot.slane %v2412_v49, 5  ;;  %v2422_v3 = vshll.u32 %v7100_v26, 16  ;;  %v7136_v41 = vld [vmem:[%s6805_s6 + $0xa8] sm:$0xf] }
  0x81   : > { %v2418_v0 = vrot.slane %v2416_v50, 4  ;;  %6138 = vmatmul.mubr.msk.bf16.gmra.mrb[20].mxu0 %vm744_vm4, %v5491_v51  ;;  %v611_v8 = vsel %vm6823_vm3, %v606_v52, %v610_v24  ;;  %v616_v4 = vrot.slane %v615_v54, 4  ;;  %v623_v9 = vshrl.u32 %v7105_v37, 16  ;;  %v7140_v50 = vld [vmem:[%s6805_s6 + $0xac] sm:$0xf] }
  0x82   : > { %v626_v11 = vshll.u32 %v7105_v37, 16  ;;  %v2409_v17 = vor.u32 %v2408_v62, %v2405_v56  ;;  %v2424_v19 = vrot.slane %v2422_v3, 5  ;;  %v632_v21 = vshll.u32 %v7108_v43, 16 }
  0x83   : > { %v2419_v18 = vor.u32 %v2418_v0, %v2414_v63  ;;  %v621_v23 = vsel %vm6823_vm3, %v616_v4, %v620_v48  ;;  %v625_v60 = vrot.slane %v623_v9, 4  ;;  %v636_v24 = vshrl.u32 %v7108_v43, 16 }
  0x84   : > { %v628_v25 = vrot.slane %v626_v11, 5  ;;  %v5265_v30 = vcombine.low %v611_v8, %v621_v23  ;;  %v2410_v34 = vrot.slane %v2409_v17, 4  ;;  %v634_v38 = vrot.slane %v632_v21, 5  ;;  %v5473_v21 = vld [vmem:[%s6805_s6 + $0xb4] sm:$0xf] }
  0x85   : > { %v2420_v36 = vrot.slane %v2419_v18, 4  ;;  %v638_v47 = vrot.slane %v636_v24, 4  ;;  %v642_v49 = vshll.u32 %v7117_v6, 16  ;;  %v2427_v48 = vshrl.u32 %v5470_v7, 16  ;;  %v7150_v18 = vld [vmem:[%s6805_s6 + $0xb0] sm:$0x1] }
  0x86   : > { %v629_v44 = vor.u32 %v628_v25, %v625_v60  ;;  %6005 = vmatprep.mubr.msk.bf16.mxu1 %vm744_vm4, %v5265_v30  ;;  %v2415_v51 = vsel %vm6823_vm3, %v2410_v34, %v2414_v63  ;;  %v2430_v54 = vshll.u32 %v5470_v7, 16  ;;  %v2436_v56 = vshll.u32 %v7130_v27, 16  ;;  %8770 = vst [vmem:[#allocation4_spill] sm:$0xff] %v7150_v18 }
  0x87   : > { %v2425_v52 = vsel %vm6823_vm3, %v2420_v36, %v2424_v19  ;;  %v639_v3 = vor.u32 %v638_v47, %v634_v38  ;;  %v644_v8 = vrot.slane %v642_v49, 5  ;;  %v2429_v4 = vrot.slane %v2427_v48, 4  ;;  %v7164_v47 = vld [vmem:[%s6805_s6 + $0xb8] sm:$0xf] }
  0x88   : > { %v5492_v62 = vcombine.low %v2415_v51, %v2425_v52  ;;  %v630_v0 = vrot.slane %v629_v44, 4  ;;  %v2432_v9 = vrot.slane %v2430_v54, 5  ;;  %v2438_v11 = vrot.slane %v2436_v56, 5  ;;  %v7167_v54 = vld [vmem:[%s6805_s6 + $0xbc] sm:$0x1] }
  0x89   : > { %v2440_v17 = vshrl.u32 %v7130_v27, 16  ;;  %v640_v7 = vrot.slane %v639_v3, 4  ;;  %v2446_v19 = vshll.u32 %v7133_v39, 16  ;;  %v647_v23 = vshrl.u32 %v7136_v41, 16 }
  0x8a   : > { %6141 = vmatprep.mubr.msk.bf16.mxu0 %vm744_vm4, %v5492_v62  ;;  %v635_v63 = vsel %vm6823_vm3, %v630_v0, %v634_v38  ;;  %v2433_v60 = vor.u32 %v2432_v9, %v2429_v4  ;;  %v650_v24 = vshll.u32 %v7136_v41, 16  ;;  %v656_v30 = vshll.u32 %v7140_v50, 16 }
  0x8b   : > { %v2442_v25 = vrot.slane %v2440_v17, 4  ;;  %v645_v34 = vsel %vm6823_vm3, %v640_v7, %v644_v8  ;;  %v2448_v36 = vrot.slane %v2446_v19, 5  ;;  %v649_v44 = vrot.slane %v647_v23, 4  ;;  %v7171_v8 = vld [vmem:[%s6805_s6 + $0xb4] sm:$0xf] }
  0x8c   : > { %v660_v38 = vshrl.u32 %v7140_v50, 16  ;;  %v5266_v49 = vcombine.low %v635_v63, %v645_v34  ;;  %v2434_v48 = vrot.slane %v2433_v60, 4  ;;  %v652_v52 = vrot.slane %v650_v24, 5  ;;  %v7177_v7 = vld [vmem:[%s6805_s6 + $0xb8] sm:$0xf] }
  0x8d   : > { %v2443_v51 = vor.u32 %v2442_v25, %v2438_v11  ;;  %v658_v56 = vrot.slane %v656_v30, 5  ;;  %v666_v0 = vshll.u32 %v7150_v18, 16  ;;  %v2451_v3 = vshrl.u32 %v5473_v21, 16  ;;  %v5524_v18 = vld [vmem:[%s6805_s6 + $0x9c] sm:$0xe] }
  0x8e   : > { %v662_v62 = vrot.slane %v660_v38, 4  ;;  %6006 = vmatmul.mubr.msk.bf16.gmra.mrb[24].mxu1 %vm744_vm4, %v5266_v49  ;;  %v2439_v4 = vsel %vm6823_vm3, %v2434_v48, %v2438_v11  ;;  %v653_v17 = vor.u32 %v652_v52, %v649_v44  ;;  %v2454_v63 = vshll.u32 %v5473_v21, 16  ;;  %v7184_v49 = vld [vmem:[%s6805_s6 + $0xbc] sm:$0x1] }
  0x8f   : > { %v2444_v9 = vrot.slane %v2443_v51, 4  ;;  %v668_v23 = vrot.slane %v666_v0, 5  ;;  %v2453_v60 = vrot.slane %v2451_v3, 4  ;;  %v2460_v25 = vshll.u32 %v7164_v47, 16  ;;  %8771 = vst [vmem:[#allocation5_spill] sm:$0xff] %v7184_v49 }
  0x90   : > { %v663_v19 = vor.u32 %v662_v62, %v658_v56  ;;  %v654_v30 = vrot.slane %v653_v17, 4  ;;  %v2456_v34 = vrot.slane %v2454_v63, 5  ;;  %v2464_v38 = vshrl.u32 %v7164_v47, 16  ;;  %v5476_v17 = vld [vmem:[%s6805_s6 + $0xc0] sm:$0xf] }
  0x91   : > { %v2449_v24 = vsel %vm6823_vm3, %v2444_v9, %v2448_v36  ;;  %v2462_v21 = vrot.slane %v2460_v25, 5  ;;  %v2470_v48 = vshll.u32 %v7167_v54, 16  ;;  %v671_v36 = vshrl.u32 %v7171_v8, 16 }
  0x92   : > { %v5493_v11 = vcombine.low %v2439_v4, %v2449_v24  ;;  %v664_v44 = vrot.slane %v663_v19, 4  ;;  %v659_v51 = vsel %vm6823_vm3, %v654_v30, %v658_v56  ;;  %v2457_v52 = vor.u32 %v2456_v34, %v2453_v60  ;;  %v7197_v60 = vld [vmem:[%s6805_s6 + $0xc4] sm:$0xf] }
  0x93   : > { %v2466_v62 = vrot.slane %v2464_v38, 4  ;;  %v2472_v3 = vrot.slane %v2470_v48, 5  ;;  %v674_v4 = vshll.u32 %v7171_v8, 16  ;;  %v680_v9 = vshll.u32 %v7177_v7, 16 }
  0x94   : > { %6142 = vmatmul.mubr.msk.bf16.gmra.mrb[24].mxu0 %vm744_vm4, %v5493_v11  ;;  %v669_v0 = vsel %vm6823_vm3, %v664_v44, %v668_v23  ;;  %v2458_v19 = vrot.slane %v2457_v52, 4  ;;  %v673_v56 = vrot.slane %v671_v36, 4  ;;  %v684_v34 = vshrl.u32 %v7177_v7, 16  ;;  %v7202_v23 = vld [vmem:[%s6805_s6 + $0xc8] sm:$0x1] }
  0x95   : > { %v5267_v63 = vcombine.low %v659_v51, %v669_v0  ;;  %v2467_v25 = vor.u32 %v2466_v62, %v2462_v21  ;;  %v676_v24 = vrot.slane %v674_v4, 5  ;;  %v682_v30 = vrot.slane %v680_v9, 5  ;;  %v7211_v4 = vld [vmem:[%s8745_s1 + $0x4] sm:$0x3] }
  0x96   : > { %v690_v38 = vshll.u32 %v7184_v49, 16  ;;  %v2463_v11 = vsel %vm6823_vm3, %v2458_v19, %v2462_v21  ;;  %v2475_v48 = vshrl.u32 %v5476_v17, 16  ;;  %v2478_v51 = vshll.u32 %v5476_v17, 16  ;;  %v5512_v19 = vld [vmem:[%s6805_s6 + $0xc] sm:$0xe] }
  0x97   : > { %6009 = vmatprep.mubr.msk.bf16.mxu1 %vm744_vm4, %v5267_v63  ;;  %v2468_v44 = vrot.slane %v2467_v25, 4  ;;  %v677_v52 = vor.u32 %v676_v24, %v673_v56  ;;  %v686_v62 = vrot.slane %v684_v34, 4  ;;  %v2484_v0 = vshll.u32 %v7197_v60, 16  ;;  %v7329_v49 = vld [vmem:[%s6805_s6 + $0x40] sm:$0xf] }
  0x98   : > { %v692_v36 = vrot.slane %v690_v38, 5  ;;  %v2477_v63 = vrot.slane %v2475_v48, 4  ;;  %v2480_v22 = vrot.slane %v2478_v51, 5  ;;  %v2488_v21 = vshrl.u32 %v7197_v60, 16 }
  0x99   : > { %v2473_v9 = vsel %vm6823_vm3, %v2468_v44, %v2472_v3  ;;  %v678_v25 = vrot.slane %v677_v52, 4  ;;  %v687_v56 = vor.u32 %v686_v62, %v682_v30  ;;  %v2486_v24 = vrot.slane %v2484_v0, 5  ;;  %v6658_v62 = vld [vmem:[%s6805_s6] sm:$0xf]  ;;  %v7232_v0 = vld [vmem:[%s6805_s6 + $0x4] sm:$0xf] }
  0x9a   : > { %v5494_v17 = vcombine.low %v2463_v11, %v2473_v9  ;;  %v2481_v34 = vor.u32 %v2480_v22, %v2477_v63  ;;  %v2490_v38 = vrot.slane %v2488_v21, 4  ;;  %v2494_v10 = vshll.u32 %v7202_v23, 16  ;;  %v5513_v22 = vld [vmem:[%s6805_s6 + $0x18] sm:$0xe] }
  0x9b   : > { %v1087_v57 = vsel %vm793_vm0, %v6977_v2, 0  ;;  %v2867_v3 = vrot.slane %v2865_v20, 4  ;;  %v683_v11 = vsel %vm6823_vm3, %v678_v25, %v682_v30  ;;  %v688_v44 = vrot.slane %v687_v56, 4  ;;  %v5514_v56 = vld [vmem:[%s6805_s6 + $0x24] sm:$0xe] }
  0x9c   : > { %6145 = vmatprep.mubr.msk.bf16.mxu0 %vm744_vm4, %v5494_v17  ;;  %6014 = vmatpush3.bf16.msra.mxu1 %v1087_v57  ;;  %v2482_v48 = vrot.slane %v2481_v34, 4  ;;  %v2491_v51 = vor.u32 %v2490_v38, %v2486_v24  ;;  %v2496_v52 = vrot.slane %v2494_v10, 5  ;;  %v5285_v30 = vcombine.low %v6658_v62, %v7232_v0  ;;  %v6661_v62 = vld [vmem:[%s6805_s6 + $0x2c] sm:$0x1] }
  0x9d   : > { %6577 = vmatprep.subr.msk.bf16.mxu1 %vm793_vm0, %v7211_v4  ;;  %v693_v2 = vsel %vm6823_vm3, %v688_v44, %v692_v36  ;;  %v5528_v9 = vrot.slane %v5512_v19, 9  ;;  %v8774_v63 = vrot.slane %v6812_v14, 5  ;;  %v5529_v36 = vrot.slane %v5513_v22, 9 }
  0x9e   : > { %v5268_v21 = vcombine.low %v683_v11, %v693_v2  ;;  %v2487_v17 = vsel %vm6823_vm3, %v2482_v48, %v2486_v24  ;;  %v2492_v25 = vrot.slane %v2491_v51, 4  ;;  %v8776_v44 = vrot.slane %v6815_v15, 5  ;;  %v6660_v48 = vld [vmem:[%s6805_s6 + $0x28] sm:$0xf] }
  0x9f   : > { %v2860_v10 = vrot.slane %v8774_v63, 4  ;;  %v8775_v34 = vmov %v8774_v63  ;;  %v8777_v11 = vrot.slane %v6842_v59, 5  ;;  %v2866_v15 = vsel %vm7235_vm7, %v5529_v36, %v2865_v20  ;;  %v6662_v20 = vld [vmem:[%s6805_s6 + $0xc] sm:$0xf]  ;;  %v5515_v63 = vld [vmem:[%s6805_s6 + $0x30] sm:$0xe] }
  0xa0   : > { %v2859_v38 = vsel %vm7235_vm7, %v5528_v9, %v8775_v34  ;;  %6010 = vmatmul.mubr.msk.bf16.gmra.mrb[28].mxu1 %vm744_vm4, %v5268_v21  ;;  %v2497_v14 = vsel %vm6823_vm3, %v2492_v25, %v2496_v52  ;;  %v2872_v51 = vrot.slane %v6660_v48, 5  ;;  %v2875_v52 = vrot.slane %v6661_v62, 5  ;;  %v7270_v9 = vld [vmem:[%s6805_s6 + $0x10] sm:$0xf]  ;;  %v7277_v25 = vld [vmem:[%s6805_s6 + $0x1c] sm:$0xf] }
  0xa1   : > { %v2862_v19 = vsel %vm7235_vm7, %v2860_v10, %v8776_v44  ;;  %v2869_v2 = vsel %vm7235_vm7, %v2867_v3, %v8777_v11  ;;  %v5495_v22 = vcombine.low %v2487_v17, %v2497_v14  ;;  %6015 = vmatprep.mubr.msk.bf16.mxu1 %vm744_vm4, %v5285_v30  ;;  %v5530_v3 = vrot.slane %v5514_v56, 9  ;;  %v6664_v10 = vld [vmem:[%s6805_s6 + $0x34] sm:$0xf]  ;;  %v6665_v17 = vld [vmem:[%s6805_s6 + $0x18] sm:$0xf] }
  0xa2   : > { %v5545_v24 = vcombine.low %v2859_v38, %v2862_v19  ;;  %v5546_v59 = vcombine.low %v2866_v15, %v2869_v2  ;;  %v2874_v55 = vrot.slane %v2872_v51, 4  ;;  %v5286_v30 = vcombine.low %v6662_v20, %v7270_v9  ;;  %v5516_v38 = vld [vmem:[%s6805_s6 + $0x3c] sm:$0xe]  ;;  %v6667_v44 = vld [vmem:[%s6805_s6 + $0x40] sm:$0xf] }
  0xa3   : > { %6146 = vmatmul.mubr.msk.bf16.gmra.mrb[28].mxu0 %vm744_vm4, %v5495_v22  ;;  %v2879_v21 = vrot.slane %v6664_v10, 5  ;;  %v5287_v36 = vcombine.low %v6665_v17, %v7277_v25  ;;  %v2873_v56 = vsel %vm7235_vm7, %v5530_v3, %v2872_v51  ;;  %v2886_v19 = vrot.slane %v6667_v44, 5  ;;  %v6668_v14 = vld [vmem:[%s6805_s6 + $0x38] sm:$0x1]  ;;  %v5517_v15 = vld [vmem:[%s6805_s6 + $0x48] sm:$0xe] }
  0xa4   : > { %6151 = vmatprep.mubr.msk.bf16.mxu0 %vm744_vm4, %v5545_v24  ;;  %v2876_v34 = vsel %vm7235_vm7, %v2874_v55, %v2875_v52  ;;  %v3426_v11 = vsel %vm793_vm0, %v6990_v13, 0  ;;  %v5531_v2 = vrot.slane %v5515_v63, 9  ;;  %v2882_v24 = vrot.slane %v6668_v14, 5  ;;  %v6669_v51 = vld [vmem:[%s6805_s6 + $0x4c] sm:$0xf] }
  0xa5   : > { %v5547_v22 = vcombine.low %v2873_v56, %v2876_v34  ;;  %v2881_v3 = vrot.slane %v2879_v21, 4  ;;  %v5532_v48 = vrot.slane %v5516_v38, 9  ;;  %v2893_v62 = vrot.slane %v6669_v51, 5  ;;  %v6670_v55 = vld [vmem:[%s6805_s6 + $0x44] sm:$0x1] }
  0xa6   : > { %v2888_v52 = vrot.slane %v2886_v19, 4  ;;  %v2889_v13 = vrot.slane %v6670_v55, 5  ;;  %v5518_v20 = vld [vmem:[%s6805_s6 + $0x54] sm:$0xe]  ;;  %v6671_v63 = vld [vmem:[%s6805_s6 + $0x58] sm:$0xf]  ;;  %v2880_v34 = vsel %vm7235_vm7, %v5531_v2, %v2879_v21 }
  0xa7   : > { %v2900_v10 = vrot.slane %v6671_v63, 5  ;;  %v6672_v17 = vld [vmem:[%s6805_s6 + $0x24] sm:$0xf]  ;;  %v7304_v56 = vld [vmem:[%s6805_s6 + $0x28] sm:$0xf]  ;;  %v2883_v44 = vsel %vm7235_vm7, %v2881_v3, %v2882_v24  ;;  %v5533_v14 = vrot.slane %v5517_v15, 9 }
  0xa8   : > { %6016 = vmatmul.mubr.msk.bf16.vlgmr.msra.gmra.mrb[0].mxu1 %vm744_vm4, %v5286_v30  ;;  %v7299_v30 = vld [vmem:[%s8745_s1 + $0xe] sm:$0x3]  ;;  %v5519_v38 = vld [vmem:[%s6805_s6 + $0x60] sm:$0xe]  ;;  %v6674_v51 = vld [vmem:[%s6805_s6 + $0x50] sm:$0x1]  ;;  %v2890_v2 = vsel %vm7235_vm7, %v2888_v52, %v2889_v13  ;;  %v5548_v29 = vcombine.low %v2880_v34, %v2883_v44 }
  0xa9   : > { %6019 = vmatprep.mubr.msk.bf16.mxu1 %vm744_vm4, %v5287_v36  ;;  %v5288_v36 = vcombine.low %v6672_v17, %v7304_v56  ;;  %v2896_v55 = vrot.slane %v6674_v51, 5  ;;  %v6675_v63 = vld [vmem:[%s6805_s6 + $0x30] sm:$0xf]  ;;  %v7316_v17 = vld [vmem:[%s6805_s6 + $0x34] sm:$0xf]  ;;  %v2902_v24 = vrot.slane %v2900_v10, 4 }
  0xaa   : > { %v5289_v21 = vcombine.low %v6675_v63, %v7316_v17  ;;  %v6677_v15 = vld [vmem:[%s6805_s6 + $0x5c] sm:$0x1]  ;;  %v5523_v51 = vld [vmem:[%s6805_s6 + $0x90] sm:$0xe]  ;;  %v7333_v52 = vld [vmem:[%s6805_s6 + $0x6c] sm:$0xe] }
  0xab   : > { %6152 = vmatmul.mubr.msk.bf16.vlgmr.msra.gmra.mrb[0].mxu0 %vm744_vm4, %v5546_v59  ;;  %v2895_v59 = vrot.slane %v2893_v62, 4  ;;  %v2903_v3 = vrot.slane %v6677_v15, 5  ;;  %v6678_v63 = vld [vmem:[%s6805_s6 + $0x3c] sm:$0xf]  ;;  %v6680_v44 = vld [vmem:[%s6805_s6 + $0x64] sm:$0xf] }
  0xac   : > { %6184 = vmatpush3.bf16.msra.mxu0 %v3426_v11  ;;  %6155 = vmatprep.mubr.msk.bf16.mxu0 %vm744_vm4, %v5547_v22  ;;  %v2887_v11 = vsel %vm7235_vm7, %v5532_v48, %v2886_v19  ;;  %v5534_v22 = vrot.slane %v5518_v20, 9  ;;  %v5290_v19 = vcombine.low %v6678_v63, %v7329_v49  ;;  %v5535_v48 = vrot.slane %v5519_v38, 9  ;;  %v6681_v63 = vld [vmem:[%s6805_s6 + $0x48] sm:$0xf]  ;;  %v7345_v38 = vld [vmem:[%s6805_s6 + $0x4c] sm:$0xf] }
  0xad   : > { %6582 = vmatprep.subr.msk.bf16.mxu0 %vm793_vm0, %v7299_v30  ;;  %v5549_v13 = vcombine.low %v2887_v11, %v2890_v2  ;;  %v2894_v20 = vsel %vm7235_vm7, %v5533_v14, %v2893_v62  ;;  %v2897_v34 = vsel %vm7235_vm7, %v2895_v59, %v2896_v55  ;;  %v2907_v15 = vrot.slane %v6680_v44, 5  ;;  %8778 = vst [vmem:[#allocation6_spill] sm:$0xff] %v7345_v38  ;;  %v7351_v11 = vld [vmem:[%s6805_s6 + $0x54] sm:$0xf]  ;;  %v7354_v62 = vld [vmem:[%s6805_s6 + $0x58] sm:$0xf] }
  0xae   : > { %v5291_v6 = vcombine.low %v6681_v63, %v7345_v38  ;;  %v5539_v59 = vrot.slane %v5523_v51, 9  ;;  %v2904_v55 = vsel %vm7235_vm7, %v2902_v24, %v2903_v3  ;;  %v7362_v44 = vld [vmem:[%s6805_s6 + $0x60] sm:$0xf]  ;;  %v5550_v63 = vcombine.low %v2894_v20, %v2897_v34  ;;  %v5525_v3 = vld [vmem:[%s6805_s6 + $0xa8] sm:$0xe] }
  0xaf   : > { %v7370_v14 = vsel %vm7235_vm7, %v5535_v48, %v2907_v15  ;;  %v2935_v51 = vrot.slane %v7060_v12, 5  ;;  %v2938_v24 = vrot.slane %v7069_v31, 5  ;;  %v5540_v38 = vrot.slane %v5524_v18, 9 }
  0xb0   : > { %6020 = vmatmul.mubr.msk.bf16.gmra.mrb[4].mxu1 %vm744_vm4, %v5288_v36  ;;  %v2901_v36 = vsel %vm7235_vm7, %v5534_v22, %v2900_v10  ;;  %v5536_v22 = vrot.slane %v7333_v52, 9  ;;  %v2942_v10 = vrot.slane %v7094_v16, 5  ;;  %v2945_v52 = vrot.slane %v7100_v26, 5 }
  0xb1   : > { %6023 = vmatprep.mubr.msk.bf16.mxu1 %vm744_vm4, %v5289_v21  ;;  %v6685_v21 = vld [vmem:[%s6805_s6 + $0x68] sm:$0x1]  ;;  %v5551_v20 = vcombine.low %v2901_v36, %v2904_v55  ;;  %v2914_v34 = vrot.slane %v6967_v58, 5  ;;  %v7382_v48 = vsel %vm7235_vm7, %v5539_v59, %v2935_v51  ;;  %v2937_v12 = vrot.slane %v2935_v51, 4  ;;  %v5527_v59 = vld [vmem:[%s6805_s6 + $0xc0] sm:$0xe] }
  0xb2   : > { %v2910_v2 = vrot.slane %v6685_v21, 5  ;;  %v2909_v21 = vrot.slane %v2907_v15, 4  ;;  %v7386_v31 = vsel %vm7235_vm7, %v5540_v38, %v2942_v10  ;;  %v5541_v18 = vrot.slane %v5525_v3, 9 }
  0xb3   : > { %6156 = vmatmul.mubr.msk.bf16.gmra.mrb[4].mxu0 %vm744_vm4, %v5548_v29  ;;  %v5526_v29 = vld [vmem:[%s6805_s6 + $0xb4] sm:$0xe]  ;;  %v2949_v15 = vrot.slane %v7130_v27, 5  ;;  %v2917_v16 = vrot.slane %v6972_v1, 5  ;;  %v7392_v26 = vsel %vm7235_vm7, %v2937_v12, %v2938_v24  ;;  %v2952_v58 = vrot.slane %v7133_v39, 5 }
  0xb4   : > { %6159 = vmatprep.mubr.msk.bf16.mxu0 %vm744_vm4, %v5549_v13  ;;  %v2944_v13 = vrot.slane %v2942_v10, 4  ;;  %v5542_v36 = vrot.slane %v5526_v29, 9  ;;  %v5556_v38 = vcombine.low %v7382_v48, %v7392_v26  ;;  %v2916_v10 = vrot.slane %v2914_v34, 4  ;;  %v1251_v48 = vld [vmem:[%s6805_s6 + $0xc] sm:$0xe] }
  0xb5   : > { %v7405_v1 = vsel %vm7235_vm7, %v5541_v18, %v2949_v15  ;;  %v2951_v27 = vrot.slane %v2949_v15, 4  ;;  %v2959_v51 = vrot.slane %v7167_v54, 5  ;;  %v5543_v3 = vrot.slane %v5527_v59, 9 }
  0xb6   : > { %v7401_v55 = vsel %vm7235_vm7, %v2944_v13, %v2945_v52  ;;  %v2963_v52 = vrot.slane %v7197_v60, 5  ;;  %v2966_v29 = vrot.slane %v7202_v23, 5  ;;  %v1512_v60 = vsel %vm793_vm0, %v7211_v4, 0  ;;  %v5521_v4 = vld [vmem:[%s6805_s6 + $0x78] sm:$0xe] }
  0xb7   : > { %v5557_v39 = vcombine.low %v7386_v31, %v7401_v55  ;;  %v7414_v24 = vsel %vm7235_vm7, %v2951_v27, %v2952_v58  ;;  %v2911_v23 = vsel %vm7235_vm7, %v2909_v21, %v2910_v2  ;;  %v2921_v31 = vrot.slane %v7004_v42, 5  ;;  %6048 = vmatpush3.bf16.msra.mxu1 %v1512_v60  ;;  %v5522_v42 = vld [vmem:[%s6805_s6 + $0x84] sm:$0xe] }
  0xb8   : > { %6024 = vmatmul.mubr.msk.bf16.gmra.mrb[8].mxu1 %vm744_vm4, %v5290_v19  ;;  %v2956_v19 = vrot.slane %v7164_v47, 5  ;;  %v5558_v47 = vcombine.low %v7405_v1, %v7414_v24  ;;  %v2965_v13 = vrot.slane %v2963_v52, 4  ;;  %v2915_v18 = vsel %vm7235_vm7, %v5536_v22, %v2914_v34 }
  0xb9   : > { %6027 = vmatprep.mubr.msk.bf16.mxu1 %vm744_vm4, %v5291_v6  ;;  %v7421_v6 = vld [vmem:[%s8745_s1 + $0x6] sm:$0x3]  ;;  %v2918_v15 = vsel %vm7235_vm7, %v2916_v10, %v2917_v16  ;;  %v5552_v34 = vcombine.low %v7370_v14, %v2911_v23  ;;  %v8779_v16 = vcombine.low %v7351_v11, %v7354_v62  ;;  %v2923_v59 = vrot.slane %v2921_v31, 4  ;;  %v6687_v11 = vld [vmem:[%s6805_s6 + $0x6c] sm:$0xf] }
  0xba   : > { %v7428_v54 = vsel %vm7235_vm7, %v5542_v36, %v2956_v19  ;;  %v2958_v12 = vrot.slane %v2956_v19, 4  ;;  %6578 = vmatprep.subr.msk.bf16.mxu1 %vm793_vm0, %v7421_v6  ;;  %v7457_v22 = vsel %vm7235_vm7, %v2965_v13, %v2966_v29  ;;  %v5553_v58 = vcombine.low %v2915_v18, %v2918_v15  ;;  %v1250_v23 = vld [vmem:[%s6805_s6] sm:$0xe]  ;;  %v6690_v18 = vld [vmem:[%s6805_s6 + $0x14] sm:$0x1] }
  0xbb   : > { %6160 = vmatmul.mubr.msk.bf16.gmra.mrb[8].mxu0 %vm744_vm4, %v5550_v63  ;;  %v7438_v63 = vsel %vm7235_vm7, %v5543_v3, %v2963_v52  ;;  %v5537_v36 = vrot.slane %v5521_v4, 9  ;;  %v2924_v55 = vrot.slane %v7012_v53, 5  ;;  %v8780_v27 = vcombine.low %v7362_v44, %v6955_v33 }
  0xbc   : > { %6163 = vmatprep.mubr.msk.bf16.mxu0 %vm744_vm4, %v5551_v20  ;;  %v2928_v20 = vrot.slane %v7035_v28, 5  ;;  %v7448_v2 = vsel %vm7235_vm7, %v2958_v12, %v2959_v51  ;;  %v5560_v28 = vcombine.low %v7438_v63, %v7457_v22  ;;  %v5538_v10 = vrot.slane %v5522_v42, 9  ;;  %v7476_v51 = vld [vmem:[%s6805_s6 + $0x70] sm:$0xf] }
  0xbd   : > { %v5559_v21 = vcombine.low %v7428_v54, %v7448_v2  ;;  %v2931_v19 = vrot.slane %v7038_v35, 5  ;;  %v5294_v3 = vcombine.low %v6687_v11, %v7476_v51  ;;  %v2922_v53 = vsel %vm7235_vm7, %v5537_v36, %v2921_v31  ;;  %v1255_v36 = vld [vmem:[%s6805_s6 + $0x3c] sm:$0xe] }
  0xbe   : > { %v2930_v14 = vrot.slane %v2928_v20, 4  ;;  %v2925_v33 = vsel %vm7235_vm7, %v2923_v59, %v2924_v55  ;;  %v5295_v44 = vcombine.low %v7016_v61, %v7019_v5  ;;  %v2929_v35 = vsel %vm7235_vm7, %v5538_v10, %v2928_v20  ;;  %v1254_v20 = vld [vmem:[%s6805_s6 + $0x30] sm:$0xe] }
  0xbf   : > { %v5554_v29 = vcombine.low %v2922_v53, %v2925_v33  ;;  %v5296_v61 = vcombine.low %v7041_v40, %v7047_v46  ;;  %v5297_v5 = vcombine.low %v7072_v32, %v7079_v45  ;;  %v1303_v60 = vrot.slane %v7232_v0, 5  ;;  %v6689_v46 = vld [vmem:[%s6805_s6 + $0x8] sm:$0x1]  ;;  %v6626_v33 = vld [vmem:[%s6805_s6 + $0x18] sm:$0xff]  }
  0xc0   : > { %6028 = vmatmul.mubr.msk.bf16.gmra.mrb[12].mxu1 %vm744_vm4, %v8779_v16  ;;  %v2932_v52 = vsel %vm7235_vm7, %v2930_v14, %v2931_v19  ;;  %v5298_v40 = vcombine.low %v7105_v37, %v7108_v43  ;;  %v1306_v32 = vrot.slane %v6689_v46, 5  ;;  %v5299_v45 = vcombine.low %v7136_v41, %v7140_v50  ;;  %v1253_v41 = vld [vmem:[%s6805_s6 + $0x24] sm:$0xe]  ;;  %v6691_v16 = vld [vmem:[%s6805_s6 + $0x20] sm:$0x1] }
  0xc1   : > { %6031 = vmatprep.mubr.msk.bf16.mxu1 %vm744_vm4, %v8780_v27  ;;  %v5555_v12 = vcombine.low %v2929_v35, %v2932_v52  ;;  %v5317_v31 = vrot.slane %v1250_v23, 9  ;;  %v1305_v0 = vrot.slane %v1303_v60, 4  ;;  %v1310_v13 = vrot.slane %v7270_v9, 5  ;;  %v6693_v14 = vld [vmem:[%s6805_s6 + $0x38] sm:$0x1] }
  0xc2   : > { %v1317_v26 = vrot.slane %v7277_v25, 5  ;;  %v1331_v9 = vrot.slane %v7316_v17, 5  ;;  %v1313_v25 = vrot.slane %v6690_v18, 5  ;;  %v5318_v15 = vrot.slane %v1251_v48, 9  ;;  %v1259_v48 = vld [vmem:[%s6805_s6 + $0x6c] sm:$0xe] }
  0xc3   : > { %6164 = vmatmul.mubr.msk.bf16.gmra.mrb[12].mxu0 %vm744_vm4, %v5552_v34  ;;  %v1304_v37 = vsel %vm7235_vm7, %v5317_v31, %v1303_v60  ;;  %v1307_v43 = vsel %vm7235_vm7, %v1305_v0, %v1306_v32  ;;  %v1312_v4 = vrot.slane %v1310_v13, 4  ;;  %v5300_v17 = vcombine.low %v7171_v8, %v7177_v7  ;;  %v8781_v32 = vld [vmem:[#allocation6_spill] sm:$0xff] }
  0xc4   : > { %6167 = vmatprep.mubr.msk.bf16.mxu0 %vm744_vm4, %v5553_v58  ;;  %v1319_v34 = vrot.slane %v1317_v26, 4  ;;  %v1320_v58 = vrot.slane %v6691_v16, 5  ;;  %v5334_v1 = vcombine.low %v1304_v37, %v1307_v43  ;;  %v5320_v24 = vrot.slane %v1253_v41, 9  ;;  %v1258_v31 = vld [vmem:[%s6805_s6 + $0x60] sm:$0xe]  ;;  %v6628_v16 = vld [vmem:[%s6805_s6 + $0x30] sm:$0xff]  }
  0xc5   : > { %v5321_v27 = vrot.slane %v1254_v20, 9  ;;  %v1333_v10 = vrot.slane %v1331_v9, 4  ;;  %v1334_v19 = vrot.slane %v6693_v14, 5  ;;  %v1314_v54 = vsel %vm7235_vm7, %v1312_v4, %v1313_v25  ;;  %v6695_v0 = vld [vmem:[%s6805_s6 + $0x64] sm:$0xf] }
  0xc6   : > { %v5322_v2 = vrot.slane %v1255_v36, 9  ;;  %v6697_v43 = vld [vmem:[%s6805_s6 + $0x5c] sm:$0x1]  ;;  %v1261_v4 = vld [vmem:[%s6805_s6 + $0x84] sm:$0xe] }
  0xc7   : > { %v7563_v52 = vsel %vm7235_vm7, %v5321_v27, %v1331_v9  ;;  %v1355_v41 = vrot.slane %v6697_v43, 5  ;;  %v6698_v9 = vld [vmem:[%s6805_s6 + $0x7c] sm:$0xf]  ;;  %v6699_v20 = vld [vmem:[%s6805_s6 + $0x88] sm:$0xf] }
  0xc8   : > { %6032 = vmatmul.mubr.msk.bf16.gmra.mrb[16].mxu1 %vm744_vm4, %v5294_v3  ;;  %v6694_v3 = vld [vmem:[%s6805_s6 + $0x44] sm:$0x1]  ;;  %v1373_v18 = vrot.slane %v6698_v9, 5 }
  0xc9   : > { %6035 = vmatprep.mubr.msk.bf16.mxu1 %vm744_vm4, %v5295_v44  ;;  %v1341_v53 = vrot.slane %v6694_v3, 5 }
  0xca   : > { %v1375_v14 = vrot.slane %v1373_v18, 4 }
  0xcb   : > { %6168 = vmatmul.mubr.msk.bf16.gmra.mrb[16].mxu0 %vm744_vm4, %v5554_v29  ;;  %v7567_v29 = vsel %vm7235_vm7, %v1333_v10, %v1334_v19  ;;  %v1262_v10 = vld [vmem:[%s6805_s6 + $0x90] sm:$0xe]  ;;  %v6702_v19 = vld [vmem:[%s6805_s6 + $0x80] sm:$0x1] }
  0xcc   : > { %6171 = vmatprep.mubr.msk.bf16.mxu0 %vm744_vm4, %v5555_v12  ;;  %v1256_v12 = vld [vmem:[%s6805_s6 + $0x48] sm:$0xe]  ;;  %v5338_v22 = vcombine.low %v7563_v52, %v7567_v29 }
  0xd0   : > { %6036 = vmatmul.mubr.msk.bf16.gmra.mrb[20].mxu1 %vm744_vm4, %v5296_v61 }
  0xd1   : > { %6039 = vmatprep.mubr.msk.bf16.mxu1 %vm744_vm4, %v5297_v5  ;;  %v7572_v5 = vsel %vm793_vm0, %v7299_v30, 0  ;;  %v1345_v30 = vrot.slane %v8781_v32, 5 }
  0xd3   : > { %6172 = vmatmul.mubr.msk.bf16.gmra.mrb[20].mxu0 %vm744_vm4, %v5556_v38  ;;  %v1252_v38 = vld [vmem:[%s6805_s6 + $0x18] sm:$0xe] }
  0xd4   : > { %6175 = vmatprep.mubr.msk.bf16.mxu0 %vm744_vm4, %v5557_v39  ;;  %v1324_v39 = vrot.slane %v7304_v56, 5  ;;  %v5319_v42 = vrot.slane %v1252_v38, 9  ;;  %v1338_v56 = vrot.slane %v7329_v49, 5  ;;  %v1311_v49 = vsel %vm7235_vm7, %v5318_v15, %v1310_v13 }
  0xd5   : > { %v5335_v61 = vcombine.low %v1311_v49, %v1314_v54  ;;  %v1359_v13 = vrot.slane %v6695_v0, 5  ;;  %v5325_v15 = vrot.slane %v1258_v31, 9  ;;  %v1376_v49 = vrot.slane %v6702_v19, 5 }
  0xd6   : > { %v1326_v55 = vrot.slane %v1324_v39, 4  ;;  %v1318_v8 = vsel %vm7235_vm7, %v5319_v42, %v1317_v26  ;;  %v1340_v11 = vrot.slane %v1338_v56, 4  ;;  %v7555_v44 = vsel %vm7235_vm7, %v5320_v24, %v1324_v39  ;;  %v1260_v39 = vld [vmem:[%s6805_s6 + $0x78] sm:$0xe] }
  0xd7   : > { %v7576_v23 = vsel %vm7235_vm7, %v5322_v2, %v1338_v56  ;;  %v1366_v26 = vrot.slane %v7476_v51, 5  ;;  %v1380_v42 = vrot.slane %v6699_v20, 5  ;;  %v1871_v51 = vsel %vm793_vm0, %v7421_v6, 0  ;;  %v1263_v2 = vld [vmem:[%s6805_s6 + $0x9c] sm:$0xe] }
  0xd8   : > { %6040 = vmatmul.mubr.msk.bf16.gmra.mrb[24].mxu1 %vm744_vm4, %v5298_v40  ;;  %v1257_v40 = vld [vmem:[%s6805_s6 + $0x54] sm:$0xe]  ;;  %v7585_v46 = vsel %vm7235_vm7, %v1340_v11, %v1341_v53  ;;  %v1361_v56 = vrot.slane %v1359_v13, 4  ;;  %v5326_v24 = vrot.slane %v1259_v48, 9  ;;  %v5327_v27 = vrot.slane %v1260_v39, 9 }
  0xd9   : > { %6043 = vmatprep.mubr.msk.bf16.mxu1 %vm744_vm4, %v5299_v45  ;;  %v1352_v45 = vrot.slane %v7354_v62, 5  ;;  %v6696_v62 = vld [vmem:[%s6805_s6 + $0x50] sm:$0x1]  ;;  %v5324_v37 = vrot.slane %v1257_v40, 9  ;;  %v5339_v25 = vcombine.low %v7576_v23, %v7585_v46  ;;  %v5328_v54 = vrot.slane %v1261_v4, 9 }
  0xda   : > { %v1348_v38 = vrot.slane %v6696_v62, 5  ;;  %v6703_v11 = vld [vmem:[%s6805_s6 + $0x8c] sm:$0x1]  ;;  %v6704_v53 = vld [vmem:[%s6805_s6 + $0x94] sm:$0xf]  ;;  %v7643_v40 = vsel %vm7235_vm7, %v5325_v15, %v1359_v13  ;;  %v7662_v0 = vsel %vm7235_vm7, %v5327_v27, %v1373_v18  ;;  %v5329_v13 = vrot.slane %v1262_v10, 9 }
  0xdb   : > { %6176 = vmatmul.mubr.msk.bf16.gmra.mrb[24].mxu0 %vm744_vm4, %v5558_v47  ;;  %v6692_v47 = vld [vmem:[%s6805_s6 + $0x2c] sm:$0x1]  ;;  %v1354_v36 = vrot.slane %v1352_v45, 4  ;;  %v1383_v3 = vrot.slane %v6703_v11, 5  ;;  %v7671_v48 = vsel %vm7235_vm7, %v5328_v54, %v1380_v42  ;;  %v6629_v18 = vld [vmem:[%s6805_s6 + $0x3c] sm:$0xff]  }
  0xdc   : > { %6179 = vmatprep.mubr.msk.bf16.mxu0 %vm744_vm4, %v5559_v21  ;;  %v1327_v59 = vrot.slane %v6692_v47, 5  ;;  %v1321_v21 = vsel %vm7235_vm7, %v1319_v34, %v1320_v58  ;;  %v6627_v34 = vld [vmem:[%s6805_s6 + $0x24] sm:$0xff]   ;;  %v1347_v58 = vrot.slane %v1345_v30, 4  ;;  %v1368_v47 = vrot.slane %v1366_v26, 4  ;;  %v7724_v27 = vld [vmem:[%s6805_s6 + $0x34] sm:$0xf] }
  0xdd   : > { %v5336_v60 = vcombine.low %v1318_v8, %v1321_v21  ;;  %v7623_v8 = vsel %vm7235_vm7, %v5324_v37, %v1352_v45  ;;  %v1382_v21 = vrot.slane %v1380_v42, 4  ;;  %v7654_v45 = vsel %vm7235_vm7, %v5326_v24, %v1366_v26  ;;  %v6705_v26 = vld [vmem:[%s6805_s6 + $0x98] sm:$0x1]  ;;  %v5644_v10 = vld [vmem:[%s6805_s6 + $0x20] sm:$0x1] }
  0xde   : > { %v7559_v35 = vsel %vm7235_vm7, %v1326_v55, %v1327_v59  ;;  %v6701_v59 = vld [vmem:[%s6805_s6 + $0x74] sm:$0x1]  ;;  %v1390_v62 = vrot.slane %v6705_v26, 5  ;;  %v1265_v26 = vld [vmem:[%s6805_s6 + $0xb4] sm:$0xe] }
  0xdf   : > { %v5337_v63 = vcombine.low %v7555_v44, %v7559_v35  ;;  %v1369_v55 = vrot.slane %v6701_v59, 5  ;;  %v7678_v37 = vsel %vm7235_vm7, %v1382_v21, %v1383_v3  ;;  %v5648_v59 = vld [vmem:[%s6805_s6 + $0x30] sm:$0xf]  ;;  %v7760_v23 = vld [vmem:[%s6805_s6 + $0x40] sm:$0xf] }
  0xe0   : > { %6044 = vmatmul.mubr.msk.bf16.gmra.mrb[28].mxu1 %vm744_vm4, %v5300_v17  ;;  %v6700_v17 = vld [vmem:[%s6805_s6 + $0x68] sm:$0x1]  ;;  %v5345_v35 = vcombine.low %v7671_v48, %v7678_v37  ;;  %v3718_v21 = vshrl.u32 %v5648_v59, 16  ;;  %v3721_v11 = vshll.u32 %v5648_v59, 16  ;;  %v7938_v48 = vld [vmem:[%s6805_s6 + $0x74] sm:$0x1] }
  0xe1   : > { %6049 = vmatprep.mubr.msk.bf16.mxu1 %vm744_vm4, %v5334_v1  ;;  %v1362_v1 = vrot.slane %v6700_v17, 5  ;;  %v7658_v31 = vsel %vm7235_vm7, %v1368_v47, %v1369_v55  ;;  %v5645_v17 = vld [vmem:[%s6805_s6 + $0x24] sm:$0xf]  ;;  %v5646_v47 = vld [vmem:[%s6805_s6 + $0x28] sm:$0xf] }
  0xe2   : > { %v3694_v19 = vshrl.u32 %v5645_v17, 16  ;;  %v3703_v54 = vshll.u32 %v5646_v47, 16 }
  0xe3   : > { %6180 = vmatmul.mubr.msk.bf16.gmra.mrb[28].mxu0 %vm744_vm4, %v5560_v28  ;;  %v5323_v28 = vrot.slane %v1256_v12, 9  ;;  %v7630_v12 = vld [vmem:[%s8745_s1 + $0x10] sm:$0x3]  ;;  %v7647_v32 = vsel %vm7235_vm7, %v1361_v56, %v1362_v1 }
  0xe4   : > { %6185 = vmatprep.mubr.msk.bf16.mxu0 %vm744_vm4, %v6626_v33  ;;  %v1387_v33 = vrot.slane %v6704_v53, 5 }
  0xe5   : > { %v7617_v6 = vsel %vm7235_vm7, %v5323_v28, %v1345_v30  ;;  %v5642_v30 = vld [vmem:[%s6805_s6 + $0x18] sm:$0xf]  ;;  %v5643_v28 = vld [vmem:[%s6805_s6 + $0x1c] sm:$0xf] }
  0xe6   : > { %v1389_v43 = vrot.slane %v1387_v33, 4  ;;  %v3670_v39 = vshrl.u32 %v5642_v30, 16  ;;  %v3673_v9 = vshll.u32 %v5642_v30, 16  ;;  %v3679_v20 = vshll.u32 %v5643_v28, 16 }
  0xe7   : > { %v3683_v42 = vshrl.u32 %v5643_v28, 16  ;;  %v1401_v30 = vrot.slane %v7140_v50, 5  ;;  %v7748_v50 = vld [vmem:[%s6805_s6 + $0x2c] sm:$0x1] }
  0xe8   : > { %6050 = vmatmul.mubr.msk.bf16.vlgmr.msra.gmra.mrb[0].mxu1 %vm744_vm4, %v5335_v61  ;;  %v7635_v61 = vsel %vm7235_vm7, %v1347_v58, %v1348_v38  ;;  %v5330_v38 = vrot.slane %v1263_v2, 9  ;;  %v7699_v58 = vsel %vm7235_vm7, %v5329_v13, %v1387_v33  ;;  %v7717_v55 = vsel %vm7235_vm7, %v1389_v43, %v1390_v62  ;;  %v8783_v13 = vld [vmem:[#allocation4_spill] sm:$0xff]  ;;  %8784 = vst [vmem:[#allocation6_spill] sm:$0xff] %v7748_v50 }
  0xe9   : > { %6053 = vmatprep.mubr.msk.bf16.mxu1 %vm744_vm4, %v5336_v60  ;;  %6082 = vmatpush3.bf16.msra.mxu1 %v1871_v51  ;;  %v7639_v60 = vsel %vm7235_vm7, %v1354_v36, %v1355_v41  ;;  %v7681_v41 = vld [vmem:[%s6805_s6 + $0xa8] sm:$0xe]  ;;  %v5340_v15 = vcombine.low %v7617_v6, %v7635_v61  ;;  %v6706_v36 = vld [vmem:[%s6805_s6 + $0xa0] sm:$0xf]  ;;  %v3672_v29 = vrot.slane %v3670_v39, 4  ;;  %v7728_v6 = vrot.slane %v3679_v20, 5 }
  0xea   : > { %v5341_v4 = vcombine.low %v7623_v8, %v7639_v60  ;;  %v6630_v51 = vld [vmem:[%s6805_s6 + $0x48] sm:$0xff]   ;;  %v1394_v56 = vrot.slane %v6706_v36, 5  ;;  %v5331_v24 = vrot.slane %v7681_v41, 9  ;;  %v3707_v2 = vshrl.u32 %v5646_v47, 16  ;;  %v6631_v43 = vld [vmem:[%s6805_s6 + $0x54] sm:$0xff]   ;;  %v6632_v39 = vld [vmem:[%s6805_s6 + $0x60] sm:$0xff]  }
  0xeb   : > { %6186 = vmatmul.mubr.msk.bf16.vlgmr.msra.gmra.mrb[0].mxu0 %vm744_vm4, %v6627_v34  ;;  %v5342_v34 = vcombine.low %v7643_v40, %v7647_v32  ;;  %v5346_v3 = vcombine.low %v7699_v58, %v7717_v55  ;;  %v3727_v33 = vshll.u32 %v7724_v27, 16  ;;  %v3731_v61 = vshrl.u32 %v7724_v27, 16  ;;  %v5654_v41 = vld [vmem:[%s6805_s6 + $0x48] sm:$0xf]  ;;  %v7814_v8 = vld [vmem:[%s6805_s6 + $0x44] sm:$0x1] }
  0xec   : > { %6218 = vmatpush3.bf16.msra.mxu0 %v7572_v5  ;;  %6189 = vmatprep.mubr.msk.bf16.mxu0 %vm744_vm4, %v6628_v16  ;;  %v7667_v5 = vsel %vm7235_vm7, %v1375_v14, %v1376_v49  ;;  %v5343_v16 = vcombine.low %v7654_v45, %v7658_v31  ;;  %v7721_v52 = vsel %vm7235_vm7, %v5330_v38, %v1394_v56  ;;  %v3685_v14 = vrot.slane %v3683_v42, 4  ;;  %v7945_v55 = vld [vmem:[%s6805_s6 + $0x80] sm:$0x1] }
  0xed   : > { %6583 = vmatprep.subr.msk.bf16.mxu0 %vm793_vm0, %v7630_v12  ;;  %v5344_v44 = vcombine.low %v7662_v0, %v7667_v5  ;;  %v3697_v49 = vshll.u32 %v5645_v17, 16  ;;  %v1396_v53 = vrot.slane %v1394_v56, 4  ;;  %v1404_v28 = vrot.slane %v8783_v13, 5  ;;  %v7892_v5 = vld [vmem:[%s6805_s6 + $0x5c] sm:$0x1] }
  0xee   : > { %v1408_v62 = vrot.slane %v7177_v7, 5  ;;  %v3689_v38 = vshll.u32 %v5644_v10, 16  ;;  %v3696_v20 = vrot.slane %v3694_v19, 4  ;;  %v7750_v36 = vrot.slane %v3703_v54, 5  ;;  %v7764_v10 = vld [vmem:[%s6805_s6 + $0x38] sm:$0x1] }
  0xef   : > { %v3699_v42 = vrot.slane %v3697_v49, 5  ;;  %v3709_v7 = vrot.slane %v3707_v2, 4  ;;  %v3720_v56 = vrot.slane %v3718_v21, 4  ;;  %v3723_v17 = vrot.slane %v3721_v11, 5 }
  0xf0   : > { %6054 = vmatmul.mubr.msk.bf16.gmra.mrb[4].mxu1 %vm744_vm4, %v5337_v63  ;;  %v8782_v63 = vld [vmem:[#allocation3_spill] sm:$0xff]  ;;  %v5332_v47 = vrot.slane %v1265_v26, 9  ;;  %v7757_v59 = vrot.slane %v3727_v33, 5  ;;  %v1403_v46 = vrot.slane %v1401_v30, 4  ;;  %v3713_v54 = vshll.u32 %v7748_v50, 16 }
  0xf1   : > { %6057 = vmatprep.mubr.msk.bf16.mxu1 %vm744_vm4, %v5338_v22  ;;  %v1397_v1 = vrot.slane %v8782_v63, 5  ;;  %v3675_v22 = vrot.slane %v3673_v9, 5  ;;  %v3700_v21 = vor.u32 %v3699_v42, %v3696_v20  ;;  %v3710_v11 = vor.u32 %v3709_v7, %v7750_v36  ;;  %v6634_v7 = vld [vmem:[%s6805_s6 + $0x78] sm:$0xff]  }
  0xf2   : > { %v7774_v33 = vsel %vm7235_vm7, %v5331_v24, %v1401_v30  ;;  %v3737_v13 = vshll.u32 %v7764_v10, 16  ;;  %v3751_v26 = vshll.u32 %v7760_v23, 16  ;;  %v7788_v24 = vsel %vm7235_vm7, %v1403_v46, %v1404_v28 }
  0xf3   : > { %6190 = vmatmul.mubr.msk.bf16.gmra.mrb[4].mxu0 %vm744_vm4, %v6629_v18  ;;  %v3676_v9 = vor.u32 %v3675_v22, %v3672_v29  ;;  %v3686_v18 = vor.u32 %v3685_v14, %v7728_v6  ;;  %v7755_v63 = vsel %vm7235_vm7, %v1396_v53, %v1397_v1  ;;  %v3733_v29 = vrot.slane %v3731_v61, 4 }
  0xf4   : > { %6193 = vmatprep.mubr.msk.bf16.mxu0 %vm744_vm4, %v6630_v51  ;;  %v5651_v51 = vld [vmem:[%s6805_s6 + $0x3c] sm:$0xf]  ;;  %v3691_v1 = vrot.slane %v3689_v38, 5  ;;  %v3724_v53 = vor.u32 %v3723_v17, %v3720_v56  ;;  %v7781_v38 = vsel %vm7235_vm7, %v5332_v47, %v1408_v62  ;;  %v3715_v42 = vrot.slane %v3713_v54, 5 }
  0xf5   : > { %v3742_v14 = vshrl.u32 %v5651_v51, 16  ;;  %v3745_v19 = vshll.u32 %v5651_v51, 16  ;;  %v3677_v49 = vrot.slane %v3676_v9, 4  ;;  %v3687_v2 = vrot.slane %v3686_v18, 4  ;;  %v6633_v18 = vld [vmem:[%s6805_s6 + $0x6c] sm:$0xff]  }
  0xf6   : > { %v3734_v61 = vor.u32 %v3733_v29, %v7757_v59  ;;  %v3755_v9 = vshrl.u32 %v7760_v23, 16  ;;  %v7798_v51 = vld [vmem:[%s6805_s6 + $0x4c] sm:$0xf]  ;;  %v3701_v56 = vrot.slane %v3700_v21, 4  ;;  %v3711_v17 = vrot.slane %v3710_v11, 4 }
  0xf7   : > { %v3692_v28 = vsel %vm6823_vm3, %v3687_v2, %v3691_v1  ;;  %v3725_v47 = vrot.slane %v3724_v53, 4  ;;  %v3739_v29 = vrot.slane %v3737_v13, 5  ;;  %v7811_v46 = vrot.slane %v3751_v26, 5  ;;  %v7838_v2 = vld [vmem:[%s6805_s6 + $0x50] sm:$0x1] }
  0xf8   : > { %6058 = vmatmul.mubr.msk.bf16.gmra.mrb[8].mxu1 %vm744_vm4, %v5339_v25  ;;  %v8785_v25 = vld [vmem:[#allocation5_spill] sm:$0xff]  ;;  %v3716_v1 = vsel %vm6823_vm3, %v3711_v17, %v3715_v42  ;;  %v7835_v54 = vsel %vm793_vm0, %v7630_v12, 0  ;;  %v5657_v21 = vld [vmem:[%s6805_s6 + $0x54] sm:$0xf]  ;;  %v5660_v26 = vld [vmem:[%s6805_s6 + $0x60] sm:$0xf] }
  0xf9   : > { %6061 = vmatprep.mubr.msk.bf16.mxu1 %vm744_vm4, %v5340_v15  ;;  %v1411_v22 = vrot.slane %v8785_v25, 5  ;;  %v1410_v15 = vrot.slane %v1408_v62, 4  ;;  %v3682_v62 = vsel %vm6823_vm3, %v3677_v49, %v7728_v6  ;;  %v3735_v6 = vrot.slane %v3734_v61, 4  ;;  %v7850_v13 = vld [vmem:[%s6805_s6 + $0x58] sm:$0xf] }
  0xfa   : > { %v3766_v25 = vshrl.u32 %v5654_v41, 16  ;;  %v3706_v49 = vsel %vm6823_vm3, %v3701_v56, %v7750_v36  ;;  %v3730_v11 = vsel %vm6823_vm3, %v3725_v47, %v7757_v59  ;;  %v3761_v36 = vshll.u32 %v7814_v8, 16  ;;  %v6635_v59 = vld [vmem:[%s6805_s6 + $0x84] sm:$0xff]  }
  0xfb   : > { %6194 = vmatmul.mubr.msk.bf16.gmra.mrb[8].mxu0 %vm744_vm4, %v6631_v43  ;;  %v3744_v43 = vrot.slane %v3742_v14, 4  ;;  %v7792_v30 = vsel %vm7235_vm7, %v1410_v15, %v1411_v22  ;;  %v3769_v22 = vshll.u32 %v5654_v41, 16  ;;  %v3775_v14 = vshll.u32 %v7798_v51, 16  ;;  %v7859_v41 = vld [vmem:[%s6805_s6 + $0x64] sm:$0xf] }
  0xfc   : > { %6197 = vmatprep.mubr.msk.bf16.mxu0 %vm744_vm4, %v6632_v39  ;;  %v3747_v39 = vrot.slane %v3745_v19, 5  ;;  %v3779_v19 = vshrl.u32 %v7798_v51, 16  ;;  %v7826_v15 = vcombine.low %v3682_v62, %v3692_v28  ;;  %v3740_v53 = vsel %vm6823_vm3, %v3735_v6, %v3739_v29  ;;  %v6636_v28 = vld [vmem:[%s6805_s6 + $0x90] sm:$0xff]  }
  0xfd   : > { %v7847_v61 = vrot.slane %v3766_v25, 4  ;;  %v3785_v62 = vshll.u32 %v7838_v2, 16  ;;  %v3790_v42 = vshrl.u32 %v5657_v21, 16  ;;  %v3799_v56 = vshll.u32 %v7850_v13, 16 }
  0xfe   : > { %v3748_v60 = vor.u32 %v3747_v39, %v3744_v43  ;;  %v3771_v39 = vrot.slane %v3769_v22, 5  ;;  %v3803_v17 = vshrl.u32 %v7850_v13, 16  ;;  %v3814_v47 = vshrl.u32 %v5660_v26, 16  ;;  %v7896_v22 = vld [vmem:[%s6805_s6 + $0x70] sm:$0xf] }
  0xff   : > { %v3817_v6 = vshll.u32 %v5660_v26, 16  ;;  %v7876_v29 = vcombine.low %v3706_v49, %v3716_v1  ;;  %v7878_v45 = vrot.slane %v3761_v36, 5  ;;  %v3823_v31 = vshll.u32 %v7859_v41, 16  ;;  %v7908_v26 = vld [vmem:[%s6805_s6 + $0x7c] sm:$0xf] }
 0x100   : > { %6062 = vmatmul.mubr.msk.bf16.gmra.mrb[12].mxu1 %vm744_vm4, %v5341_v4  ;;  %v3757_v4 = vrot.slane %v3755_v9, 4  ;;  %v7853_v12 = vrot.slane %v3748_v60, 4  ;;  %v7856_v9 = vrot.slane %v3775_v14, 5  ;;  %v7882_v25 = vcombine.low %v3730_v11, %v3740_v53 }
 0x101   : > { %6065 = vmatprep.mubr.msk.bf16.mxu1 %vm744_vm4, %v5342_v34  ;;  %v3772_v0 = vor.u32 %v3771_v39, %v7847_v61  ;;  %v3792_v49 = vrot.slane %v3790_v42, 4  ;;  %v7905_v11 = vrot.slane %v3799_v56, 5  ;;  %v3805_v53 = vrot.slane %v3803_v17, 4  ;;  %v6637_v17 = vld [vmem:[%s6805_s6 + $0x9c] sm:$0xff]  }
 0x102   : > { %v3758_v43 = vor.u32 %v3757_v4, %v7811_v46  ;;  %8787 = vst [vmem:[#allocation3_spill] sm:$0xff] %v7882_v25  ;;  %v3816_v36 = vrot.slane %v3814_v47, 4  ;;  %v3819_v61 = vrot.slane %v3817_v6, 5  ;;  %v7913_v39 = vrot.slane %v3823_v31, 5 }
 0x103   : > { %6198 = vmatmul.mubr.msk.bf16.gmra.mrb[12].mxu0 %vm744_vm4, %v6633_v18  ;;  %v7862_v18 = vrot.slane %v3779_v19, 4  ;;  %v7901_v19 = vrot.slane %v3785_v62, 5  ;;  %v3847_v42 = vshll.u32 %v7896_v22, 16  ;;  %v3809_v6 = vshll.u32 %v7892_v5, 16 }
 0x104   : > { %6201 = vmatprep.mubr.msk.bf16.mxu0 %vm744_vm4, %v6634_v7  ;;  %v3793_v7 = vshll.u32 %v5657_v21, 16  ;;  %v7888_v4 = vrot.slane %v3758_v43, 4  ;;  %v5666_v21 = vld [vmem:[%s6805_s6 + $0x78] sm:$0xf]  ;;  %v7911_v43 = vld [vmem:[%s6805_s6 + $0x68] sm:$0x1]  ;;  %v3806_v34 = vor.u32 %v3805_v53, %v7905_v11  ;;  %v3820_v60 = vor.u32 %v3819_v61, %v3816_v36 }
 0x105   : > { %v3782_v14 = vor.u32 %v7862_v18, %v7856_v9  ;;  %v3865_v56 = vshll.u32 %v5666_v21, 16  ;;  %v3871_v31 = vshll.u32 %v7908_v26, 16  ;;  %v3833_v47 = vshll.u32 %v7911_v43, 16  ;;  %v5669_v36 = vld [vmem:[%s6805_s6 + $0x84] sm:$0xf] }
 0x106   : > { %v3795_v1 = vrot.slane %v3793_v7, 5  ;;  %v3851_v7 = vshrl.u32 %v7896_v22, 16  ;;  %v3773_v32 = vrot.slane %v3772_v0, 4  ;;  %v7940_v50 = vrot.slane %v3847_v42, 5 }
 0x107   : > { %v3867_v53 = vrot.slane %v3865_v56, 5  ;;  %v3783_v61 = vrot.slane %v3782_v14, 4  ;;  %v3811_v58 = vrot.slane %v3809_v6, 5  ;;  %v3835_v42 = vrot.slane %v3833_v47, 5 }
 0x108   : > { %6066 = vmatmul.mubr.msk.bf16.gmra.mrb[16].mxu1 %vm744_vm4, %v5343_v16  ;;  %v3827_v16 = vshrl.u32 %v7859_v41, 16  ;;  %v3857_v56 = vshll.u32 %v7938_v48, 16  ;;  %v3886_v14 = vshrl.u32 %v5669_v36, 16 }
 0x109   : > { %6069 = vmatprep.mubr.msk.bf16.mxu1 %vm744_vm4, %v5344_v44  ;;  %v5663_v44 = vld [vmem:[%s6805_s6 + $0x6c] sm:$0xf] }
 0x10a   : > { %v3838_v18 = vshrl.u32 %v5663_v44, 16  ;;  %v3841_v62 = vshll.u32 %v5663_v44, 16  ;;  %v6638_v44 = vld [vmem:[%s6805_s6 + $0xa8] sm:$0xff]  }
 0x10b   : > { %6202 = vmatmul.mubr.msk.bf16.gmra.mrb[16].mxu0 %vm744_vm4, %v6635_v59  ;;  %v3829_v59 = vrot.slane %v3827_v16, 4  ;;  %v3875_v16 = vshrl.u32 %v7908_v26, 16 }
 0x10c   : > { %6205 = vmatprep.mubr.msk.bf16.mxu0 %vm744_vm4, %v6636_v28  ;;  %v3862_v28 = vshrl.u32 %v5666_v21, 16  ;;  %v3796_v21 = vor.u32 %v3795_v1, %v3792_v49  ;;  %v3840_v37 = vrot.slane %v3838_v18, 4  ;;  %v3853_v49 = vrot.slane %v3851_v7, 4  ;;  %v7951_v7 = vld [vmem:[%s6805_s6 + $0x88] sm:$0xf] }
 0x10d   : > { %v3830_v40 = vor.u32 %v3829_v59, %v7913_v39  ;;  %v3877_v0 = vrot.slane %v3875_v16, 4  ;;  %v3807_v18 = vrot.slane %v3806_v34, 4  ;;  %v3881_v16 = vshll.u32 %v7945_v55, 16 }
 0x10e   : > { %v3864_v1 = vrot.slane %v3862_v28, 4  ;;  %v3797_v59 = vrot.slane %v3796_v21, 4  ;;  %v3778_v34 = vsel %vm6823_vm3, %v3773_v32, %v7856_v9  ;;  %v3895_v47 = vshll.u32 %v7951_v7, 16 }
 0x10f   : > { %v3831_v6 = vrot.slane %v3830_v40, 4  ;;  %v3899_v21 = vshrl.u32 %v7951_v7, 16  ;;  %v8788_v40 = vcombine.low %v7721_v52, %v7755_v63  ;;  %v3812_v9 = vsel %vm6823_vm3, %v3807_v18, %v3811_v58  ;;  %v7980_v52 = vld [vmem:[%s6805_s6 + $0x8c] sm:$0x1] }
 0x110   : > { %6070 = vmatmul.mubr.msk.bf16.gmra.mrb[20].mxu1 %vm744_vm4, %v5345_v35  ;;  %v3843_v35 = vrot.slane %v3841_v62, 5  ;;  %v3821_v62 = vrot.slane %v3820_v60, 4  ;;  %v3868_v25 = vor.u32 %v3867_v53, %v3864_v1  ;;  %v3802_v32 = vsel %vm6823_vm3, %v3797_v59, %v7905_v11 }
 0x111   : > { %6073 = vmatprep.mubr.msk.bf16.mxu1 %vm744_vm4, %v5346_v3  ;;  %v7947_v3 = vrot.slane %v3871_v31, 5  ;;  %v3854_v31 = vor.u32 %v3853_v49, %v7940_v50  ;;  %v8789_v63 = vcombine.low %v7774_v33, %v7788_v24  ;;  %v3888_v53 = vrot.slane %v3886_v14, 4  ;;  %v8000_v33 = vld [vmem:[%s6805_s6 + $0x94] sm:$0xf] }
 0x112   : > { %v3844_v28 = vor.u32 %v3843_v35, %v3840_v37  ;;  %v6640_v37 = vld [vmem:[%s6805_s6 + $0xc0] sm:$0xff]   ;;  %v3788_v35 = vsel %vm6823_vm3, %v3783_v61, %v7901_v19  ;;  %v3826_v49 = vsel %vm6823_vm3, %v3821_v62, %v7913_v39  ;;  %v7988_v19 = vrot.slane %v3857_v56, 5 }
 0x113   : > { %6206 = vmatmul.mubr.msk.bf16.gmra.mrb[20].mxu0 %vm744_vm4, %v6637_v17  ;;  %v3889_v17 = vshll.u32 %v5669_v36, 16  ;;  %v3878_v60 = vor.u32 %v3877_v0, %v7947_v3  ;;  %v5672_v36 = vld [vmem:[%s6805_s6 + $0x90] sm:$0xf]  ;;  %v3836_v61 = vsel %vm6823_vm3, %v3831_v6, %v3835_v42  ;;  %v7993_v39 = vrot.slane %v3854_v31, 4 }
 0x114   : > { %6209 = vmatprep.mubr.msk.bf16.mxu0 %vm744_vm4, %v6638_v44  ;;  %v6639_v44 = vld [vmem:[%s6805_s6 + $0xb4] sm:$0xff]   ;;  %v7986_v1 = vrot.slane %v3844_v28, 4  ;;  %v7995_v58 = vrot.slane %v3868_v25, 4  ;;  %v7997_v0 = vrot.slane %v3881_v16, 5  ;;  %v8005_v59 = vrot.slane %v3895_v47, 5  ;;  %v6642_v31 = vld [vmem:[%s6805_s6 + $0xc] sm:$0xff]  }
 0x115   : > { %v3891_v11 = vrot.slane %v3889_v17, 5  ;;  %v8003_v24 = vrot.slane %v3878_v60, 4  ;;  %v8007_v18 = vrot.slane %v3899_v21, 4  ;;  %v3905_v62 = vshll.u32 %v7980_v52, 16  ;;  %v5725_v6 = vld [vmem:[%s6805_s6 + $0x30] sm:$0xe] }
 0x116   : > { %v8790_v25 = vsel %vm6823_vm3, %v7888_v4, %v7878_v45  ;;  %v8791_v42 = vsel %vm6823_vm3, %v7853_v12, %v7811_v46  ;;  %v8023_v56 = vcombine.low %v3778_v34, %v3788_v35  ;;  %v3910_v14 = vshrl.u32 %v5672_v36, 16  ;;  %v5726_v47 = vld [vmem:[%s6805_s6 + $0x3c] sm:$0xe]  ;;  %v6641_v21 = vld [vmem:[%s6805_s6 + $0xcc] sm:$0xff]   ;;  %v8251_v12 = vld [vmem:[%s6805_s6 + $0xc4] sm:$0xf] }
 0x117   : > { %v8021_v28 = vcombine.low %v8791_v42, %v8790_v25  ;;  %v3913_v17 = vshll.u32 %v5672_v36, 16  ;;  %v8027_v16 = vcombine.low %v3802_v32, %v3812_v9  ;;  %v3892_v60 = vor.u32 %v3891_v11, %v3888_v53  ;;  %v5727_v36 = vld [vmem:[%s6805_s6 + $0x48] sm:$0xe] }
 0x118   : > { %6074 = vmatmul.mubr.msk.bf16.gmra.mrb[24].mxu1 %vm744_vm4, %v8788_v40  ;;  %v3919_v45 = vshll.u32 %v8000_v33, 16  ;;  %v3923_v34 = vshrl.u32 %v8000_v33, 16  ;;  %v8053_v35 = vrot.slane %v3905_v62, 5  ;;  %v5741_v32 = vrot.slane %v5725_v6, 9  ;;  %v5737_v40 = vld [vmem:[%s6805_s6 + $0xc0] sm:$0xe] }
 0x119   : > { %6077 = vmatprep.mubr.msk.bf16.mxu1 %vm744_vm4, %v8789_v63  ;;  %v8792_v9 = vcombine.low %v7781_v38, %v7792_v30  ;;  %v8061_v63 = vrot.slane %v3913_v17, 5  ;;  %v4427_v53 = vrot.slane %v7724_v27, 5  ;;  %v4430_v11 = vrot.slane %v7764_v10, 5  ;;  %v5728_v30 = vld [vmem:[%s6805_s6 + $0x54] sm:$0xe] }
 0x11a   : > { %v8069_v62 = vrot.slane %v3919_v45, 5  ;;  %v5742_v25 = vrot.slane %v5726_v47, 9  ;;  %v4434_v38 = vrot.slane %v7760_v23, 5  ;;  %v8073_v42 = vrot.slane %v3923_v34, 4 }
 0x11b   : > { %6210 = vmatmul.mubr.msk.bf16.gmra.mrb[24].mxu0 %vm744_vm4, %v6639_v44  ;;  %v8029_v44 = vcombine.low %v3826_v49, %v3836_v61  ;;  %v8059_v49 = vrot.slane %v3910_v14, 4  ;;  %v8067_v61 = vrot.slane %v3892_v60, 4  ;;  %v8077_v27 = vsel %vm7235_vm7, %v5741_v32, %v4427_v53  ;;  %v6643_v60 = vld [vmem:[%s6805_s6 + $0x18] sm:$0xff]   ;;  %v6644_v32 = vld [vmem:[%s6805_s6 + $0x24] sm:$0xff]  }
 0x11c   : > { %6213 = vmatprep.mubr.msk.bf16.mxu0 %vm744_vm4, %v6640_v37  ;;  %v4429_v10 = vrot.slane %v4427_v53, 4  ;;  %v4437_v14 = vrot.slane %v7814_v8, 5  ;;  %v8083_v17 = vsel %vm7235_vm7, %v5742_v25, %v4434_v38  ;;  %v4436_v23 = vrot.slane %v4434_v38, 4  ;;  %v8254_v37 = vld [vmem:[%s6805_s6 + $0xc8] sm:$0x1] }
 0x11d   : > { %v5743_v6 = vrot.slane %v5727_v36, 9  ;;  %v4444_v8 = vrot.slane %v7838_v2, 5  ;;  %v5744_v34 = vrot.slane %v5728_v30, 9  ;;  %v4448_v47 = vrot.slane %v7850_v13, 5  ;;  %v5730_v2 = vld [vmem:[%s6805_s6 + $0x6c] sm:$0xe] }
 0x11e   : > { %v8091_v45 = vsel %vm7235_vm7, %v4429_v10, %v4430_v11  ;;  %v4451_v25 = vrot.slane %v7892_v5, 5  ;;  %v4455_v10 = vrot.slane %v7859_v41, 5  ;;  %v5746_v5 = vrot.slane %v5730_v2, 9  ;;  %v8190_v41 = vld [vmem:[%s6805_s6 + $0xa4] sm:$0x1] }
 0x11f   : > { %v8112_v11 = vsel %vm7235_vm7, %v5744_v34, %v4448_v47  ;;  %v4450_v36 = vrot.slane %v4448_v47, 4  ;;  %v4462_v34 = vrot.slane %v7896_v22, 5  ;;  %v4465_v47 = vrot.slane %v7938_v48, 5 }
 0x120   : > { %6078 = vmatmul.mubr.msk.bf16.gmra.mrb[28].mxu1 %vm744_vm4, %v8792_v9  ;;  %v4472_v48 = vrot.slane %v7945_v55, 5 }
 0x121   : > { %6083 = vmatprep.mubr.msk.bf16.mxu1 %vm744_vm4, %v6642_v31  ;;  %v4441_v31 = vrot.slane %v7798_v51, 5  ;;  %v8101_v51 = vsel %vm7235_vm7, %v4436_v23, %v4437_v14  ;;  %v4458_v14 = vrot.slane %v7911_v43, 5  ;;  %v5731_v23 = vld [vmem:[%s6805_s6 + $0x78] sm:$0xe]  ;;  %v4464_v22 = vrot.slane %v4462_v34, 4 }
 0x123   : > { %6214 = vmatmul.mubr.msk.bf16.gmra.mrb[28].mxu0 %vm744_vm4, %v6641_v21  ;;  %v5729_v21 = vld [vmem:[%s6805_s6 + $0x60] sm:$0xe]  ;;  %v4443_v53 = vrot.slane %v4441_v31, 4 }
 0x124   : > { %6219 = vmatprep.mubr.msk.bf16.mxu0 %vm744_vm4, %v7826_v15  ;;  %v8105_v15 = vsel %vm7235_vm7, %v5743_v6, %v4441_v31  ;;  %v5745_v30 = vrot.slane %v5729_v21, 9  ;;  %v8127_v31 = vsel %vm7235_vm7, %v4450_v36, %v4451_v25  ;;  %v8141_v21 = vsel %vm7235_vm7, %v5746_v5, %v4462_v34  ;;  %v8170_v5 = vld [vmem:[%s6805_s6 + $0x98] sm:$0x1]  ;;  %v8173_v34 = vld [vmem:[%s6805_s6 + $0xa0] sm:$0xf] }
 0x125   : > { %v8117_v38 = vsel %vm7235_vm7, %v4443_v53, %v4444_v8  ;;  %v5732_v8 = vld [vmem:[%s6805_s6 + $0x84] sm:$0xe]  ;;  %v5747_v53 = vrot.slane %v5731_v23, 9  ;;  %v4476_v25 = vrot.slane %v7951_v7, 5  ;;  %v6646_v23 = vld [vmem:[%s6805_s6 + $0x3c] sm:$0xff]   ;;  %v8812_v57 = vcombine.low %v8112_v11, %v8127_v31 }
 0x126   : > { %v8136_v43 = vsel %vm7235_vm7, %v5745_v30, %v4455_v10  ;;  %v5748_v36 = vrot.slane %v5732_v8, 9  ;;  %v5733_v30 = vld [vmem:[%s6805_s6 + $0x90] sm:$0xe]  ;;  %v5735_v8 = vld [vmem:[%s6805_s6 + $0xa8] sm:$0xe] }
 0x127   : > { %v5751_v6 = vrot.slane %v5735_v8, 9  ;;  %v5675_v8 = vld [vmem:[%s6805_s6 + $0x9c] sm:$0xf]  ;;  %v4904_v11 = vld [vmem:[%s8747_s3] sm:$0x3] }
 0x128   : > { %6084 = vmatmul.mubr.msk.bf16.vlgmr.msra.gmra.mrb[0].mxu1 %vm744_vm4, %v6643_v60  ;;  %v4457_v60 = vrot.slane %v4455_v10, 4  ;;  %v8793_v10 = vld [vmem:[#allocation3_spill] sm:$0xff]  ;;  %6584 = vmatprep.subr.msk.bf16.mxu1 %vm793_vm0, %v4904_v11 }
 0x129   : > { %6087 = vmatprep.mubr.msk.bf16.mxu1 %vm744_vm4, %v6644_v32  ;;  %v4469_v32 = vrot.slane %v7908_v26, 5  ;;  %v6645_v26 = vld [vmem:[%s6805_s6 + $0x30] sm:$0xff]  }
 0x12a   : > { %v8148_v2 = vsel %vm7235_vm7, %v4457_v60, %v4458_v14  ;;  %v8162_v14 = vsel %vm7235_vm7, %v4464_v22, %v4465_v47  ;;  %v8179_v60 = vsel %vm7235_vm7, %v5748_v36, %v4476_v25  ;;  %v4478_v47 = vrot.slane %v4476_v25, 4 }
 0x12b   : > { %6220 = vmatmul.mubr.msk.bf16.vlgmr.msra.gmra.mrb[0].mxu0 %vm744_vm4, %v7876_v29  ;;  %v8166_v55 = vsel %vm7235_vm7, %v5747_v53, %v4469_v32  ;;  %v4471_v7 = vrot.slane %v4469_v32, 4  ;;  %8795 = vst [vmem:[#allocation5_spill] sm:$0xff] %v8179_v60  ;;  %v4479_v22 = vrot.slane %v7980_v52, 5  ;;  %v5749_v32 = vrot.slane %v5733_v30, 9  ;;  %v8205_v30 = vld [vmem:[%s6805_s6 + $0xb8] sm:$0xf] }
 0x12c   : > { %6252 = vmatpush3.bf16.msra.mxu0 %v7835_v54  ;;  %6223 = vmatprep.mubr.msk.bf16.mxu0 %vm744_vm4, %v8793_v10  ;;  %8794 = vst [vmem:[#allocation4_spill] sm:$0xff] %v8166_v55  ;;  %v5734_v54 = vld [vmem:[%s6805_s6 + $0x9c] sm:$0xe]  ;;  %v4483_v10 = vrot.slane %v8000_v33, 5  ;;  %v4486_v29 = vrot.slane %v8170_v5, 5  ;;  %v4504_v4 = vrot.slane %v8205_v30, 5 }
 0x12d   : > { %v8184_v53 = vsel %vm7235_vm7, %v4471_v7, %v4472_v48  ;;  %v8196_v25 = vsel %vm7235_vm7, %v4478_v47, %v4479_v22  ;;  %v5750_v52 = vrot.slane %v5734_v54, 9  ;;  %v4490_v48 = vrot.slane %v8173_v34, 5  ;;  %v5736_v7 = vld [vmem:[%s6805_s6 + $0xb4] sm:$0xe]  ;;  %v8202_v33 = vld [vmem:[%s6805_s6 + $0xac] sm:$0xf] }
 0x12e   : > { %8796 = vst [vmem:[#allocation2_spill] sm:$0xff] %v8184_v53  ;;  %8797 = vst [vmem:[#allocation3_spill] sm:$0xff] %v8196_v25  ;;  %v8211_v36 = vsel %vm7235_vm7, %v5749_v32, %v4483_v10  ;;  %v4485_v54 = vrot.slane %v4483_v10, 4  ;;  %v4493_v47 = vrot.slane %v8190_v41, 5  ;;  %v4497_v9 = vrot.slane %v8202_v33, 5 }
 0x12f   : > { %8798 = vst [vmem:[#allocation7_spill] sm:$0xff] %v8211_v36  ;;  %v8220_v22 = vsel %vm7235_vm7, %v5750_v52, %v4490_v48  ;;  %v4492_v13 = vrot.slane %v4490_v48, 4  ;;  %v6647_v52 = vld [vmem:[%s6805_s6 + $0x48] sm:$0xff]   ;;  %v8235_v48 = vld [vmem:[%s6805_s6 + $0xbc] sm:$0x1]  ;;  %v5753_v36 = vrot.slane %v5737_v40, 9 }
 0x130   : > { %6088 = vmatmul.mubr.msk.bf16.gmra.mrb[4].mxu1 %vm744_vm4, %v6645_v26  ;;  %v8216_v26 = vld [vmem:[%s6805_s6 + $0xb0] sm:$0x1]  ;;  %8799 = vst [vmem:[#allocation8_spill] sm:$0xff] %v8220_v22  ;;  %v8225_v32 = vsel %vm7235_vm7, %v4485_v54, %v4486_v29  ;;  %v4499_v46 = vrot.slane %v4497_v9, 4  ;;  %v4511_v25 = vrot.slane %v8251_v12, 5  ;;  %v4514_v60 = vrot.slane %v8254_v37, 5 }
 0x131   : > { %6091 = vmatprep.mubr.msk.bf16.mxu1 %vm744_vm4, %v6646_v23  ;;  %8800 = vst [vmem:[#allocation9_spill] sm:$0xff] %v8225_v32  ;;  %v4500_v10 = vrot.slane %v8216_v26, 5  ;;  %v5752_v23 = vrot.slane %v5736_v7, 9  ;;  %v8241_v54 = vsel %vm7235_vm7, %v4492_v13, %v4493_v47  ;;  %v8245_v7 = vsel %vm7235_vm7, %v5751_v6, %v4497_v9  ;;  %v6648_v9 = vld [vmem:[%s6805_s6 + $0x54] sm:$0xff]   ;;  %v8265_v32 = vld [vmem:[%s6805_s6 + $0xd0] sm:$0xf] }
 0x132   : > { %8801 = vst [vmem:[#allocation10_spill] sm:$0xff] %v8241_v54  ;;  %v4506_v6 = vrot.slane %v4504_v4, 4  ;;  %v4507_v47 = vrot.slane %v8235_v48, 5  ;;  %v8274_v29 = vld [vmem:[%s6805_s6 + $0xd4] sm:$0x1]  ;;  %v4518_v22 = vrot.slane %v8265_v32, 5  ;;  %v8288_v40 = vsel %vm7235_vm7, %v5753_v36, %v4511_v25 }
 0x133   : > { %6224 = vmatmul.mubr.msk.bf16.gmra.mrb[4].mxu0 %vm744_vm4, %v8021_v28  ;;  %v5738_v28 = vld [vmem:[%s6805_s6 + $0xcc] sm:$0xe]  ;;  %v8260_v13 = vsel %vm7235_vm7, %v5752_v23, %v4504_v4  ;;  %v5678_v53 = vld [vmem:[%s6805_s6 + $0xa8] sm:$0xf]  ;;  %v4521_v55 = vrot.slane %v8274_v29, 5  ;;  %v3934_v23 = vshrl.u32 %v5675_v8, 16 }
 0x134   : > { %6227 = vmatprep.mubr.msk.bf16.mxu0 %vm744_vm4, %v8023_v56  ;;  %v8269_v56 = vsel %vm7235_vm7, %v4499_v46, %v4500_v10  ;;  %v8280_v4 = vsel %vm7235_vm7, %v4506_v6, %v4507_v47  ;;  %v5754_v54 = vrot.slane %v5738_v28, 9  ;;  %v4513_v10 = vrot.slane %v4511_v25, 4  ;;  %v8818_v31 = vld [vmem:[#allocation5_spill] sm:$0xff] }
 0x135   : > { %8802 = vst [vmem:[#allocation11_spill] sm:$0xff] %v8269_v56  ;;  %v3937_v56 = vshll.u32 %v5675_v8, 16  ;;  %v4520_v6 = vrot.slane %v4518_v22, 4  ;;  %v8803_v47 = vor.u32 %v8007_v18, %v8005_v59  ;;  %v3943_v25 = vshll.u32 %v8173_v34, 16 }
 0x136   : > { %v8294_v28 = vsel %vm7235_vm7, %v5754_v54, %v4518_v22  ;;  %v3947_v46 = vshrl.u32 %v8173_v34, 16  ;;  %v3958_v8 = vshrl.u32 %v5678_v53, 16  ;;  %v3961_v54 = vshll.u32 %v5678_v53, 16 }
 0x137   : > { %v3903_v36 = vrot.slane %v8803_v47, 4  ;;  %v3916_v18 = vor.u32 %v8061_v63, %v8059_v49  ;;  %v3967_v34 = vshll.u32 %v8202_v33, 16  ;;  %v3939_v47 = vrot.slane %v3937_v56, 5 }
 0x138   : > { %6092 = vmatmul.mubr.msk.bf16.gmra.mrb[8].mxu1 %vm744_vm4, %v6647_v52  ;;  %v8304_v52 = vsel %vm7235_vm7, %v4513_v10, %v4514_v60  ;;  %v3971_v60 = vshrl.u32 %v8202_v33, 16  ;;  %v6649_v10 = vld [vmem:[%s6805_s6 + $0x60] sm:$0xff]   ;;  %v8804_v49 = vsel %vm6823_vm3, %v7993_v39, %v7988_v19  ;;  %v8805_v63 = vsel %vm6823_vm3, %v7986_v1, %v7940_v50  ;;  %v6650_v33 = vld [vmem:[%s6805_s6 + $0x6c] sm:$0xff]  }
 0x139   : > { %6095 = vmatprep.mubr.msk.bf16.mxu1 %vm744_vm4, %v6648_v9  ;;  %v5770_v22 = vcombine.low %v8288_v40, %v8304_v52  ;;  %v8310_v9 = vsel %vm7235_vm7, %v4520_v6, %v4521_v55  ;;  %v3926_v55 = vor.u32 %v8073_v42, %v8069_v62  ;;  %v3936_v6 = vrot.slane %v3934_v23, 4 }
 0x13a   : > { %v5771_v53 = vcombine.low %v8294_v28, %v8310_v9  ;;  %v3898_v42 = vsel %vm6823_vm3, %v8067_v61, %v8005_v59  ;;  %v8344_v56 = vrot.slane %v3943_v25, 5  ;;  %v3949_v23 = vrot.slane %v3947_v46, 4 }
 0x13b   : > { %6228 = vmatmul.mubr.msk.bf16.gmra.mrb[8].mxu0 %vm744_vm4, %v8027_v16  ;;  %v3929_v16 = vshll.u32 %v8170_v5, 16  ;;  %v3908_v5 = vsel %vm6823_vm3, %v3903_v36, %v8053_v35  ;;  %v3960_v19 = vrot.slane %v3958_v8, 4  ;;  %v3963_v39 = vrot.slane %v3961_v54, 5  ;;  %v5681_v36 = vld [vmem:[%s6805_s6 + $0xb4] sm:$0xf] }
 0x13c   : > { %6231 = vmatprep.mubr.msk.bf16.mxu0 %vm744_vm4, %v8029_v44  ;;  %v5698_v44 = vcombine.low %v8805_v63, %v8804_v49  ;;  %v8806_v50 = vsel %vm6823_vm3, %v8003_v24, %v7997_v0  ;;  %v8807_v1 = vsel %vm6823_vm3, %v7995_v58, %v7947_v3  ;;  %v3917_v61 = vrot.slane %v3916_v18, 4 }
 0x13d   : > { %v5699_v59 = vcombine.low %v8807_v1, %v8806_v50  ;;  %v8356_v49 = vrot.slane %v3967_v34, 5  ;;  %v3973_v35 = vrot.slane %v3971_v60, 4  ;;  %v3927_v46 = vrot.slane %v3926_v55, 4  ;;  %v5684_v34 = vld [vmem:[%s6805_s6 + $0xc0] sm:$0xf] }
 0x13e   : > { %v3931_v25 = vrot.slane %v3929_v16, 5  ;;  %v3940_v8 = vor.u32 %v3939_v47, %v3936_v6  ;;  %v3953_v0 = vshll.u32 %v8190_v41, 16  ;;  %v5700_v24 = vcombine.low %v3898_v42, %v3908_v5  ;;  %v6651_v16 = vld [vmem:[%s6805_s6 + $0x78] sm:$0xff]  }
 0x13f   : > { %v3950_v3 = vor.u32 %v3949_v23, %v8344_v56  ;;  %v3964_v58 = vor.u32 %v3963_v39, %v3960_v19  ;;  %v3977_v54 = vshll.u32 %v8216_v26, 16  ;;  %v3982_v18 = vshrl.u32 %v5681_v36, 16 }
 0x140   : > { %6096 = vmatmul.mubr.msk.bf16.gmra.mrb[12].mxu1 %vm744_vm4, %v6649_v10  ;;  %v3974_v60 = vor.u32 %v3973_v35, %v8356_v49  ;;  %v3985_v10 = vshll.u32 %v5681_v36, 16  ;;  %v3991_v55 = vshll.u32 %v8205_v30, 16  ;;  %v3995_v41 = vshrl.u32 %v8205_v30, 16 }
 0x141   : > { %6099 = vmatprep.mubr.msk.bf16.mxu1 %vm744_vm4, %v6650_v33  ;;  %v3922_v6 = vsel %vm6823_vm3, %v3917_v61, %v8069_v62  ;;  %v3932_v26 = vsel %vm6823_vm3, %v3927_v46, %v3931_v25  ;;  %v3941_v47 = vrot.slane %v3940_v8, 4  ;;  %v3955_v63 = vrot.slane %v3953_v0, 5 }
 0x142   : > { %v4006_v33 = vshrl.u32 %v5684_v34, 16  ;;  %v4009_v42 = vshll.u32 %v5684_v34, 16  ;;  %v4015_v5 = vshll.u32 %v8251_v12, 16  ;;  %v4019_v23 = vshrl.u32 %v8251_v12, 16  ;;  %v5687_v12 = vld [vmem:[%s6805_s6 + $0xcc] sm:$0xf] }
 0x143   : > { %6232 = vmatmul.mubr.msk.bf16.gmra.mrb[12].mxu0 %vm744_vm4, %v5698_v44  ;;  %v6652_v44 = vld [vmem:[%s6805_s6 + $0x84] sm:$0xff]   ;;  %v3951_v30 = vrot.slane %v3950_v3, 4  ;;  %v3965_v19 = vrot.slane %v3964_v58, 4  ;;  %v3979_v39 = vrot.slane %v3977_v54, 5  ;;  %v3984_v50 = vrot.slane %v3982_v18, 4 }
 0x144   : > { %6235 = vmatprep.mubr.msk.bf16.mxu0 %vm744_vm4, %v5699_v59  ;;  %v3975_v1 = vrot.slane %v3974_v60, 4  ;;  %v3987_v59 = vrot.slane %v3985_v10, 5  ;;  %v3993_v62 = vrot.slane %v3991_v55, 5  ;;  %v3997_v61 = vrot.slane %v3995_v41, 4  ;;  %v6653_v10 = vld [vmem:[%s6805_s6 + $0x90] sm:$0xff]  }
 0x145   : > { %v5701_v35 = vcombine.low %v3922_v6, %v3932_v26  ;;  %v4008_v36 = vrot.slane %v4006_v33, 4  ;;  %v4011_v46 = vrot.slane %v4009_v42, 5  ;;  %v4017_v25 = vrot.slane %v4015_v5, 5 }
 0x146   : > { %v4021_v8 = vrot.slane %v4019_v23, 4  ;;  %v3946_v0 = vsel %vm6823_vm3, %v3941_v47, %v8344_v56  ;;  %v3956_v3 = vsel %vm6823_vm3, %v3951_v30, %v3955_v63  ;;  %v4001_v58 = vshll.u32 %v8235_v48, 16 }
 0x147   : > { %v3970_v54 = vsel %vm6823_vm3, %v3965_v19, %v8356_v49  ;;  %v3980_v18 = vsel %vm6823_vm3, %v3975_v1, %v3979_v39  ;;  %v3988_v34 = vor.u32 %v3987_v59, %v3984_v50  ;;  %v3998_v60 = vor.u32 %v3997_v61, %v3993_v62  ;;  %v6655_v50 = vld [vmem:[%s6805_s6 + $0xa8] sm:$0xff]  }
 0x148   : > { %6100 = vmatmul.mubr.msk.bf16.gmra.mrb[16].mxu1 %vm744_vm4, %v6651_v16  ;;  %v4030_v56 = vshrl.u32 %v5687_v12, 16  ;;  %v4033_v55 = vshll.u32 %v5687_v12, 16  ;;  %v4039_v41 = vshll.u32 %v8265_v32, 16  ;;  %v4043_v48 = vshrl.u32 %v8265_v32, 16  ;;  %v6654_v16 = vld [vmem:[%s6805_s6 + $0x9c] sm:$0xff]  }
 0x149   : > { %6103 = vmatprep.mubr.msk.bf16.mxu1 %vm744_vm4, %v6652_v44  ;;  %v4022_v6 = vor.u32 %v4021_v8, %v4017_v25  ;;  %v4025_v26 = vshll.u32 %v8254_v37, 16  ;;  %v5702_v49 = vcombine.low %v3946_v0, %v3956_v3  ;;  %v5703_v47 = vcombine.low %v3970_v54, %v3980_v18  ;;  %v6707_v12 = vld [vmem:[%s6805_s6 + $0x1c] sm:$0xf]  ;;  %v5723_v0 = vld [vmem:[%s6805_s6 + $0x18] sm:$0xe] }
 0x14a   : > { %v3989_v63 = vrot.slane %v3988_v34, 4  ;;  %v3999_v44 = vrot.slane %v3998_v60, 4  ;;  %v4003_v33 = vrot.slane %v4001_v58, 5  ;;  %v4032_v42 = vrot.slane %v4030_v56, 4  ;;  %v6708_v60 = vld [vmem:[%s6805_s6 + $0x20] sm:$0x1] }
 0x14b   : > { %6236 = vmatmul.mubr.msk.bf16.gmra.mrb[16].mxu0 %vm744_vm4, %v5700_v24  ;;  %v4012_v24 = vor.u32 %v4011_v46, %v4008_v36  ;;  %v4035_v5 = vrot.slane %v4033_v55, 5  ;;  %v4041_v23 = vrot.slane %v4039_v41, 5  ;;  %v4045_v30 = vrot.slane %v4043_v48, 4  ;;  %v6656_v36 = vld [vmem:[%s6805_s6 + $0xb4] sm:$0xff]   ;;  %v6657_v56 = vld [vmem:[%s6805_s6 + $0xc0] sm:$0xff]  }
 0x14c   : > { %6239 = vmatprep.mubr.msk.bf16.mxu0 %vm744_vm4, %v5701_v35  ;;  %v4023_v19 = vrot.slane %v4022_v6, 4  ;;  %v4027_v37 = vrot.slane %v4025_v26, 5  ;;  %v3994_v39 = vsel %vm6823_vm3, %v3989_v63, %v3993_v62  ;;  %v4004_v1 = vsel %vm6823_vm3, %v3999_v44, %v4003_v33  ;;  %v6709_v48 = vld [vmem:[%s6805_s6 + $0x28] sm:$0xf]  ;;  %v5724_v26 = vld [vmem:[%s6805_s6 + $0x24] sm:$0xe] }
 0x14d   : > { %v4013_v32 = vrot.slane %v4012_v24, 4  ;;  %v4036_v59 = vor.u32 %v4035_v5, %v4032_v42  ;;  %v4046_v61 = vor.u32 %v4045_v30, %v4041_v23  ;;  %v4049_v35 = vshll.u32 %v8274_v29, 16  ;;  %v8808_v33 = vld [vmem:[#allocation6_spill] sm:$0xff] }
 0x14e   : > { %v4028_v8 = vsel %vm6823_vm3, %v4023_v19, %v4027_v37  ;;  %v4413_v62 = vrot.slane %v6707_v12, 5  ;;  %v5704_v3 = vcombine.low %v3994_v39, %v4004_v1  ;;  %v5739_v34 = vrot.slane %v5723_v0, 9  ;;  %v8824_v39 = vld [vmem:[#allocation8_spill] sm:$0xff] }
 0x14f   : > { %v4018_v46 = vsel %vm6823_vm3, %v4013_v32, %v4017_v25  ;;  %v4037_v54 = vrot.slane %v4036_v59, 4  ;;  %v4047_v18 = vrot.slane %v4046_v61, 4  ;;  %v4051_v29 = vrot.slane %v4049_v35, 5  ;;  %v8827_v59 = vld [vmem:[#allocation11_spill] sm:$0xff] }
 0x150   : > { %6104 = vmatmul.mubr.msk.bf16.gmra.mrb[20].mxu1 %vm744_vm4, %v6653_v10  ;;  %v5705_v58 = vcombine.low %v4018_v46, %v4028_v8  ;;  %v4415_v25 = vrot.slane %v4413_v62, 4  ;;  %v4416_v10 = vrot.slane %v6708_v60, 5  ;;  %v4414_v24 = vsel %vm7235_vm7, %v5739_v34, %v4413_v62 }
 0x151   : > { %6107 = vmatprep.mubr.msk.bf16.mxu1 %vm744_vm4, %v6654_v16  ;;  %v4042_v55 = vsel %vm6823_vm3, %v4037_v54, %v4041_v23  ;;  %v4052_v41 = vsel %vm6823_vm3, %v4047_v18, %v4051_v29  ;;  %v4420_v16 = vrot.slane %v6709_v48, 5  ;;  %v5740_v63 = vrot.slane %v5724_v26, 9 }
 0x152   : > { %v4417_v6 = vsel %vm7235_vm7, %v4415_v25, %v4416_v10  ;;  %v4423_v42 = vrot.slane %v8808_v33, 5  ;;  %v8809_v30 = vcombine.low %v8077_v27, %v8091_v45  ;;  %v8810_v32 = vcombine.low %v8083_v17, %v8101_v51  ;;  %v8815_v45 = vld [vmem:[#allocation4_spill] sm:$0xff]  ;;  %v8816_v51 = vld [vmem:[#allocation2_spill] sm:$0xff] }
 0x153   : > { %6240 = vmatmul.mubr.msk.bf16.gmra.mrb[20].mxu0 %vm744_vm4, %v5702_v49  ;;  %v5706_v49 = vcombine.low %v4042_v55, %v4052_v41  ;;  %v4422_v44 = vrot.slane %v4420_v16, 4  ;;  %v4421_v20 = vsel %vm7235_vm7, %v5740_v63, %v4420_v16  ;;  %v8811_v19 = vcombine.low %v8105_v15, %v8117_v38 }
 0x154   : > { %6243 = vmatprep.mubr.msk.bf16.mxu0 %vm744_vm4, %v5703_v47  ;;  %v5756_v47 = vcombine.low %v4414_v24, %v4417_v6  ;;  %v8813_v27 = vcombine.low %v8136_v43, %v8148_v2  ;;  %v8814_v17 = vcombine.low %v8141_v21, %v8162_v14  ;;  %v8817_v15 = vcombine.low %v8815_v45, %v8816_v51  ;;  %v8819_v43 = vld [vmem:[#allocation3_spill] sm:$0xff]  ;;  %v8822_v14 = vld [vmem:[#allocation9_spill] sm:$0xff] }
 0x155   : > { %v4424_v5 = vsel %vm7235_vm7, %v4422_v44, %v4423_v42  ;;  %v4961_v38 = vsel %vm793_vm0, %v4904_v11, 0  ;;  %v8820_v2 = vcombine.low %v8818_v31, %v8819_v43  ;;  %v8821_v21 = vld [vmem:[#allocation7_spill] sm:$0xff]  ;;  %v8828_v61 = vcombine.low %v8245_v7, %v8827_v59 }
 0x156   : > { %v5757_v23 = vcombine.low %v4421_v20, %v4424_v5  ;;  %6286 = vmatpush3.bf16.msra.mxu1 %v4961_v38  ;;  %v8823_v37 = vcombine.low %v8821_v21, %v8822_v14  ;;  %v8829_v35 = vcombine.low %v8260_v13, %v8280_v4 }
 0x158   : > { %6108 = vmatmul.mubr.msk.bf16.gmra.mrb[24].mxu1 %vm744_vm4, %v6655_v50  ;;  %v8825_v50 = vld [vmem:[#allocation10_spill] sm:$0xff] }
 0x159   : > { %6111 = vmatprep.mubr.msk.bf16.mxu1 %vm744_vm4, %v6656_v36  ;;  %v8826_v1 = vcombine.low %v8824_v39, %v8825_v50 }
 0x15b   : > { %6244 = vmatmul.mubr.msk.bf16.gmra.mrb[24].mxu0 %vm744_vm4, %v5704_v3 }
 0x15c   : > { %6247 = vmatprep.mubr.msk.bf16.mxu0 %vm744_vm4, %v5705_v58 }
 0x160   : > { %6112 = vmatmul.mubr.msk.bf16.gmra.mrb[28].mxu1 %vm744_vm4, %v6657_v56 }
 0x163   : > { %6248 = vmatmul.mubr.msk.bf16.gmra.mrb[28].mxu0 %vm744_vm4, %v5706_v49 }
 0x164   : > { %6253 = vmatprep.mubr.msk.bf16.mxu0 %vm744_vm4, %v5756_v47  ;;  %v8554_v47 = vld [vmem:[%s8746_s2] ss:$0 sm:$0xff] }
 0x16b   : > { %6254 = vmatmul.mubr.msk.bf16.vlgmr.msra.gmra.mrb[0].mxu0 %vm744_vm4, %v5757_v23 }
 0x16c   : > { %6257 = vmatprep.mubr.msk.bf16.mxu0 %vm744_vm4, %v8809_v30 }
 0x173   : > { %6258 = vmatmul.mubr.msk.bf16.gmra.mrb[4].mxu0 %vm744_vm4, %v8810_v32 }
 0x174   : > { %6261 = vmatprep.mubr.msk.bf16.mxu0 %vm744_vm4, %v8811_v19 }
 0x17b   : > { %6262 = vmatmul.mubr.msk.bf16.gmra.mrb[8].mxu0 %vm744_vm4, %v8812_v57 }
 0x17c   : > { %6265 = vmatprep.mubr.msk.bf16.mxu0 %vm744_vm4, %v8813_v27 }
 0x183   : > { %6266 = vmatmul.mubr.msk.bf16.gmra.mrb[12].mxu0 %vm744_vm4, %v8814_v17 }
 0x184   : > { %6269 = vmatprep.mubr.msk.bf16.mxu0 %vm744_vm4, %v8817_v15 }
 0x18b   : > { %6270 = vmatmul.mubr.msk.bf16.gmra.mrb[16].mxu0 %vm744_vm4, %v8820_v2 }
 0x18c   : > { %6273 = vmatprep.mubr.msk.bf16.mxu0 %vm744_vm4, %v8823_v37 }
 0x193   : > { %6274 = vmatmul.mubr.msk.bf16.gmra.mrb[20].mxu0 %vm744_vm4, %v8826_v1 }
 0x194   : > { %6277 = vmatprep.mubr.msk.bf16.mxu0 %vm744_vm4, %v8828_v61 }
 0x19b   : > { %6278 = vmatmul.mubr.msk.bf16.gmra.mrb[24].mxu0 %vm744_vm4, %v8829_v35 }
 0x19c   : > { %6281 = vmatprep.mubr.msk.bf16.mxu0 %vm744_vm4, %v5770_v22 }
 0x1a3   : > { %6282 = vmatmul.mubr.msk.bf16.gmra.mrb[28].mxu0 %vm744_vm4, %v5771_v53 }
 0x1fb   : > { %v6085_v36 = vpop.f32.mrb[0].mxu1 }
 0x1fc   : > { %v1907_v46 = vpop.f32.mrb[1].mxu1 }
 0x1fd   : > { %v6086_v7 = vpop.f32.mrb[2].mxu1 }
 0x1fe   : > { %v1910_v8 = vpop.f32.mrb[3].mxu1 }
 0x203   : > { %v6089_v12 = vpop.f32.mrb[4].mxu1 }
 0x204   : > { %v1923_v62 = vpop.f32.mrb[5].mxu1 }
 0x205   : > { %v6090_v0 = vpop.f32.mrb[6].mxu1 }
 0x206   : > { %v1926_v13 = vpop.f32.mrb[7].mxu1 }
 0x20b   : > { %v8503_v4 = vpop.f32.mrb[8].mxu1 }
 0x20c   : > { %v8505_v3 = vpop.f32.mrb[9].mxu1 }
 0x20d   : > { %v8507_v40 = vpop.f32.mrb[10].mxu1 }
 0x20e   : > { %v8509_v52 = vpop.f32.mrb[11].mxu1 }
 0x213   : > { %v8511_v22 = vpop.f32.mrb[12].mxu1 }
 0x214   : > { %v8513_v28 = vpop.f32.mrb[13].mxu1 }
 0x215   : > { %v8515_v9 = vpop.f32.mrb[14].mxu1 }
 0x216   : > { %v8517_v53 = vpop.f32.mrb[15].mxu1 }
 0x21b   : > { %v8519_v58 = vpop.f32.mrb[16].mxu1 }
 0x21c   : > { %v8521_v54 = vpop.f32.mrb[17].mxu1 }
 0x21d   : > { %v8523_v18 = vpop.f32.mrb[18].mxu1 }
 0x21e   : > { %v8525_v29 = vpop.f32.mrb[19].mxu1 }
 0x223   : > { %v8527_v34 = vpop.f32.mrb[20].mxu1 }
 0x224   : > { %v8529_v25 = vpop.f32.mrb[21].mxu1 }
 0x225   : > { %v8531_v60 = vpop.f32.mrb[22].mxu1 }
 0x226   : > { %v8533_v10 = vpop.f32.mrb[23].mxu1 }
 0x22b   : > { %v8535_v56 = vpop.f32.mrb[24].mxu1 }
 0x22c   : > { %v8537_v55 = vpop.f32.mrb[25].mxu1 }
 0x22d   : > { %v8539_v41 = vpop.f32.mrb[26].mxu1 }
 0x22e   : > { %v8541_v48 = vpop.f32.mrb[27].mxu1 }
 0x233   : > { %v8543_v16 = vpop.f32.mrb[28].mxu1 }
 0x234   : > { %v8545_v24 = vpop.f32.mrb[29].mxu1 }
 0x235   : > { %v8547_v6 = vpop.f32.mrb[30].mxu1 }
 0x236   : > { %v8549_v26 = vpop.f32.mrb[31].mxu1 }
 0x23e   : > { %v6255_v49 = vpop.f32.mrb[0].mxu0 }
 0x23f   : > { %v6319_v63 = vadd.f32 %v6255_v49, %v6085_v36  ;;  %v4658_v44 = vpop.f32.mrb[1].mxu0 }
 0x240   : > { %v6320_v33 = vadd.f32 %v4658_v44, %v1907_v46  ;;  %v6256_v42 = vpop.f32.mrb[2].mxu0 }
 0x241   : > { %v4826_v20 = vadd.f32 %v6319_v63, %v8554_v47  ;;  %v6321_v5 = vadd.f32 %v6256_v42, %v6086_v7  ;;  %v4661_v23 = vpop.f32.mrb[3].mxu0 }
 0x242   : > { %v4824_v30 = vadd.f32 %v6320_v33, %v8554_v47  ;;  %v6322_v32 = vadd.f32 %v4661_v23, %v1910_v8 }
 0x243   : > { %v4827_v19 = vadd.f32 %v6321_v5, %v8554_v47  ;;  %v4858_v27 = vmax.f32 %v4826_v20, 0.0 }
 0x244   : > { %v4825_v57 = vadd.f32 %v6322_v32, %v8554_v47  ;;  %v4856_v45 = vmax.f32 %v4824_v30, 0.0 }
 0x245   : > { %v4859_v17 = vmax.f32 %v4827_v19, 0.0 }
 0x246   : > { %v4857_v51 = vmax.f32 %v4825_v57, 0.0  ;;  %v6259_v15 = vpop.f32.mrb[4].mxu0 }
 0x247   : > { %v4889_v11 = vpack.c.bf16 %v4859_v17, %v4858_v27  ;;  %v6323_v38 = vadd.f32 %v6259_v15, %v6089_v12  ;;  %v4674_v31 = vpop.f32.mrb[5].mxu0 }
 0x248   : > { %v4888_v43 = vpack.c.bf16 %v4857_v51, %v4856_v45  ;;  %v6324_v2 = vadd.f32 %v4674_v31, %v1923_v62  ;;  %v6260_v21 = vpop.f32.mrb[6].mxu0 }
 0x249   : > { %v4830_v14 = vadd.f32 %v6323_v38, %v8554_v47  ;;  %v6325_v37 = vadd.f32 %v6260_v21, %v6090_v0  ;;  %v4677_v39 = vpop.f32.mrb[7].mxu0 }
 0x24a   : > { %v4828_v50 = vadd.f32 %v6324_v2, %v8554_v47  ;;  %v6326_v1 = vadd.f32 %v4677_v39, %v1926_v13  ;;  %6287 = vmatprep.mubr.msk.bf16.mxu1 %vm744_vm4, %v4888_v43 }
 0x24b   : > { %v4831_v59 = vadd.f32 %v6325_v37, %v8554_v47  ;;  %6288 = vmatmul.mubr.msk.bf16.vlgmr.msra.gmra.mrb[32].mxu1 %vm744_vm4, %v4889_v11  ;;  %v4862_v35 = vmax.f32 %v4830_v14, 0.0 }
 0x24c   : > { %v4829_v61 = vadd.f32 %v6326_v1, %v8554_v47  ;;  %v4860_v46 = vmax.f32 %v4828_v50, 0.0 }
 0x24d   : > { %v4863_v36 = vmax.f32 %v4831_v59, 0.0 }
 0x24e   : > { %v4861_v7 = vmax.f32 %v4829_v61, 0.0  ;;  %v6263_v8 = vpop.f32.mrb[8].mxu0 }
 0x24f   : > { %v4891_v12 = vpack.c.bf16 %v4863_v36, %v4862_v35  ;;  %v6327_v62 = vadd.f32 %v6263_v8, %v8503_v4  ;;  %v4690_v0 = vpop.f32.mrb[9].mxu0 }
 0x250   : > { %v4890_v49 = vpack.c.bf16 %v4861_v7, %v4860_v46  ;;  %v6328_v13 = vadd.f32 %v4690_v0, %v8505_v3  ;;  %v6264_v63 = vpop.f32.mrb[10].mxu0 }
 0x251   : > { %v4834_v44 = vadd.f32 %v6327_v62, %v8554_v47  ;;  %v6329_v33 = vadd.f32 %v6264_v63, %v8507_v40  ;;  %v4693_v42 = vpop.f32.mrb[11].mxu0 }
 0x252   : > { %v4832_v20 = vadd.f32 %v6328_v13, %v8554_v47  ;;  %v6330_v5 = vadd.f32 %v4693_v42, %v8509_v52  ;;  %6291 = vmatprep.mubr.msk.bf16.mxu1 %vm744_vm4, %v4890_v49 }
 0x253   : > { %v4835_v23 = vadd.f32 %v6329_v33, %v8554_v47  ;;  %6292 = vmatmul.mubr.msk.bf16.gmra.mrb[36].mxu1 %vm744_vm4, %v4891_v12  ;;  %v4866_v30 = vmax.f32 %v4834_v44, 0.0 }
 0x254   : > { %v4833_v4 = vadd.f32 %v6330_v5, %v8554_v47  ;;  %v4864_v32 = vmax.f32 %v4832_v20, 0.0 }
 0x255   : > { %v4867_v3 = vmax.f32 %v4835_v23, 0.0 }
 0x256   : > { %v4865_v19 = vmax.f32 %v4833_v4, 0.0  ;;  %v6267_v57 = vpop.f32.mrb[12].mxu0 }
 0x257   : > { %v4893_v27 = vpack.c.bf16 %v4867_v3, %v4866_v30  ;;  %v6331_v40 = vadd.f32 %v6267_v57, %v8511_v22  ;;  %v4706_v17 = vpop.f32.mrb[13].mxu0 }
 0x258   : > { %v4892_v45 = vpack.c.bf16 %v4865_v19, %v4864_v32  ;;  %v6332_v52 = vadd.f32 %v4706_v17, %v8513_v28  ;;  %v6268_v51 = vpop.f32.mrb[14].mxu0 }
 0x259   : > { %v4838_v15 = vadd.f32 %v6331_v40, %v8554_v47  ;;  %v6333_v11 = vadd.f32 %v6268_v51, %v8515_v9  ;;  %v4709_v38 = vpop.f32.mrb[15].mxu0 }
 0x25a   : > { %v4836_v31 = vadd.f32 %v6332_v52, %v8554_v47  ;;  %v6334_v43 = vadd.f32 %v4709_v38, %v8517_v53  ;;  %6295 = vmatprep.mubr.msk.bf16.mxu1 %vm744_vm4, %v4892_v45 }
 0x25b   : > { %v4839_v2 = vadd.f32 %v6333_v11, %v8554_v47  ;;  %6296 = vmatmul.mubr.msk.bf16.gmra.mrb[40].mxu1 %vm744_vm4, %v4893_v27  ;;  %v4870_v21 = vmax.f32 %v4838_v15, 0.0 }
 0x25c   : > { %v4837_v22 = vadd.f32 %v6334_v43, %v8554_v47  ;;  %v4868_v14 = vmax.f32 %v4836_v31, 0.0 }
 0x25d   : > { %v4871_v28 = vmax.f32 %v4839_v2, 0.0 }
 0x25e   : > { %v4869_v37 = vmax.f32 %v4837_v22, 0.0  ;;  %v6271_v39 = vpop.f32.mrb[16].mxu0 }
 0x25f   : > { %v4895_v50 = vpack.c.bf16 %v4871_v28, %v4870_v21  ;;  %v6335_v9 = vadd.f32 %v6271_v39, %v8519_v58  ;;  %v4722_v1 = vpop.f32.mrb[17].mxu0 }
 0x260   : > { %v4894_v59 = vpack.c.bf16 %v4869_v37, %v4868_v14  ;;  %v6336_v53 = vadd.f32 %v4722_v1, %v8521_v54  ;;  %v6272_v61 = vpop.f32.mrb[18].mxu0 }
 0x261   : > { %v4842_v35 = vadd.f32 %v6335_v9, %v8554_v47  ;;  %v6337_v36 = vadd.f32 %v6272_v61, %v8523_v18  ;;  %v4725_v46 = vpop.f32.mrb[19].mxu0 }
 0x262   : > { %v4840_v7 = vadd.f32 %v6336_v53, %v8554_v47  ;;  %v6338_v8 = vadd.f32 %v4725_v46, %v8525_v29  ;;  %6299 = vmatprep.mubr.msk.bf16.mxu1 %vm744_vm4, %v4894_v59 }
 0x263   : > { %v4843_v12 = vadd.f32 %v6337_v36, %v8554_v47  ;;  %6300 = vmatmul.mubr.msk.bf16.gmra.mrb[44].mxu1 %vm744_vm4, %v4895_v50  ;;  %v4874_v62 = vmax.f32 %v4842_v35, 0.0 }
 0x264   : > { %v4841_v58 = vadd.f32 %v6338_v8, %v8554_v47  ;;  %v4872_v0 = vmax.f32 %v4840_v7, 0.0 }
 0x265   : > { %v4875_v54 = vmax.f32 %v4843_v12, 0.0 }
 0x266   : > { %v4873_v49 = vmax.f32 %v4841_v58, 0.0  ;;  %v6275_v13 = vpop.f32.mrb[20].mxu0 }
 0x267   : > { %v4897_v63 = vpack.c.bf16 %v4875_v54, %v4874_v62  ;;  %v6339_v18 = vadd.f32 %v6275_v13, %v8527_v34  ;;  %v4738_v44 = vpop.f32.mrb[21].mxu0 }
 0x268   : > { %v4896_v33 = vpack.c.bf16 %v4873_v49, %v4872_v0  ;;  %v6340_v29 = vadd.f32 %v4738_v44, %v8529_v25  ;;  %v6276_v42 = vpop.f32.mrb[22].mxu0 }
 0x269   : > { %v4846_v20 = vadd.f32 %v6339_v18, %v8554_v47  ;;  %v6341_v5 = vadd.f32 %v6276_v42, %v8531_v60  ;;  %v4741_v23 = vpop.f32.mrb[23].mxu0 }
 0x26a   : > { %v4844_v4 = vadd.f32 %v6340_v29, %v8554_v47  ;;  %v6342_v30 = vadd.f32 %v4741_v23, %v8533_v10  ;;  %6303 = vmatprep.mubr.msk.bf16.mxu1 %vm744_vm4, %v4896_v33 }
 0x26b   : > { %v4847_v3 = vadd.f32 %v6341_v5, %v8554_v47  ;;  %6304 = vmatmul.mubr.msk.bf16.gmra.mrb[48].mxu1 %vm744_vm4, %v4897_v63  ;;  %v4878_v32 = vmax.f32 %v4846_v20, 0.0 }
 0x26c   : > { %v4845_v34 = vadd.f32 %v6342_v30, %v8554_v47  ;;  %v4876_v19 = vmax.f32 %v4844_v4, 0.0 }
 0x26d   : > { %v4879_v25 = vmax.f32 %v4847_v3, 0.0 }
 0x26e   : > { %v4877_v57 = vmax.f32 %v4845_v34, 0.0  ;;  %v6279_v27 = vpop.f32.mrb[24].mxu0 }
 0x26f   : > { %v4899_v40 = vpack.c.bf16 %v4879_v25, %v4878_v32  ;;  %v6343_v60 = vadd.f32 %v6279_v27, %v8535_v56  ;;  %v4754_v17 = vpop.f32.mrb[25].mxu0 }
 0x270   : > { %v4898_v45 = vpack.c.bf16 %v4877_v57, %v4876_v19  ;;  %v6344_v10 = vadd.f32 %v4754_v17, %v8537_v55  ;;  %v6280_v52 = vpop.f32.mrb[26].mxu0 }
 0x271   : > { %v4850_v51 = vadd.f32 %v6343_v60, %v8554_v47  ;;  %v6345_v15 = vadd.f32 %v6280_v52, %v8539_v41  ;;  %v4757_v11 = vpop.f32.mrb[27].mxu0 }
 0x272   : > { %v4848_v38 = vadd.f32 %v6344_v10, %v8554_v47  ;;  %v6346_v31 = vadd.f32 %v4757_v11, %v8541_v48  ;;  %6307 = vmatprep.mubr.msk.bf16.mxu1 %vm744_vm4, %v4898_v45 }
 0x273   : > { %v4851_v43 = vadd.f32 %v6345_v15, %v8554_v47  ;;  %6308 = vmatmul.mubr.msk.bf16.gmra.mrb[52].mxu1 %vm744_vm4, %v4899_v40  ;;  %v4882_v2 = vmax.f32 %v4850_v51, 0.0 }
 0x274   : > { %v4849_v56 = vadd.f32 %v6346_v31, %v8554_v47  ;;  %v4880_v22 = vmax.f32 %v4848_v38, 0.0 }
 0x275   : > { %v4883_v55 = vmax.f32 %v4851_v43, 0.0 }
 0x276   : > { %v4881_v21 = vmax.f32 %v4849_v56, 0.0  ;;  %v6283_v28 = vpop.f32.mrb[28].mxu0 }
 0x277   : > { %v4901_v14 = vpack.c.bf16 %v4883_v55, %v4882_v2  ;;  %v6347_v41 = vadd.f32 %v6283_v28, %v8543_v16  ;;  %v4770_v37 = vpop.f32.mrb[29].mxu0 }
 0x278   : > { %v4900_v39 = vpack.c.bf16 %v4881_v21, %v4880_v22  ;;  %v6348_v48 = vadd.f32 %v4770_v37, %v8545_v24  ;;  %v6284_v50 = vpop.f32.mrb[30].mxu0 }
 0x279   : > { %v4854_v9 = vadd.f32 %v6347_v41, %v8554_v47  ;;  %v6349_v1 = vadd.f32 %v6284_v50, %v8547_v6  ;;  %v4773_v59 = vpop.f32.mrb[31].mxu0 }
 0x27a   : > { %v4852_v53 = vadd.f32 %v6348_v48, %v8554_v47  ;;  %v6350_v61 = vadd.f32 %v4773_v59, %v8549_v26  ;;  %6311 = vmatprep.mubr.msk.bf16.mxu1 %vm744_vm4, %v4900_v39  ;;  %v8632_v26 = vld [vmem:[%s8748_s4] ss:$0 sm:$0xff] }
 0x27b   : > { %v4855_v35 = vadd.f32 %v6349_v1, %v8554_v47  ;;  %6312 = vmatmul.mubr.msk.bf16.gmra.mrb[56].mxu1 %vm744_vm4, %v4901_v14  ;;  %v4886_v24 = vmax.f32 %v4854_v9, 0.0 }
 0x27c   : > { %v4853_v16 = vadd.f32 %v6350_v61, %v8554_v47  ;;  %v4884_v46 = vmax.f32 %v4852_v53, 0.0 }
 0x27d   : > { %v4887_v36 = vmax.f32 %v4855_v35, 0.0 }
 0x27e   : > { %v4885_v7 = vmax.f32 %v4853_v16, 0.0 }
 0x27f   : > { %v4903_v8 = vpack.c.bf16 %v4887_v36, %v4886_v24 }
 0x280   : > { %v4902_v6 = vpack.c.bf16 %v4885_v7, %v4884_v46 }
 0x282   : > { %6315 = vmatprep.mubr.msk.bf16.mxu1 %vm744_vm4, %v4902_v6 }
 0x283   : > { %6316 = vmatmul.mubr.msk.bf16.gmra.mrb[60].mxu1 %vm744_vm4, %v4903_v8 }
 0x31e   : > { %v6289_v47 = vpop.f32.mrb[32].mxu1 }
 0x31f   : > { %v5006_v12 = vadd.f32 %v6289_v47, %v8632_v26  ;;  %v4997_v58 = vpop.f32.mrb[33].mxu1 }
 0x320   : > { %v4998_v62 = vadd.f32 %v8632_v26, %v4997_v58  ;;  %v6290_v54 = vpop.f32.mrb[34].mxu1 }
 0x321   : > { %5127 = vst.msk [vmem:[%s8637_s7 + $0x10] sm:$0xff] %vm5124_vm8, %v5006_v12  ;;  %v5009_v0 = vadd.f32 %v6290_v54, %v8632_v26  ;;  %v5000_v49 = vpop.f32.mrb[35].mxu1 }
 0x322   : > { %5125 = vst.msk [vmem:[%s8637_s7] sm:$0xff] %vm5124_vm8, %v4998_v62  ;;  %v5001_v13 = vadd.f32 %v8632_v26, %v5000_v49 }
 0x323   : > { %5128 = vst.msk [vmem:[%s8637_s7 + $0x18] sm:$0xff] %vm5124_vm8, %v5009_v0 }
 0x324   : > { %5126 = vst.msk [vmem:[%s8637_s7 + $0x8] sm:$0xff] %vm5124_vm8, %v5001_v13 }
 0x326   : > { %v6293_v63 = vpop.f32.mrb[36].mxu1 }
 0x327   : > { %v5022_v18 = vadd.f32 %v6293_v63, %v8632_v26  ;;  %v5013_v44 = vpop.f32.mrb[37].mxu1 }
 0x328   : > { %v5014_v33 = vadd.f32 %v8632_v26, %v5013_v44  ;;  %v6294_v29 = vpop.f32.mrb[38].mxu1 }
 0x329   : > { %5131 = vst.msk [vmem:[%s8637_s7 + $0x30] sm:$0xff] %vm5124_vm8, %v5022_v18  ;;  %v5025_v42 = vadd.f32 %v6294_v29, %v8632_v26  ;;  %v5016_v20 = vpop.f32.mrb[39].mxu1 }
 0x32a   : > { %5129 = vst.msk [vmem:[%s8637_s7 + $0x20] sm:$0xff] %vm5124_vm8, %v5014_v33  ;;  %v5017_v5 = vadd.f32 %v8632_v26, %v5016_v20 }
 0x32b   : > { %5132 = vst.msk [vmem:[%s8637_s7 + $0x38] sm:$0xff] %vm5124_vm8, %v5025_v42 }
 0x32c   : > { %5130 = vst.msk [vmem:[%s8637_s7 + $0x28] sm:$0xff] %vm5124_vm8, %v5017_v5 }
 0x32e   : > { %v6297_v23 = vpop.f32.mrb[40].mxu1 }
 0x32f   : > { %v5038_v4 = vadd.f32 %v6297_v23, %v8632_v26  ;;  %v5029_v30 = vpop.f32.mrb[41].mxu1 }
 0x330   : > { %v5030_v3 = vadd.f32 %v8632_v26, %v5029_v30  ;;  %v6298_v34 = vpop.f32.mrb[42].mxu1 }
 0x331   : > { %5135 = vst.msk [vmem:[%s8637_s7 + $0x50] sm:$0xff] %vm5124_vm8, %v5038_v4  ;;  %v5041_v32 = vadd.f32 %v6298_v34, %v8632_v26  ;;  %v5032_v25 = vpop.f32.mrb[43].mxu1 }
 0x332   : > { %5133 = vst.msk [vmem:[%s8637_s7 + $0x40] sm:$0xff] %vm5124_vm8, %v5030_v3  ;;  %v5033_v19 = vadd.f32 %v8632_v26, %v5032_v25 }
 0x333   : > { %5136 = vst.msk [vmem:[%s8637_s7 + $0x58] sm:$0xff] %vm5124_vm8, %v5041_v32 }
 0x334   : > { %5134 = vst.msk [vmem:[%s8637_s7 + $0x48] sm:$0xff] %vm5124_vm8, %v5033_v19 }
 0x336   : > { %v6301_v57 = vpop.f32.mrb[44].mxu1 }
 0x337   : > { %v5054_v27 = vadd.f32 %v6301_v57, %v8632_v26  ;;  %v5045_v40 = vpop.f32.mrb[45].mxu1 }
 0x338   : > { %v5046_v60 = vadd.f32 %v8632_v26, %v5045_v40  ;;  %v6302_v17 = vpop.f32.mrb[46].mxu1 }
 0x339   : > { %5139 = vst.msk [vmem:[%s8637_s7 + $0x70] sm:$0xff] %vm5124_vm8, %v5054_v27  ;;  %v5057_v45 = vadd.f32 %v6302_v17, %v8632_v26  ;;  %v5048_v10 = vpop.f32.mrb[47].mxu1 }
 0x33a   : > { %5137 = vst.msk [vmem:[%s8637_s7 + $0x60] sm:$0xff] %vm5124_vm8, %v5046_v60  ;;  %v5049_v52 = vadd.f32 %v8632_v26, %v5048_v10 }
 0x33b   : > { %5140 = vst.msk [vmem:[%s8637_s7 + $0x78] sm:$0xff] %vm5124_vm8, %v5057_v45 }
 0x33c   : > { %5138 = vst.msk [vmem:[%s8637_s7 + $0x68] sm:$0xff] %vm5124_vm8, %v5049_v52 }
 0x33e   : > { %v6305_v51 = vpop.f32.mrb[48].mxu1 }
 0x33f   : > { %v5070_v15 = vadd.f32 %v6305_v51, %v8632_v26  ;;  %v5061_v11 = vpop.f32.mrb[49].mxu1 }
 0x340   : > { %v5062_v38 = vadd.f32 %v8632_v26, %v5061_v11  ;;  %v6306_v31 = vpop.f32.mrb[50].mxu1 }
 0x341   : > { %5143 = vst.msk [vmem:[%s8637_s7 + $0x90] sm:$0xff] %vm5124_vm8, %v5070_v15  ;;  %v5073_v43 = vadd.f32 %v6306_v31, %v8632_v26  ;;  %v5064_v56 = vpop.f32.mrb[51].mxu1 }
 0x342   : > { %5141 = vst.msk [vmem:[%s8637_s7 + $0x80] sm:$0xff] %vm5124_vm8, %v5062_v38  ;;  %v5065_v2 = vadd.f32 %v8632_v26, %v5064_v56 }
 0x343   : > { %5144 = vst.msk [vmem:[%s8637_s7 + $0x98] sm:$0xff] %vm5124_vm8, %v5073_v43 }
 0x344   : > { %5142 = vst.msk [vmem:[%s8637_s7 + $0x88] sm:$0xff] %vm5124_vm8, %v5065_v2 }
 0x346   : > { %v6309_v55 = vpop.f32.mrb[52].mxu1 }
 0x347   : > { %v5086_v22 = vadd.f32 %v6309_v55, %v8632_v26  ;;  %v5077_v21 = vpop.f32.mrb[53].mxu1 }
 0x348   : > { %v5078_v28 = vadd.f32 %v8632_v26, %v5077_v21  ;;  %v6310_v14 = vpop.f32.mrb[54].mxu1 }
 0x349   : > { %5147 = vst.msk [vmem:[%s8637_s7 + $0xb0] sm:$0xff] %vm5124_vm8, %v5086_v22  ;;  %v5089_v41 = vadd.f32 %v6310_v14, %v8632_v26  ;;  %v5080_v37 = vpop.f32.mrb[55].mxu1 }
 0x34a   : > { %5145 = vst.msk [vmem:[%s8637_s7 + $0xa0] sm:$0xff] %vm5124_vm8, %v5078_v28  ;;  %v5081_v39 = vadd.f32 %v8632_v26, %v5080_v37 }
 0x34b   : > { %5148 = vst.msk [vmem:[%s8637_s7 + $0xb8] sm:$0xff] %vm5124_vm8, %v5089_v41 }
 0x34c   : > { %5146 = vst.msk [vmem:[%s8637_s7 + $0xa8] sm:$0xff] %vm5124_vm8, %v5081_v39 }
 0x34e   : > { %v6313_v48 = vpop.f32.mrb[56].mxu1 }
 0x34f   : > { %v5102_v50 = vadd.f32 %v6313_v48, %v8632_v26  ;;  %v5093_v9 = vpop.f32.mrb[57].mxu1 }
 0x350   : > { %v5094_v1 = vadd.f32 %v8632_v26, %v5093_v9  ;;  %v6314_v59 = vpop.f32.mrb[58].mxu1 }
 0x351   : > { %5151 = vst.msk [vmem:[%s8637_s7 + $0xd0] sm:$0xff] %vm5124_vm8, %v5102_v50  ;;  %v5105_v53 = vadd.f32 %v6314_v59, %v8632_v26  ;;  %v5096_v61 = vpop.f32.mrb[59].mxu1 }
 0x352   : > { %5149 = vst.msk [vmem:[%s8637_s7 + $0xc0] sm:$0xff] %vm5124_vm8, %v5094_v1  ;;  %v5097_v35 = vadd.f32 %v8632_v26, %v5096_v61 }
 0x353   : > { %5152 = vst.msk [vmem:[%s8637_s7 + $0xd8] sm:$0xff] %vm5124_vm8, %v5105_v53 }
 0x354   : > { %5150 = vst.msk [vmem:[%s8637_s7 + $0xc8] sm:$0xff] %vm5124_vm8, %v5097_v35 }
 0x356   : > { %v6317_v16 = vpop.f32.mrb[60].mxu1 }
 0x357   : > { %v5118_v24 = vadd.f32 %v6317_v16, %v8632_v26  ;;  %v5109_v36 = vpop.f32.mrb[61].mxu1 }
 0x358   : > { %v5110_v46 = vadd.f32 %v8632_v26, %v5109_v36  ;;  %v6318_v7 = vpop.f32.mrb[62].mxu1 }
 0x359   : > { %5155 = vst.msk [vmem:[%s8637_s7 + $0xf0] sm:$0xff] %vm5124_vm8, %v5118_v24  ;;  %v5121_v8 = vadd.f32 %v6318_v7, %v8632_v26  ;;  %v5112_v6 = vpop.f32.mrb[63].mxu1 }
 0x35a   : > { %5153 = vst.msk [vmem:[%s8637_s7 + $0xe0] sm:$0xff] %vm5124_vm8, %v5110_v46  ;;  %v5113_v47 = vadd.f32 %v8632_v26, %v5112_v6 }
 0x35b   : > { %5156 = vst.msk [vmem:[%s8637_s7 + $0xf8] sm:$0xff] %vm5124_vm8, %v5121_v8 }
 0x35c   : > { %5154 = vst.msk [vmem:[%s8637_s7 + $0xe8] sm:$0xff] %vm5124_vm8, %v5113_v47 }
 0x35d PF: > { %s15_s20 = sadd.s32 1, %s6732_s20   ;;  %s8830_s18 = smov %s6728_s19 }
 0x35e   : > { %p12_p5 = scmp.ge.s32.totalorder %s15_s20, 4   ;;  %s8831_s19 = smov %s8833_s21 }
 0x360   :  { %14 = sbr.rel (!%p12_p5) target bundleno = 2 (0x2), region = 80 }

</bundles_post_ra>
